<compile_context>
chip_gen: v7x
topology: tpu7x:2x2x1
jax: 0.10.0
libtpu: 0.0.40
codegen_flags: <defaults>
</compile_context>

<pallas_src>
import functools

import jax
import jax.numpy as jnp
from jax.experimental import pallas as pl
from jax.experimental.pallas import tpu as pltpu


def _fused_kernel(x_ref, w_ref, b_ref, m_ref, o_ref, feat_ref, *, W, num_blocks):
    """Fused forward for one batch element.

    x_ref   : (1, C, H*W)      input, channels zero-padded to C, NCHW-flat
    w_ref   : (L, 3, C, 3*C)   per-layer, per-ky weight slabs (L = 2*num_blocks+1)
    b_ref   : (L, C, 1)        biases
    m_ref   : (9, H*W)         1.0 where the (ky,kx) tap is inside the image
    o_ref   : (1, C, H*W)      output (NCHW-flat)
    feat_ref: VMEM (C, H*W)    resident feature map between layers
    """
    masks = m_ref[...]                                        # (9, HW)

    def conv3x3(feat, layer, act):
        """3x3 'same' conv of feat (C, HW); fused bias + activation."""
        acc = None
        for ky in range(3):
            taps = []
            for kx in range(3):
                t = ky * 3 + kx
                shift = (ky - 1) * W + (kx - 1)               # flat offset of this tap
                shifted = feat if shift == 0 else jnp.roll(feat, -shift, axis=1)
                taps.append(shifted * masks[t:t + 1, :])      # zero out-of-image taps
            patch = jnp.concatenate(taps, axis=0)             # (3*C, HW) im2col slab
            w_slab = w_ref[layer, ky]                         # (C, 3*C)
            part = jnp.dot(w_slab, patch, preferred_element_type=jnp.float32)
            acc = part if acc is None else acc + part
        acc = acc + b_ref[layer]                              # (C, 1) broadcast
        if act == "relu":
            acc = jnp.maximum(acc, 0.0)
        elif act == "lrelu":
            acc = jnp.where(acc >= 0.0, acc, 0.1 * acc)
        return acc

    # Input conv + LeakyReLU(0.1)
    feat_ref[...] = conv3x3(x_ref[0], 0, "lrelu")
    # num_blocks x ResidualBlockNoBN: x + conv2(relu(conv1(x)))   (res_scale = 1.0)
    for blk in range(num_blocks):
        h = conv3x3(feat_ref[...], 1 + 2 * blk, "relu")
        out2 = conv3x3(h, 2 + 2 * blk, "none")
        feat_ref[...] = feat_ref[...] + out2

    o_ref[0] = feat_ref[...].astype(o_ref.dtype)


def _flatten_hwio(w_hwio):
    """HWIO (3,3,Cin,Cout) -> (3, Cout, 3*Cin): per-ky slabs, columns = (kx, cin)."""
    kh, kw, cin, cout = w_hwio.shape
    w = w_hwio.reshape(kh * kw * cin, cout).T                 # (Cout, 9*Cin)
    return w.reshape(cout, kh, kw * cin).transpose(1, 0, 2)   # (3, Cout, 3*Cin)


def _tap_masks(H, W):
    """(9, H*W) validity masks for the 9 conv taps (zero 'same' padding)."""
    ys = jnp.arange(H, dtype=jnp.int32)[:, None]
    xs = jnp.arange(W, dtype=jnp.int32)[None, :]
    rows = []
    for ky in range(3):
        for kx in range(3):
            dy, dx = ky - 1, kx - 1
            ok = (ys + dy >= 0) & (ys + dy < H) & (xs + dx >= 0) & (xs + dx < W)
            rows.append(ok.reshape(H * W))
    return jnp.stack(rows).astype(jnp.float32)


def residual_blocks_with_input_conv(x_nchw, params):
    """Forward pass equivalent to ResidualBlocksWithInputConv.forward (NCHW in/out)."""
    N, Cin, H, W = x_nchw.shape
    C = params["conv_in_w"].shape[-1]
    num_blocks = len(params["blocks"])
    L = 1 + 2 * num_blocks
    HW = H * W
    # TODO(synk): in_channels > out_channels would need a separate first-layer path.
    assert Cin <= C, "fused kernel assumes in_channels <= out_channels"

    # Fold the Cin-channel input conv into the common C-channel path (zero pad).
    w_in = jnp.pad(params["conv_in_w"], ((0, 0), (0, 0), (0, C - Cin), (0, 0)))
    all_w = jnp.stack(
        [_flatten_hwio(w_in)]
        + [_flatten_hwio(blk[k]) for blk in params["blocks"] for k in ("w1", "w2")]
    )                                                          # (L, 3, C, 3*C)
    all_b = jnp.stack(
        [params["conv_in_b"]]
        + [blk[k] for blk in params["blocks"] for k in ("b1", "b2")]
    )[:, :, None]                                              # (L, C, 1)
    masks = _tap_masks(H, W)                                   # (9, HW)
    x_flat = jnp.pad(x_nchw, ((0, 0), (0, C - Cin), (0, 0), (0, 0))).reshape(N, C, HW)

    kernel = functools.partial(_fused_kernel, W=W, num_blocks=num_blocks)
    out = pl.pallas_call(
        kernel,
        out_shape=jax.ShapeDtypeStruct((N, C, HW), jnp.float32),
        grid_spec=pltpu.PrefetchScalarGridSpec(
            num_scalar_prefetch=0,
            grid=(N,),                                         # batch; shards across TCs on v7x
            in_specs=[
                pl.BlockSpec((1, C, HW), lambda n: (n, 0, 0)),
                pl.BlockSpec((L, 3, C, 3 * C), lambda n: (0, 0, 0, 0)),  # weights: loaded once
                pl.BlockSpec((L, C, 1), lambda n: (0, 0, 0)),
                pl.BlockSpec((9, HW), lambda n: (0, 0)),
            ],
            out_specs=pl.BlockSpec((1, C, HW), lambda n: (n, 0, 0)),
            scratch_shapes=[pltpu.VMEM((C, HW), jnp.float32)],           # resident feature map
        ),
        compiler_params=pltpu.CompilerParams(
            dimension_semantics=("parallel",),
            vmem_limit_bytes=64 * 1024 * 1024),
    )(x_flat, all_w, all_b, masks)
    return out.reshape(N, C, H, W)


def init_params(key, in_channels, out_channels, num_blocks):
    """Synthetic init mirroring the PyTorch module's shapes (HWIO weights).

    Input conv ~ 1/sqrt(fan_in) scale; residual-block convs use kaiming_normal*0.1
    (as in ResidualBlockNoBN.init_weights); biases = 0.
    """
    keys = jax.random.split(key, 1 + 2 * num_blocks)
    fan_in_first = in_channels * 9
    params = {
        "conv_in_w": jax.random.normal(
            keys[0], (3, 3, in_channels, out_channels), jnp.float32)
        / jnp.sqrt(fan_in_first),
        "conv_in_b": jnp.zeros((out_channels,), jnp.float32),
        "blocks": [],
    }
    fan_in_blk = out_channels * 9
    std_blk = 0.1 * jnp.sqrt(2.0 / fan_in_blk)
    for i in range(num_blocks):
        params["blocks"].append({
            "w1": std_blk * jax.random.normal(
                keys[1 + 2 * i], (3, 3, out_channels, out_channels), jnp.float32),
            "b1": jnp.zeros((out_channels,), jnp.float32),
            "w2": std_blk * jax.random.normal(
                keys[2 + 2 * i], (3, 3, out_channels, out_channels), jnp.float32),
            "b2": jnp.zeros((out_channels,), jnp.float32),
        })
    return params


def _reference_forward(x_nchw, params):
    """Pure-JAX/XLA reference of the PyTorch module (f32, no Pallas)."""
    def conv(x, w_hwio, b):
        y = jax.lax.conv_general_dilated(
            x, w_hwio, window_strides=(1, 1), padding=((1, 1), (1, 1)),
            dimension_numbers=("NCHW", "HWIO", "NCHW"),
            precision=jax.lax.Precision.HIGHEST)
        return y + b[None, :, None, None]

    feat = conv(x_nchw, params["conv_in_w"], params["conv_in_b"])
    feat = jnp.where(feat >= 0.0, feat, 0.1 * feat)
    for blk in params["blocks"]:
        h = jnp.maximum(conv(feat, blk["w1"], blk["b1"]), 0.0)
        feat = feat + conv(h, blk["w2"], blk["b2"])
    return feat


if __name__ == "__main__":
    # Small shapes consistent with the module: (n, c, h, w)
    N, IN_C, OUT_C, NUM_BLOCKS, H, W = 2, 4, 32, 2, 16, 16

    key = jax.random.PRNGKey(0)
    k_x, k_p = jax.random.split(key)
    x = jax.random.normal(k_x, (N, IN_C, H, W), jnp.float32)
    params = init_params(k_p, IN_C, OUT_C, NUM_BLOCKS)

    out = jax.jit(residual_blocks_with_input_conv)(x, params)
    out = jax.block_until_ready(out)
    assert out.shape == (N, OUT_C, H, W), out.shape
    assert out.dtype == jnp.float32

    ref = _reference_forward(x, params)
    err = float(jnp.max(jnp.abs(out - ref)))
    assert err < 1e-3, f"max abs error vs reference: {err}"
    print("KERNEL_OK")
</pallas_src>

<mosaic_0001>
module attributes {stable_mosaic.version = 11 : i64} {
  func.func @_fused_kernel(%arg0: i32, %arg1: memref<1x32x256xf32, #tpu.memory_space<vmem>>, %arg2: memref<5x3x32x96xf32, #tpu.memory_space<vmem>>, %arg3: memref<5x32x1xf32, #tpu.memory_space<vmem>>, %arg4: memref<9x256xf32, #tpu.memory_space<vmem>>, %arg5: memref<1x32x256xf32, #tpu.memory_space<vmem>>, %arg6: memref<32x256xf32, #tpu.memory_space<vmem>>) attributes {dimension_semantics = [#tpu.dimension_semantics<parallel>], iteration_bounds = array<i64: 2>, scalar_prefetch = 0 : i64, scratch_operands = 1 : i64, tpu.core_type = #tpu.core_type<tc>, window_params = [{transform_indices = @transform_0, window_bounds = array<i64: 1, 32, 256>}, {pipeline_mode = #tpu.pipeline_mode<synchronous>, transform_indices = @transform_1, window_bounds = array<i64: 5, 3, 32, 96>}, {pipeline_mode = #tpu.pipeline_mode<synchronous>, transform_indices = @transform_2, window_bounds = array<i64: 5, 32, 1>}, {pipeline_mode = #tpu.pipeline_mode<synchronous>, transform_indices = @transform_3, window_bounds = array<i64: 9, 256>}, {transform_indices = @transform_4, window_bounds = array<i64: 1, 32, 256>}]} {
    %c0 = arith.constant 0 : index
    %c0_0 = arith.constant 0 : index
    %0 = vector.load %arg4[%c0, %c0_0] : memref<9x256xf32, #tpu.memory_space<vmem>>, vector<9x256xf32>
    %c0_1 = arith.constant 0 : index
    %c0_2 = arith.constant 0 : index
    %c0_3 = arith.constant 0 : index
    %1 = vector.load %arg1[%c0_1, %c0_2, %c0_3] : memref<1x32x256xf32, #tpu.memory_space<vmem>>, vector<1x32x256xf32>
    %2 = vector.shape_cast %1 : vector<1x32x256xf32> to vector<32x256xf32>
    %3 = vector.extract_strided_slice %2 {offsets = [0, 239], sizes = [32, 17], strides = [1, 1]} : vector<32x256xf32> to vector<32x17xf32>
    %4 = vector.extract_strided_slice %2 {offsets = [0, 0], sizes = [32, 239], strides = [1, 1]} : vector<32x256xf32> to vector<32x239xf32>
    %5 = tpu.concatenate %3, %4 in 1 : vector<32x17xf32>, vector<32x239xf32> -> vector<32x256xf32>
    %6 = vector.extract_strided_slice %0 {offsets = [0, 0], sizes = [1, 256], strides = [1, 1]} : vector<9x256xf32> to vector<1x256xf32>
    %7 = vector.broadcast %6 : vector<1x256xf32> to vector<32x256xf32>
    %8 = arith.mulf %5, %7 : vector<32x256xf32>
    %9 = vector.extract_strided_slice %2 {offsets = [0, 240], sizes = [32, 16], strides = [1, 1]} : vector<32x256xf32> to vector<32x16xf32>
    %10 = vector.extract_strided_slice %2 {offsets = [0, 0], sizes = [32, 240], strides = [1, 1]} : vector<32x256xf32> to vector<32x240xf32>
    %11 = tpu.concatenate %9, %10 in 1 : vector<32x16xf32>, vector<32x240xf32> -> vector<32x256xf32>
    %12 = vector.extract_strided_slice %0 {offsets = [1, 0], sizes = [1, 256], strides = [1, 1]} : vector<9x256xf32> to vector<1x256xf32>
    %13 = vector.broadcast %12 : vector<1x256xf32> to vector<32x256xf32>
    %14 = arith.mulf %11, %13 : vector<32x256xf32>
    %15 = vector.extract_strided_slice %2 {offsets = [0, 241], sizes = [32, 15], strides = [1, 1]} : vector<32x256xf32> to vector<32x15xf32>
    %16 = vector.extract_strided_slice %2 {offsets = [0, 0], sizes = [32, 241], strides = [1, 1]} : vector<32x256xf32> to vector<32x241xf32>
    %17 = tpu.concatenate %15, %16 in 1 : vector<32x15xf32>, vector<32x241xf32> -> vector<32x256xf32>
    %18 = vector.extract_strided_slice %0 {offsets = [2, 0], sizes = [1, 256], strides = [1, 1]} : vector<9x256xf32> to vector<1x256xf32>
    %19 = vector.broadcast %18 : vector<1x256xf32> to vector<32x256xf32>
    %20 = arith.mulf %17, %19 : vector<32x256xf32>
    %21 = tpu.concatenate %8, %14, %20 in 0 : vector<32x256xf32>, vector<32x256xf32>, vector<32x256xf32> -> vector<96x256xf32>
    %c0_4 = arith.constant 0 : index
    %c0_5 = arith.constant 0 : index
    %c0_6 = arith.constant 0 : index
    %c0_7 = arith.constant 0 : index
    %22 = vector.load %arg2[%c0_4, %c0_5, %c0_6, %c0_7] : memref<5x3x32x96xf32, #tpu.memory_space<vmem>>, vector<1x1x32x96xf32>
    %23 = vector.shape_cast %22 : vector<1x1x32x96xf32> to vector<32x96xf32>
    %cst = arith.constant dense<0.000000e+00> : vector<32x256xf32>
    %24 = tpu.matmul %23, %21, %cst {dimension_numbers = #tpu.dot_dimension_numbers<[1], [0], [0], [1], [0, 0, 1, 1], [], []>} : vector<32x96xf32>, vector<96x256xf32>, vector<32x256xf32> -> vector<32x256xf32>
    %25 = vector.extract_strided_slice %2 {offsets = [0, 255], sizes = [32, 1], strides = [1, 1]} : vector<32x256xf32> to vector<32x1xf32>
    %26 = vector.extract_strided_slice %2 {offsets = [0, 0], sizes = [32, 255], strides = [1, 1]} : vector<32x256xf32> to vector<32x255xf32>
    %27 = tpu.concatenate %25, %26 in 1 : vector<32x1xf32>, vector<32x255xf32> -> vector<32x256xf32>
    %28 = vector.extract_strided_slice %0 {offsets = [3, 0], sizes = [1, 256], strides = [1, 1]} : vector<9x256xf32> to vector<1x256xf32>
    %29 = vector.broadcast %28 : vector<1x256xf32> to vector<32x256xf32>
    %30 = arith.mulf %27, %29 : vector<32x256xf32>
    %31 = vector.extract_strided_slice %0 {offsets = [4, 0], sizes = [1, 256], strides = [1, 1]} : vector<9x256xf32> to vector<1x256xf32>
    %32 = vector.broadcast %31 : vector<1x256xf32> to vector<32x256xf32>
    %33 = arith.mulf %2, %32 : vector<32x256xf32>
    %34 = vector.extract_strided_slice %2 {offsets = [0, 1], sizes = [32, 255], strides = [1, 1]} : vector<32x256xf32> to vector<32x255xf32>
    %35 = vector.extract_strided_slice %2 {offsets = [0, 0], sizes = [32, 1], strides = [1, 1]} : vector<32x256xf32> to vector<32x1xf32>
    %36 = tpu.concatenate %34, %35 in 1 : vector<32x255xf32>, vector<32x1xf32> -> vector<32x256xf32>
    %37 = vector.extract_strided_slice %0 {offsets = [5, 0], sizes = [1, 256], strides = [1, 1]} : vector<9x256xf32> to vector<1x256xf32>
    %38 = vector.broadcast %37 : vector<1x256xf32> to vector<32x256xf32>
    %39 = arith.mulf %36, %38 : vector<32x256xf32>
    %40 = tpu.concatenate %30, %33, %39 in 0 : vector<32x256xf32>, vector<32x256xf32>, vector<32x256xf32> -> vector<96x256xf32>
    %c0_8 = arith.constant 0 : index
    %c1 = arith.constant 1 : index
    %c0_9 = arith.constant 0 : index
    %c0_10 = arith.constant 0 : index
    %41 = vector.load %arg2[%c0_8, %c1, %c0_9, %c0_10] : memref<5x3x32x96xf32, #tpu.memory_space<vmem>>, vector<1x1x32x96xf32>
    %42 = vector.shape_cast %41 : vector<1x1x32x96xf32> to vector<32x96xf32>
    %cst_11 = arith.constant dense<0.000000e+00> : vector<32x256xf32>
    %43 = tpu.matmul %42, %40, %cst_11 {dimension_numbers = #tpu.dot_dimension_numbers<[1], [0], [0], [1], [0, 0, 1, 1], [], []>} : vector<32x96xf32>, vector<96x256xf32>, vector<32x256xf32> -> vector<32x256xf32>
    %44 = arith.addf %24, %43 : vector<32x256xf32>
    %45 = vector.extract_strided_slice %2 {offsets = [0, 15], sizes = [32, 241], strides = [1, 1]} : vector<32x256xf32> to vector<32x241xf32>
    %46 = vector.extract_strided_slice %2 {offsets = [0, 0], sizes = [32, 15], strides = [1, 1]} : vector<32x256xf32> to vector<32x15xf32>
    %47 = tpu.concatenate %45, %46 in 1 : vector<32x241xf32>, vector<32x15xf32> -> vector<32x256xf32>
    %48 = vector.extract_strided_slice %0 {offsets = [6, 0], sizes = [1, 256], strides = [1, 1]} : vector<9x256xf32> to vector<1x256xf32>
    %49 = vector.broadcast %48 : vector<1x256xf32> to vector<32x256xf32>
    %50 = arith.mulf %47, %49 : vector<32x256xf32>
    %51 = vector.extract_strided_slice %2 {offsets = [0, 16], sizes = [32, 240], strides = [1, 1]} : vector<32x256xf32> to vector<32x240xf32>
    %52 = vector.extract_strided_slice %2 {offsets = [0, 0], sizes = [32, 16], strides = [1, 1]} : vector<32x256xf32> to vector<32x16xf32>
    %53 = tpu.concatenate %51, %52 in 1 : vector<32x240xf32>, vector<32x16xf32> -> vector<32x256xf32>
    %54 = vector.extract_strided_slice %0 {offsets = [7, 0], sizes = [1, 256], strides = [1, 1]} : vector<9x256xf32> to vector<1x256xf32>
    %55 = vector.broadcast %54 : vector<1x256xf32> to vector<32x256xf32>
    %56 = arith.mulf %53, %55 : vector<32x256xf32>
    %57 = vector.extract_strided_slice %2 {offsets = [0, 17], sizes = [32, 239], strides = [1, 1]} : vector<32x256xf32> to vector<32x239xf32>
    %58 = vector.extract_strided_slice %2 {offsets = [0, 0], sizes = [32, 17], strides = [1, 1]} : vector<32x256xf32> to vector<32x17xf32>
    %59 = tpu.concatenate %57, %58 in 1 : vector<32x239xf32>, vector<32x17xf32> -> vector<32x256xf32>
    %60 = vector.extract_strided_slice %0 {offsets = [8, 0], sizes = [1, 256], strides = [1, 1]} : vector<9x256xf32> to vector<1x256xf32>
    %61 = vector.broadcast %60 : vector<1x256xf32> to vector<32x256xf32>
    %62 = arith.mulf %59, %61 : vector<32x256xf32>
    %63 = tpu.concatenate %50, %56, %62 in 0 : vector<32x256xf32>, vector<32x256xf32>, vector<32x256xf32> -> vector<96x256xf32>
    %c0_12 = arith.constant 0 : index
    %c2 = arith.constant 2 : index
    %c0_13 = arith.constant 0 : index
    %c0_14 = arith.constant 0 : index
    %64 = vector.load %arg2[%c0_12, %c2, %c0_13, %c0_14] : memref<5x3x32x96xf32, #tpu.memory_space<vmem>>, vector<1x1x32x96xf32>
    %65 = vector.shape_cast %64 : vector<1x1x32x96xf32> to vector<32x96xf32>
    %cst_15 = arith.constant dense<0.000000e+00> : vector<32x256xf32>
    %66 = tpu.matmul %65, %63, %cst_15 {dimension_numbers = #tpu.dot_dimension_numbers<[1], [0], [0], [1], [0, 0, 1, 1], [], []>} : vector<32x96xf32>, vector<96x256xf32>, vector<32x256xf32> -> vector<32x256xf32>
    %67 = arith.addf %44, %66 : vector<32x256xf32>
    %c0_16 = arith.constant 0 : index
    %c0_17 = arith.constant 0 : index
    %c0_18 = arith.constant 0 : index
    %68 = vector.load %arg3[%c0_16, %c0_17, %c0_18] : memref<5x32x1xf32, #tpu.memory_space<vmem>>, vector<1x32x1xf32>
    %69 = vector.shape_cast %68 : vector<1x32x1xf32> to vector<32x1xf32>
    %70 = vector.broadcast %69 : vector<32x1xf32> to vector<32x256xf32>
    %71 = arith.addf %67, %70 : vector<32x256xf32>
    %cst_19 = arith.constant 0.000000e+00 : f32
    %72 = vector.broadcast %cst_19 : f32 to vector<32x256xf32>
    %73 = arith.cmpf oge, %71, %72 : vector<32x256xf32>
    %cst_20 = arith.constant 1.000000e-01 : f32
    %74 = vector.broadcast %cst_20 : f32 to vector<32x256xf32>
    %75 = arith.mulf %74, %71 : vector<32x256xf32>
    %76 = arith.select %73, %71, %75 : vector<32x256xi1>, vector<32x256xf32>
    %c0_21 = arith.constant 0 : index
    %c0_22 = arith.constant 0 : index
    %77 = vector.load %arg6[%c0_21, %c0_22] : memref<32x256xf32, #tpu.memory_space<vmem>>, vector<32x256xf32>
    tpu.vector_store %arg6[%c0_21, %c0_22], %76 {strides = array<i32>} : memref<32x256xf32, #tpu.memory_space<vmem>>, vector<32x256xf32>,
    %c0_23 = arith.constant 0 : index
    %c0_24 = arith.constant 0 : index
    %78 = vector.load %arg6[%c0_23, %c0_24] : memref<32x256xf32, #tpu.memory_space<vmem>>, vector<32x256xf32>
    %79 = vector.extract_strided_slice %78 {offsets = [0, 239], sizes = [32, 17], strides = [1, 1]} : vector<32x256xf32> to vector<32x17xf32>
    %80 = vector.extract_strided_slice %78 {offsets = [0, 0], sizes = [32, 239], strides = [1, 1]} : vector<32x256xf32> to vector<32x239xf32>
    %81 = tpu.concatenate %79, %80 in 1 : vector<32x17xf32>, vector<32x239xf32> -> vector<32x256xf32>
    %82 = vector.extract_strided_slice %0 {offsets = [0, 0], sizes = [1, 256], strides = [1, 1]} : vector<9x256xf32> to vector<1x256xf32>
    %83 = vector.broadcast %82 : vector<1x256xf32> to vector<32x256xf32>
    %84 = arith.mulf %81, %83 : vector<32x256xf32>
    %85 = vector.extract_strided_slice %78 {offsets = [0, 240], sizes = [32, 16], strides = [1, 1]} : vector<32x256xf32> to vector<32x16xf32>
    %86 = vector.extract_strided_slice %78 {offsets = [0, 0], sizes = [32, 240], strides = [1, 1]} : vector<32x256xf32> to vector<32x240xf32>
    %87 = tpu.concatenate %85, %86 in 1 : vector<32x16xf32>, vector<32x240xf32> -> vector<32x256xf32>
    %88 = vector.extract_strided_slice %0 {offsets = [1, 0], sizes = [1, 256], strides = [1, 1]} : vector<9x256xf32> to vector<1x256xf32>
    %89 = vector.broadcast %88 : vector<1x256xf32> to vector<32x256xf32>
    %90 = arith.mulf %87, %89 : vector<32x256xf32>
    %91 = vector.extract_strided_slice %78 {offsets = [0, 241], sizes = [32, 15], strides = [1, 1]} : vector<32x256xf32> to vector<32x15xf32>
    %92 = vector.extract_strided_slice %78 {offsets = [0, 0], sizes = [32, 241], strides = [1, 1]} : vector<32x256xf32> to vector<32x241xf32>
    %93 = tpu.concatenate %91, %92 in 1 : vector<32x15xf32>, vector<32x241xf32> -> vector<32x256xf32>
    %94 = vector.extract_strided_slice %0 {offsets = [2, 0], sizes = [1, 256], strides = [1, 1]} : vector<9x256xf32> to vector<1x256xf32>
    %95 = vector.broadcast %94 : vector<1x256xf32> to vector<32x256xf32>
    %96 = arith.mulf %93, %95 : vector<32x256xf32>
    %97 = tpu.concatenate %84, %90, %96 in 0 : vector<32x256xf32>, vector<32x256xf32>, vector<32x256xf32> -> vector<96x256xf32>
    %c1_25 = arith.constant 1 : index
    %c0_26 = arith.constant 0 : index
    %c0_27 = arith.constant 0 : index
    %c0_28 = arith.constant 0 : index
    %98 = vector.load %arg2[%c1_25, %c0_26, %c0_27, %c0_28] : memref<5x3x32x96xf32, #tpu.memory_space<vmem>>, vector<1x1x32x96xf32>
    %99 = vector.shape_cast %98 : vector<1x1x32x96xf32> to vector<32x96xf32>
    %cst_29 = arith.constant dense<0.000000e+00> : vector<32x256xf32>
    %100 = tpu.matmul %99, %97, %cst_29 {dimension_numbers = #tpu.dot_dimension_numbers<[1], [0], [0], [1], [0, 0, 1, 1], [], []>} : vector<32x96xf32>, vector<96x256xf32>, vector<32x256xf32> -> vector<32x256xf32>
    %101 = vector.extract_strided_slice %78 {offsets = [0, 255], sizes = [32, 1], strides = [1, 1]} : vector<32x256xf32> to vector<32x1xf32>
    %102 = vector.extract_strided_slice %78 {offsets = [0, 0], sizes = [32, 255], strides = [1, 1]} : vector<32x256xf32> to vector<32x255xf32>
    %103 = tpu.concatenate %101, %102 in 1 : vector<32x1xf32>, vector<32x255xf32> -> vector<32x256xf32>
    %104 = vector.extract_strided_slice %0 {offsets = [3, 0], sizes = [1, 256], strides = [1, 1]} : vector<9x256xf32> to vector<1x256xf32>
    %105 = vector.broadcast %104 : vector<1x256xf32> to vector<32x256xf32>
    %106 = arith.mulf %103, %105 : vector<32x256xf32>
    %107 = vector.extract_strided_slice %0 {offsets = [4, 0], sizes = [1, 256], strides = [1, 1]} : vector<9x256xf32> to vector<1x256xf32>
    %108 = vector.broadcast %107 : vector<1x256xf32> to vector<32x256xf32>
    %109 = arith.mulf %78, %108 : vector<32x256xf32>
    %110 = vector.extract_strided_slice %78 {offsets = [0, 1], sizes = [32, 255], strides = [1, 1]} : vector<32x256xf32> to vector<32x255xf32>
    %111 = vector.extract_strided_slice %78 {offsets = [0, 0], sizes = [32, 1], strides = [1, 1]} : vector<32x256xf32> to vector<32x1xf32>
    %112 = tpu.concatenate %110, %111 in 1 : vector<32x255xf32>, vector<32x1xf32> -> vector<32x256xf32>
    %113 = vector.extract_strided_slice %0 {offsets = [5, 0], sizes = [1, 256], strides = [1, 1]} : vector<9x256xf32> to vector<1x256xf32>
    %114 = vector.broadcast %113 : vector<1x256xf32> to vector<32x256xf32>
    %115 = arith.mulf %112, %114 : vector<32x256xf32>
    %116 = tpu.concatenate %106, %109, %115 in 0 : vector<32x256xf32>, vector<32x256xf32>, vector<32x256xf32> -> vector<96x256xf32>
    %c1_30 = arith.constant 1 : index
    %c1_31 = arith.constant 1 : index
    %c0_32 = arith.constant 0 : index
    %c0_33 = arith.constant 0 : index
    %117 = vector.load %arg2[%c1_30, %c1_31, %c0_32, %c0_33] : memref<5x3x32x96xf32, #tpu.memory_space<vmem>>, vector<1x1x32x96xf32>
    %118 = vector.shape_cast %117 : vector<1x1x32x96xf32> to vector<32x96xf32>
    %cst_34 = arith.constant dense<0.000000e+00> : vector<32x256xf32>
    %119 = tpu.matmul %118, %116, %cst_34 {dimension_numbers = #tpu.dot_dimension_numbers<[1], [0], [0], [1], [0, 0, 1, 1], [], []>} : vector<32x96xf32>, vector<96x256xf32>, vector<32x256xf32> -> vector<32x256xf32>
    %120 = arith.addf %100, %119 : vector<32x256xf32>
    %121 = vector.extract_strided_slice %78 {offsets = [0, 15], sizes = [32, 241], strides = [1, 1]} : vector<32x256xf32> to vector<32x241xf32>
    %122 = vector.extract_strided_slice %78 {offsets = [0, 0], sizes = [32, 15], strides = [1, 1]} : vector<32x256xf32> to vector<32x15xf32>
    %123 = tpu.concatenate %121, %122 in 1 : vector<32x241xf32>, vector<32x15xf32> -> vector<32x256xf32>
    %124 = vector.extract_strided_slice %0 {offsets = [6, 0], sizes = [1, 256], strides = [1, 1]} : vector<9x256xf32> to vector<1x256xf32>
    %125 = vector.broadcast %124 : vector<1x256xf32> to vector<32x256xf32>
    %126 = arith.mulf %123, %125 : vector<32x256xf32>
    %127 = vector.extract_strided_slice %78 {offsets = [0, 16], sizes = [32, 240], strides = [1, 1]} : vector<32x256xf32> to vector<32x240xf32>
    %128 = vector.extract_strided_slice %78 {offsets = [0, 0], sizes = [32, 16], strides = [1, 1]} : vector<32x256xf32> to vector<32x16xf32>
    %129 = tpu.concatenate %127, %128 in 1 : vector<32x240xf32>, vector<32x16xf32> -> vector<32x256xf32>
    %130 = vector.extract_strided_slice %0 {offsets = [7, 0], sizes = [1, 256], strides = [1, 1]} : vector<9x256xf32> to vector<1x256xf32>
    %131 = vector.broadcast %130 : vector<1x256xf32> to vector<32x256xf32>
    %132 = arith.mulf %129, %131 : vector<32x256xf32>
    %133 = vector.extract_strided_slice %78 {offsets = [0, 17], sizes = [32, 239], strides = [1, 1]} : vector<32x256xf32> to vector<32x239xf32>
    %134 = vector.extract_strided_slice %78 {offsets = [0, 0], sizes = [32, 17], strides = [1, 1]} : vector<32x256xf32> to vector<32x17xf32>
    %135 = tpu.concatenate %133, %134 in 1 : vector<32x239xf32>, vector<32x17xf32> -> vector<32x256xf32>
    %136 = vector.extract_strided_slice %0 {offsets = [8, 0], sizes = [1, 256], strides = [1, 1]} : vector<9x256xf32> to vector<1x256xf32>
    %137 = vector.broadcast %136 : vector<1x256xf32> to vector<32x256xf32>
    %138 = arith.mulf %135, %137 : vector<32x256xf32>
    %139 = tpu.concatenate %126, %132, %138 in 0 : vector<32x256xf32>, vector<32x256xf32>, vector<32x256xf32> -> vector<96x256xf32>
    %c1_35 = arith.constant 1 : index
    %c2_36 = arith.constant 2 : index
    %c0_37 = arith.constant 0 : index
    %c0_38 = arith.constant 0 : index
    %140 = vector.load %arg2[%c1_35, %c2_36, %c0_37, %c0_38] : memref<5x3x32x96xf32, #tpu.memory_space<vmem>>, vector<1x1x32x96xf32>
    %141 = vector.shape_cast %140 : vector<1x1x32x96xf32> to vector<32x96xf32>
    %cst_39 = arith.constant dense<0.000000e+00> : vector<32x256xf32>
    %142 = tpu.matmul %141, %139, %cst_39 {dimension_numbers = #tpu.dot_dimension_numbers<[1], [0], [0], [1], [0, 0, 1, 1], [], []>} : vector<32x96xf32>, vector<96x256xf32>, vector<32x256xf32> -> vector<32x256xf32>
    %143 = arith.addf %120, %142 : vector<32x256xf32>
    %c1_40 = arith.constant 1 : index
    %c0_41 = arith.constant 0 : index
    %c0_42 = arith.constant 0 : index
    %144 = vector.load %arg3[%c1_40, %c0_41, %c0_42] : memref<5x32x1xf32, #tpu.memory_space<vmem>>, vector<1x32x1xf32>
    %145 = vector.shape_cast %144 : vector<1x32x1xf32> to vector<32x1xf32>
    %146 = vector.broadcast %145 : vector<32x1xf32> to vector<32x256xf32>
    %147 = arith.addf %143, %146 : vector<32x256xf32>
    %cst_43 = arith.constant 0.000000e+00 : f32
    %148 = vector.broadcast %cst_43 : f32 to vector<32x256xf32>
    %149 = arith.maximumf %147, %148 : vector<32x256xf32>
    %150 = vector.extract_strided_slice %149 {offsets = [0, 239], sizes = [32, 17], strides = [1, 1]} : vector<32x256xf32> to vector<32x17xf32>
    %151 = vector.extract_strided_slice %149 {offsets = [0, 0], sizes = [32, 239], strides = [1, 1]} : vector<32x256xf32> to vector<32x239xf32>
    %152 = tpu.concatenate %150, %151 in 1 : vector<32x17xf32>, vector<32x239xf32> -> vector<32x256xf32>
    %153 = vector.extract_strided_slice %0 {offsets = [0, 0], sizes = [1, 256], strides = [1, 1]} : vector<9x256xf32> to vector<1x256xf32>
    %154 = vector.broadcast %153 : vector<1x256xf32> to vector<32x256xf32>
    %155 = arith.mulf %152, %154 : vector<32x256xf32>
    %156 = vector.extract_strided_slice %149 {offsets = [0, 240], sizes = [32, 16], strides = [1, 1]} : vector<32x256xf32> to vector<32x16xf32>
    %157 = vector.extract_strided_slice %149 {offsets = [0, 0], sizes = [32, 240], strides = [1, 1]} : vector<32x256xf32> to vector<32x240xf32>
    %158 = tpu.concatenate %156, %157 in 1 : vector<32x16xf32>, vector<32x240xf32> -> vector<32x256xf32>
    %159 = vector.extract_strided_slice %0 {offsets = [1, 0], sizes = [1, 256], strides = [1, 1]} : vector<9x256xf32> to vector<1x256xf32>
    %160 = vector.broadcast %159 : vector<1x256xf32> to vector<32x256xf32>
    %161 = arith.mulf %158, %160 : vector<32x256xf32>
    %162 = vector.extract_strided_slice %149 {offsets = [0, 241], sizes = [32, 15], strides = [1, 1]} : vector<32x256xf32> to vector<32x15xf32>
    %163 = vector.extract_strided_slice %149 {offsets = [0, 0], sizes = [32, 241], strides = [1, 1]} : vector<32x256xf32> to vector<32x241xf32>
    %164 = tpu.concatenate %162, %163 in 1 : vector<32x15xf32>, vector<32x241xf32> -> vector<32x256xf32>
    %165 = vector.extract_strided_slice %0 {offsets = [2, 0], sizes = [1, 256], strides = [1, 1]} : vector<9x256xf32> to vector<1x256xf32>
    %166 = vector.broadcast %165 : vector<1x256xf32> to vector<32x256xf32>
    %167 = arith.mulf %164, %166 : vector<32x256xf32>
    %168 = tpu.concatenate %155, %161, %167 in 0 : vector<32x256xf32>, vector<32x256xf32>, vector<32x256xf32> -> vector<96x256xf32>
    %c2_44 = arith.constant 2 : index
    %c0_45 = arith.constant 0 : index
    %c0_46 = arith.constant 0 : index
    %c0_47 = arith.constant 0 : index
    %169 = vector.load %arg2[%c2_44, %c0_45, %c0_46, %c0_47] : memref<5x3x32x96xf32, #tpu.memory_space<vmem>>, vector<1x1x32x96xf32>
    %170 = vector.shape_cast %169 : vector<1x1x32x96xf32> to vector<32x96xf32>
    %cst_48 = arith.constant dense<0.000000e+00> : vector<32x256xf32>
    %171 = tpu.matmul %170, %168, %cst_48 {dimension_numbers = #tpu.dot_dimension_numbers<[1], [0], [0], [1], [0, 0, 1, 1], [], []>} : vector<32x96xf32>, vector<96x256xf32>, vector<32x256xf32> -> vector<32x256xf32>
    %172 = vector.extract_strided_slice %149 {offsets = [0, 255], sizes = [32, 1], strides = [1, 1]} : vector<32x256xf32> to vector<32x1xf32>
    %173 = vector.extract_strided_slice %149 {offsets = [0, 0], sizes = [32, 255], strides = [1, 1]} : vector<32x256xf32> to vector<32x255xf32>
    %174 = tpu.concatenate %172, %173 in 1 : vector<32x1xf32>, vector<32x255xf32> -> vector<32x256xf32>
    %175 = vector.extract_strided_slice %0 {offsets = [3, 0], sizes = [1, 256], strides = [1, 1]} : vector<9x256xf32> to vector<1x256xf32>
    %176 = vector.broadcast %175 : vector<1x256xf32> to vector<32x256xf32>
    %177 = arith.mulf %174, %176 : vector<32x256xf32>
    %178 = vector.extract_strided_slice %0 {offsets = [4, 0], sizes = [1, 256], strides = [1, 1]} : vector<9x256xf32> to vector<1x256xf32>
    %179 = vector.broadcast %178 : vector<1x256xf32> to vector<32x256xf32>
    %180 = arith.mulf %149, %179 : vector<32x256xf32>
    %181 = vector.extract_strided_slice %149 {offsets = [0, 1], sizes = [32, 255], strides = [1, 1]} : vector<32x256xf32> to vector<32x255xf32>
    %182 = vector.extract_strided_slice %149 {offsets = [0, 0], sizes = [32, 1], strides = [1, 1]} : vector<32x256xf32> to vector<32x1xf32>
    %183 = tpu.concatenate %181, %182 in 1 : vector<32x255xf32>, vector<32x1xf32> -> vector<32x256xf32>
    %184 = vector.extract_strided_slice %0 {offsets = [5, 0], sizes = [1, 256], strides = [1, 1]} : vector<9x256xf32> to vector<1x256xf32>
    %185 = vector.broadcast %184 : vector<1x256xf32> to vector<32x256xf32>
    %186 = arith.mulf %183, %185 : vector<32x256xf32>
    %187 = tpu.concatenate %177, %180, %186 in 0 : vector<32x256xf32>, vector<32x256xf32>, vector<32x256xf32> -> vector<96x256xf32>
    %c2_49 = arith.constant 2 : index
    %c1_50 = arith.constant 1 : index
    %c0_51 = arith.constant 0 : index
    %c0_52 = arith.constant 0 : index
    %188 = vector.load %arg2[%c2_49, %c1_50, %c0_51, %c0_52] : memref<5x3x32x96xf32, #tpu.memory_space<vmem>>, vector<1x1x32x96xf32>
    %189 = vector.shape_cast %188 : vector<1x1x32x96xf32> to vector<32x96xf32>
    %cst_53 = arith.constant dense<0.000000e+00> : vector<32x256xf32>
    %190 = tpu.matmul %189, %187, %cst_53 {dimension_numbers = #tpu.dot_dimension_numbers<[1], [0], [0], [1], [0, 0, 1, 1], [], []>} : vector<32x96xf32>, vector<96x256xf32>, vector<32x256xf32> -> vector<32x256xf32>
    %191 = arith.addf %171, %190 : vector<32x256xf32>
    %192 = vector.extract_strided_slice %149 {offsets = [0, 15], sizes = [32, 241], strides = [1, 1]} : vector<32x256xf32> to vector<32x241xf32>
    %193 = vector.extract_strided_slice %149 {offsets = [0, 0], sizes = [32, 15], strides = [1, 1]} : vector<32x256xf32> to vector<32x15xf32>
    %194 = tpu.concatenate %192, %193 in 1 : vector<32x241xf32>, vector<32x15xf32> -> vector<32x256xf32>
    %195 = vector.extract_strided_slice %0 {offsets = [6, 0], sizes = [1, 256], strides = [1, 1]} : vector<9x256xf32> to vector<1x256xf32>
    %196 = vector.broadcast %195 : vector<1x256xf32> to vector<32x256xf32>
    %197 = arith.mulf %194, %196 : vector<32x256xf32>
    %198 = vector.extract_strided_slice %149 {offsets = [0, 16], sizes = [32, 240], strides = [1, 1]} : vector<32x256xf32> to vector<32x240xf32>
    %199 = vector.extract_strided_slice %149 {offsets = [0, 0], sizes = [32, 16], strides = [1, 1]} : vector<32x256xf32> to vector<32x16xf32>
    %200 = tpu.concatenate %198, %199 in 1 : vector<32x240xf32>, vector<32x16xf32> -> vector<32x256xf32>
    %201 = vector.extract_strided_slice %0 {offsets = [7, 0], sizes = [1, 256], strides = [1, 1]} : vector<9x256xf32> to vector<1x256xf32>
    %202 = vector.broadcast %201 : vector<1x256xf32> to vector<32x256xf32>
    %203 = arith.mulf %200, %202 : vector<32x256xf32>
    %204 = vector.extract_strided_slice %149 {offsets = [0, 17], sizes = [32, 239], strides = [1, 1]} : vector<32x256xf32> to vector<32x239xf32>
    %205 = vector.extract_strided_slice %149 {offsets = [0, 0], sizes = [32, 17], strides = [1, 1]} : vector<32x256xf32> to vector<32x17xf32>
    %206 = tpu.concatenate %204, %205 in 1 : vector<32x239xf32>, vector<32x17xf32> -> vector<32x256xf32>
    %207 = vector.extract_strided_slice %0 {offsets = [8, 0], sizes = [1, 256], strides = [1, 1]} : vector<9x256xf32> to vector<1x256xf32>
    %208 = vector.broadcast %207 : vector<1x256xf32> to vector<32x256xf32>
    %209 = arith.mulf %206, %208 : vector<32x256xf32>
    %210 = tpu.concatenate %197, %203, %209 in 0 : vector<32x256xf32>, vector<32x256xf32>, vector<32x256xf32> -> vector<96x256xf32>
    %c2_54 = arith.constant 2 : index
    %c2_55 = arith.constant 2 : index
    %c0_56 = arith.constant 0 : index
    %c0_57 = arith.constant 0 : index
    %211 = vector.load %arg2[%c2_54, %c2_55, %c0_56, %c0_57] : memref<5x3x32x96xf32, #tpu.memory_space<vmem>>, vector<1x1x32x96xf32>
    %212 = vector.shape_cast %211 : vector<1x1x32x96xf32> to vector<32x96xf32>
    %cst_58 = arith.constant dense<0.000000e+00> : vector<32x256xf32>
    %213 = tpu.matmul %212, %210, %cst_58 {dimension_numbers = #tpu.dot_dimension_numbers<[1], [0], [0], [1], [0, 0, 1, 1], [], []>} : vector<32x96xf32>, vector<96x256xf32>, vector<32x256xf32> -> vector<32x256xf32>
    %214 = arith.addf %191, %213 : vector<32x256xf32>
    %c2_59 = arith.constant 2 : index
    %c0_60 = arith.constant 0 : index
    %c0_61 = arith.constant 0 : index
    %215 = vector.load %arg3[%c2_59, %c0_60, %c0_61] : memref<5x32x1xf32, #tpu.memory_space<vmem>>, vector<1x32x1xf32>
    %216 = vector.shape_cast %215 : vector<1x32x1xf32> to vector<32x1xf32>
    %217 = vector.broadcast %216 : vector<32x1xf32> to vector<32x256xf32>
    %218 = arith.addf %214, %217 : vector<32x256xf32>
    %c0_62 = arith.constant 0 : index
    %c0_63 = arith.constant 0 : index
    %219 = vector.load %arg6[%c0_62, %c0_63] : memref<32x256xf32, #tpu.memory_space<vmem>>, vector<32x256xf32>
    %220 = arith.addf %219, %218 : vector<32x256xf32>
    %c0_64 = arith.constant 0 : index
    %c0_65 = arith.constant 0 : index
    %221 = vector.load %arg6[%c0_64, %c0_65] : memref<32x256xf32, #tpu.memory_space<vmem>>, vector<32x256xf32>
    tpu.vector_store %arg6[%c0_64, %c0_65], %220 {strides = array<i32>} : memref<32x256xf32, #tpu.memory_space<vmem>>, vector<32x256xf32>,
    %c0_66 = arith.constant 0 : index
    %c0_67 = arith.constant 0 : index
    %222 = vector.load %arg6[%c0_66, %c0_67] : memref<32x256xf32, #tpu.memory_space<vmem>>, vector<32x256xf32>
    %223 = vector.extract_strided_slice %222 {offsets = [0, 239], sizes = [32, 17], strides = [1, 1]} : vector<32x256xf32> to vector<32x17xf32>
    %224 = vector.extract_strided_slice %222 {offsets = [0, 0], sizes = [32, 239], strides = [1, 1]} : vector<32x256xf32> to vector<32x239xf32>
    %225 = tpu.concatenate %223, %224 in 1 : vector<32x17xf32>, vector<32x239xf32> -> vector<32x256xf32>
    %226 = vector.extract_strided_slice %0 {offsets = [0, 0], sizes = [1, 256], strides = [1, 1]} : vector<9x256xf32> to vector<1x256xf32>
    %227 = vector.broadcast %226 : vector<1x256xf32> to vector<32x256xf32>
    %228 = arith.mulf %225, %227 : vector<32x256xf32>
    %229 = vector.extract_strided_slice %222 {offsets = [0, 240], sizes = [32, 16], strides = [1, 1]} : vector<32x256xf32> to vector<32x16xf32>
    %230 = vector.extract_strided_slice %222 {offsets = [0, 0], sizes = [32, 240], strides = [1, 1]} : vector<32x256xf32> to vector<32x240xf32>
    %231 = tpu.concatenate %229, %230 in 1 : vector<32x16xf32>, vector<32x240xf32> -> vector<32x256xf32>
    %232 = vector.extract_strided_slice %0 {offsets = [1, 0], sizes = [1, 256], strides = [1, 1]} : vector<9x256xf32> to vector<1x256xf32>
    %233 = vector.broadcast %232 : vector<1x256xf32> to vector<32x256xf32>
    %234 = arith.mulf %231, %233 : vector<32x256xf32>
    %235 = vector.extract_strided_slice %222 {offsets = [0, 241], sizes = [32, 15], strides = [1, 1]} : vector<32x256xf32> to vector<32x15xf32>
    %236 = vector.extract_strided_slice %222 {offsets = [0, 0], sizes = [32, 241], strides = [1, 1]} : vector<32x256xf32> to vector<32x241xf32>
    %237 = tpu.concatenate %235, %236 in 1 : vector<32x15xf32>, vector<32x241xf32> -> vector<32x256xf32>
    %238 = vector.extract_strided_slice %0 {offsets = [2, 0], sizes = [1, 256], strides = [1, 1]} : vector<9x256xf32> to vector<1x256xf32>
    %239 = vector.broadcast %238 : vector<1x256xf32> to vector<32x256xf32>
    %240 = arith.mulf %237, %239 : vector<32x256xf32>
    %241 = tpu.concatenate %228, %234, %240 in 0 : vector<32x256xf32>, vector<32x256xf32>, vector<32x256xf32> -> vector<96x256xf32>
    %c3 = arith.constant 3 : index
    %c0_68 = arith.constant 0 : index
    %c0_69 = arith.constant 0 : index
    %c0_70 = arith.constant 0 : index
    %242 = vector.load %arg2[%c3, %c0_68, %c0_69, %c0_70] : memref<5x3x32x96xf32, #tpu.memory_space<vmem>>, vector<1x1x32x96xf32>
    %243 = vector.shape_cast %242 : vector<1x1x32x96xf32> to vector<32x96xf32>
    %cst_71 = arith.constant dense<0.000000e+00> : vector<32x256xf32>
    %244 = tpu.matmul %243, %241, %cst_71 {dimension_numbers = #tpu.dot_dimension_numbers<[1], [0], [0], [1], [0, 0, 1, 1], [], []>} : vector<32x96xf32>, vector<96x256xf32>, vector<32x256xf32> -> vector<32x256xf32>
    %245 = vector.extract_strided_slice %222 {offsets = [0, 255], sizes = [32, 1], strides = [1, 1]} : vector<32x256xf32> to vector<32x1xf32>
    %246 = vector.extract_strided_slice %222 {offsets = [0, 0], sizes = [32, 255], strides = [1, 1]} : vector<32x256xf32> to vector<32x255xf32>
    %247 = tpu.concatenate %245, %246 in 1 : vector<32x1xf32>, vector<32x255xf32> -> vector<32x256xf32>
    %248 = vector.extract_strided_slice %0 {offsets = [3, 0], sizes = [1, 256], strides = [1, 1]} : vector<9x256xf32> to vector<1x256xf32>
    %249 = vector.broadcast %248 : vector<1x256xf32> to vector<32x256xf32>
    %250 = arith.mulf %247, %249 : vector<32x256xf32>
    %251 = vector.extract_strided_slice %0 {offsets = [4, 0], sizes = [1, 256], strides = [1, 1]} : vector<9x256xf32> to vector<1x256xf32>
    %252 = vector.broadcast %251 : vector<1x256xf32> to vector<32x256xf32>
    %253 = arith.mulf %222, %252 : vector<32x256xf32>
    %254 = vector.extract_strided_slice %222 {offsets = [0, 1], sizes = [32, 255], strides = [1, 1]} : vector<32x256xf32> to vector<32x255xf32>
    %255 = vector.extract_strided_slice %222 {offsets = [0, 0], sizes = [32, 1], strides = [1, 1]} : vector<32x256xf32> to vector<32x1xf32>
    %256 = tpu.concatenate %254, %255 in 1 : vector<32x255xf32>, vector<32x1xf32> -> vector<32x256xf32>
    %257 = vector.extract_strided_slice %0 {offsets = [5, 0], sizes = [1, 256], strides = [1, 1]} : vector<9x256xf32> to vector<1x256xf32>
    %258 = vector.broadcast %257 : vector<1x256xf32> to vector<32x256xf32>
    %259 = arith.mulf %256, %258 : vector<32x256xf32>
    %260 = tpu.concatenate %250, %253, %259 in 0 : vector<32x256xf32>, vector<32x256xf32>, vector<32x256xf32> -> vector<96x256xf32>
    %c3_72 = arith.constant 3 : index
    %c1_73 = arith.constant 1 : index
    %c0_74 = arith.constant 0 : index
    %c0_75 = arith.constant 0 : index
    %261 = vector.load %arg2[%c3_72, %c1_73, %c0_74, %c0_75] : memref<5x3x32x96xf32, #tpu.memory_space<vmem>>, vector<1x1x32x96xf32>
    %262 = vector.shape_cast %261 : vector<1x1x32x96xf32> to vector<32x96xf32>
    %cst_76 = arith.constant dense<0.000000e+00> : vector<32x256xf32>
    %263 = tpu.matmul %262, %260, %cst_76 {dimension_numbers = #tpu.dot_dimension_numbers<[1], [0], [0], [1], [0, 0, 1, 1], [], []>} : vector<32x96xf32>, vector<96x256xf32>, vector<32x256xf32> -> vector<32x256xf32>
    %264 = arith.addf %244, %263 : vector<32x256xf32>
    %265 = vector.extract_strided_slice %222 {offsets = [0, 15], sizes = [32, 241], strides = [1, 1]} : vector<32x256xf32> to vector<32x241xf32>
    %266 = vector.extract_strided_slice %222 {offsets = [0, 0], sizes = [32, 15], strides = [1, 1]} : vector<32x256xf32> to vector<32x15xf32>
    %267 = tpu.concatenate %265, %266 in 1 : vector<32x241xf32>, vector<32x15xf32> -> vector<32x256xf32>
    %268 = vector.extract_strided_slice %0 {offsets = [6, 0], sizes = [1, 256], strides = [1, 1]} : vector<9x256xf32> to vector<1x256xf32>
    %269 = vector.broadcast %268 : vector<1x256xf32> to vector<32x256xf32>
    %270 = arith.mulf %267, %269 : vector<32x256xf32>
    %271 = vector.extract_strided_slice %222 {offsets = [0, 16], sizes = [32, 240], strides = [1, 1]} : vector<32x256xf32> to vector<32x240xf32>
    %272 = vector.extract_strided_slice %222 {offsets = [0, 0], sizes = [32, 16], strides = [1, 1]} : vector<32x256xf32> to vector<32x16xf32>
    %273 = tpu.concatenate %271, %272 in 1 : vector<32x240xf32>, vector<32x16xf32> -> vector<32x256xf32>
    %274 = vector.extract_strided_slice %0 {offsets = [7, 0], sizes = [1, 256], strides = [1, 1]} : vector<9x256xf32> to vector<1x256xf32>
    %275 = vector.broadcast %274 : vector<1x256xf32> to vector<32x256xf32>
    %276 = arith.mulf %273, %275 : vector<32x256xf32>
    %277 = vector.extract_strided_slice %222 {offsets = [0, 17], sizes = [32, 239], strides = [1, 1]} : vector<32x256xf32> to vector<32x239xf32>
    %278 = vector.extract_strided_slice %222 {offsets = [0, 0], sizes = [32, 17], strides = [1, 1]} : vector<32x256xf32> to vector<32x17xf32>
    %279 = tpu.concatenate %277, %278 in 1 : vector<32x239xf32>, vector<32x17xf32> -> vector<32x256xf32>
    %280 = vector.extract_strided_slice %0 {offsets = [8, 0], sizes = [1, 256], strides = [1, 1]} : vector<9x256xf32> to vector<1x256xf32>
    %281 = vector.broadcast %280 : vector<1x256xf32> to vector<32x256xf32>
    %282 = arith.mulf %279, %281 : vector<32x256xf32>
    %283 = tpu.concatenate %270, %276, %282 in 0 : vector<32x256xf32>, vector<32x256xf32>, vector<32x256xf32> -> vector<96x256xf32>
    %c3_77 = arith.constant 3 : index
    %c2_78 = arith.constant 2 : index
    %c0_79 = arith.constant 0 : index
    %c0_80 = arith.constant 0 : index
    %284 = vector.load %arg2[%c3_77, %c2_78, %c0_79, %c0_80] : memref<5x3x32x96xf32, #tpu.memory_space<vmem>>, vector<1x1x32x96xf32>
    %285 = vector.shape_cast %284 : vector<1x1x32x96xf32> to vector<32x96xf32>
    %cst_81 = arith.constant dense<0.000000e+00> : vector<32x256xf32>
    %286 = tpu.matmul %285, %283, %cst_81 {dimension_numbers = #tpu.dot_dimension_numbers<[1], [0], [0], [1], [0, 0, 1, 1], [], []>} : vector<32x96xf32>, vector<96x256xf32>, vector<32x256xf32> -> vector<32x256xf32>
    %287 = arith.addf %264, %286 : vector<32x256xf32>
    %c3_82 = arith.constant 3 : index
    %c0_83 = arith.constant 0 : index
    %c0_84 = arith.constant 0 : index
    %288 = vector.load %arg3[%c3_82, %c0_83, %c0_84] : memref<5x32x1xf32, #tpu.memory_space<vmem>>, vector<1x32x1xf32>
    %289 = vector.shape_cast %288 : vector<1x32x1xf32> to vector<32x1xf32>
    %290 = vector.broadcast %289 : vector<32x1xf32> to vector<32x256xf32>
    %291 = arith.addf %287, %290 : vector<32x256xf32>
    %cst_85 = arith.constant 0.000000e+00 : f32
    %292 = vector.broadcast %cst_85 : f32 to vector<32x256xf32>
    %293 = arith.maximumf %291, %292 : vector<32x256xf32>
    %294 = vector.extract_strided_slice %293 {offsets = [0, 239], sizes = [32, 17], strides = [1, 1]} : vector<32x256xf32> to vector<32x17xf32>
    %295 = vector.extract_strided_slice %293 {offsets = [0, 0], sizes = [32, 239], strides = [1, 1]} : vector<32x256xf32> to vector<32x239xf32>
    %296 = tpu.concatenate %294, %295 in 1 : vector<32x17xf32>, vector<32x239xf32> -> vector<32x256xf32>
    %297 = vector.extract_strided_slice %0 {offsets = [0, 0], sizes = [1, 256], strides = [1, 1]} : vector<9x256xf32> to vector<1x256xf32>
    %298 = vector.broadcast %297 : vector<1x256xf32> to vector<32x256xf32>
    %299 = arith.mulf %296, %298 : vector<32x256xf32>
    %300 = vector.extract_strided_slice %293 {offsets = [0, 240], sizes = [32, 16], strides = [1, 1]} : vector<32x256xf32> to vector<32x16xf32>
    %301 = vector.extract_strided_slice %293 {offsets = [0, 0], sizes = [32, 240], strides = [1, 1]} : vector<32x256xf32> to vector<32x240xf32>
    %302 = tpu.concatenate %300, %301 in 1 : vector<32x16xf32>, vector<32x240xf32> -> vector<32x256xf32>
    %303 = vector.extract_strided_slice %0 {offsets = [1, 0], sizes = [1, 256], strides = [1, 1]} : vector<9x256xf32> to vector<1x256xf32>
    %304 = vector.broadcast %303 : vector<1x256xf32> to vector<32x256xf32>
    %305 = arith.mulf %302, %304 : vector<32x256xf32>
    %306 = vector.extract_strided_slice %293 {offsets = [0, 241], sizes = [32, 15], strides = [1, 1]} : vector<32x256xf32> to vector<32x15xf32>
    %307 = vector.extract_strided_slice %293 {offsets = [0, 0], sizes = [32, 241], strides = [1, 1]} : vector<32x256xf32> to vector<32x241xf32>
    %308 = tpu.concatenate %306, %307 in 1 : vector<32x15xf32>, vector<32x241xf32> -> vector<32x256xf32>
    %309 = vector.extract_strided_slice %0 {offsets = [2, 0], sizes = [1, 256], strides = [1, 1]} : vector<9x256xf32> to vector<1x256xf32>
    %310 = vector.broadcast %309 : vector<1x256xf32> to vector<32x256xf32>
    %311 = arith.mulf %308, %310 : vector<32x256xf32>
    %312 = tpu.concatenate %299, %305, %311 in 0 : vector<32x256xf32>, vector<32x256xf32>, vector<32x256xf32> -> vector<96x256xf32>
    %c4 = arith.constant 4 : index
    %c0_86 = arith.constant 0 : index
    %c0_87 = arith.constant 0 : index
    %c0_88 = arith.constant 0 : index
    %313 = vector.load %arg2[%c4, %c0_86, %c0_87, %c0_88] : memref<5x3x32x96xf32, #tpu.memory_space<vmem>>, vector<1x1x32x96xf32>
    %314 = vector.shape_cast %313 : vector<1x1x32x96xf32> to vector<32x96xf32>
    %cst_89 = arith.constant dense<0.000000e+00> : vector<32x256xf32>
    %315 = tpu.matmul %314, %312, %cst_89 {dimension_numbers = #tpu.dot_dimension_numbers<[1], [0], [0], [1], [0, 0, 1, 1], [], []>} : vector<32x96xf32>, vector<96x256xf32>, vector<32x256xf32> -> vector<32x256xf32>
    %316 = vector.extract_strided_slice %293 {offsets = [0, 255], sizes = [32, 1], strides = [1, 1]} : vector<32x256xf32> to vector<32x1xf32>
    %317 = vector.extract_strided_slice %293 {offsets = [0, 0], sizes = [32, 255], strides = [1, 1]} : vector<32x256xf32> to vector<32x255xf32>
    %318 = tpu.concatenate %316, %317 in 1 : vector<32x1xf32>, vector<32x255xf32> -> vector<32x256xf32>
    %319 = vector.extract_strided_slice %0 {offsets = [3, 0], sizes = [1, 256], strides = [1, 1]} : vector<9x256xf32> to vector<1x256xf32>
    %320 = vector.broadcast %319 : vector<1x256xf32> to vector<32x256xf32>
    %321 = arith.mulf %318, %320 : vector<32x256xf32>
    %322 = vector.extract_strided_slice %0 {offsets = [4, 0], sizes = [1, 256], strides = [1, 1]} : vector<9x256xf32> to vector<1x256xf32>
    %323 = vector.broadcast %322 : vector<1x256xf32> to vector<32x256xf32>
    %324 = arith.mulf %293, %323 : vector<32x256xf32>
    %325 = vector.extract_strided_slice %293 {offsets = [0, 1], sizes = [32, 255], strides = [1, 1]} : vector<32x256xf32> to vector<32x255xf32>
    %326 = vector.extract_strided_slice %293 {offsets = [0, 0], sizes = [32, 1], strides = [1, 1]} : vector<32x256xf32> to vector<32x1xf32>
    %327 = tpu.concatenate %325, %326 in 1 : vector<32x255xf32>, vector<32x1xf32> -> vector<32x256xf32>
    %328 = vector.extract_strided_slice %0 {offsets = [5, 0], sizes = [1, 256], strides = [1, 1]} : vector<9x256xf32> to vector<1x256xf32>
    %329 = vector.broadcast %328 : vector<1x256xf32> to vector<32x256xf32>
    %330 = arith.mulf %327, %329 : vector<32x256xf32>
    %331 = tpu.concatenate %321, %324, %330 in 0 : vector<32x256xf32>, vector<32x256xf32>, vector<32x256xf32> -> vector<96x256xf32>
    %c4_90 = arith.constant 4 : index
    %c1_91 = arith.constant 1 : index
    %c0_92 = arith.constant 0 : index
    %c0_93 = arith.constant 0 : index
    %332 = vector.load %arg2[%c4_90, %c1_91, %c0_92, %c0_93] : memref<5x3x32x96xf32, #tpu.memory_space<vmem>>, vector<1x1x32x96xf32>
    %333 = vector.shape_cast %332 : vector<1x1x32x96xf32> to vector<32x96xf32>
    %cst_94 = arith.constant dense<0.000000e+00> : vector<32x256xf32>
    %334 = tpu.matmul %333, %331, %cst_94 {dimension_numbers = #tpu.dot_dimension_numbers<[1], [0], [0], [1], [0, 0, 1, 1], [], []>} : vector<32x96xf32>, vector<96x256xf32>, vector<32x256xf32> -> vector<32x256xf32>
    %335 = arith.addf %315, %334 : vector<32x256xf32>
    %336 = vector.extract_strided_slice %293 {offsets = [0, 15], sizes = [32, 241], strides = [1, 1]} : vector<32x256xf32> to vector<32x241xf32>
    %337 = vector.extract_strided_slice %293 {offsets = [0, 0], sizes = [32, 15], strides = [1, 1]} : vector<32x256xf32> to vector<32x15xf32>
    %338 = tpu.concatenate %336, %337 in 1 : vector<32x241xf32>, vector<32x15xf32> -> vector<32x256xf32>
    %339 = vector.extract_strided_slice %0 {offsets = [6, 0], sizes = [1, 256], strides = [1, 1]} : vector<9x256xf32> to vector<1x256xf32>
    %340 = vector.broadcast %339 : vector<1x256xf32> to vector<32x256xf32>
    %341 = arith.mulf %338, %340 : vector<32x256xf32>
    %342 = vector.extract_strided_slice %293 {offsets = [0, 16], sizes = [32, 240], strides = [1, 1]} : vector<32x256xf32> to vector<32x240xf32>
    %343 = vector.extract_strided_slice %293 {offsets = [0, 0], sizes = [32, 16], strides = [1, 1]} : vector<32x256xf32> to vector<32x16xf32>
    %344 = tpu.concatenate %342, %343 in 1 : vector<32x240xf32>, vector<32x16xf32> -> vector<32x256xf32>
    %345 = vector.extract_strided_slice %0 {offsets = [7, 0], sizes = [1, 256], strides = [1, 1]} : vector<9x256xf32> to vector<1x256xf32>
    %346 = vector.broadcast %345 : vector<1x256xf32> to vector<32x256xf32>
    %347 = arith.mulf %344, %346 : vector<32x256xf32>
    %348 = vector.extract_strided_slice %293 {offsets = [0, 17], sizes = [32, 239], strides = [1, 1]} : vector<32x256xf32> to vector<32x239xf32>
    %349 = vector.extract_strided_slice %293 {offsets = [0, 0], sizes = [32, 17], strides = [1, 1]} : vector<32x256xf32> to vector<32x17xf32>
    %350 = tpu.concatenate %348, %349 in 1 : vector<32x239xf32>, vector<32x17xf32> -> vector<32x256xf32>
    %351 = vector.extract_strided_slice %0 {offsets = [8, 0], sizes = [1, 256], strides = [1, 1]} : vector<9x256xf32> to vector<1x256xf32>
    %352 = vector.broadcast %351 : vector<1x256xf32> to vector<32x256xf32>
    %353 = arith.mulf %350, %352 : vector<32x256xf32>
    %354 = tpu.concatenate %341, %347, %353 in 0 : vector<32x256xf32>, vector<32x256xf32>, vector<32x256xf32> -> vector<96x256xf32>
    %c4_95 = arith.constant 4 : index
    %c2_96 = arith.constant 2 : index
    %c0_97 = arith.constant 0 : index
    %c0_98 = arith.constant 0 : index
    %355 = vector.load %arg2[%c4_95, %c2_96, %c0_97, %c0_98] : memref<5x3x32x96xf32, #tpu.memory_space<vmem>>, vector<1x1x32x96xf32>
    %356 = vector.shape_cast %355 : vector<1x1x32x96xf32> to vector<32x96xf32>
    %cst_99 = arith.constant dense<0.000000e+00> : vector<32x256xf32>
    %357 = tpu.matmul %356, %354, %cst_99 {dimension_numbers = #tpu.dot_dimension_numbers<[1], [0], [0], [1], [0, 0, 1, 1], [], []>} : vector<32x96xf32>, vector<96x256xf32>, vector<32x256xf32> -> vector<32x256xf32>
    %358 = arith.addf %335, %357 : vector<32x256xf32>
    %c4_100 = arith.constant 4 : index
    %c0_101 = arith.constant 0 : index
    %c0_102 = arith.constant 0 : index
    %359 = vector.load %arg3[%c4_100, %c0_101, %c0_102] : memref<5x32x1xf32, #tpu.memory_space<vmem>>, vector<1x32x1xf32>
    %360 = vector.shape_cast %359 : vector<1x32x1xf32> to vector<32x1xf32>
    %361 = vector.broadcast %360 : vector<32x1xf32> to vector<32x256xf32>
    %362 = arith.addf %358, %361 : vector<32x256xf32>
    %c0_103 = arith.constant 0 : index
    %c0_104 = arith.constant 0 : index
    %363 = vector.load %arg6[%c0_103, %c0_104] : memref<32x256xf32, #tpu.memory_space<vmem>>, vector<32x256xf32>
    %364 = arith.addf %363, %362 : vector<32x256xf32>
    %c0_105 = arith.constant 0 : index
    %c0_106 = arith.constant 0 : index
    %365 = vector.load %arg6[%c0_105, %c0_106] : memref<32x256xf32, #tpu.memory_space<vmem>>, vector<32x256xf32>
    tpu.vector_store %arg6[%c0_105, %c0_106], %364 {strides = array<i32>} : memref<32x256xf32, #tpu.memory_space<vmem>>, vector<32x256xf32>,
    %c0_107 = arith.constant 0 : index
    %c0_108 = arith.constant 0 : index
    %366 = vector.load %arg6[%c0_107, %c0_108] : memref<32x256xf32, #tpu.memory_space<vmem>>, vector<32x256xf32>
    %c0_109 = arith.constant 0 : index
    %c0_110 = arith.constant 0 : index
    %c0_111 = arith.constant 0 : index
    %367 = vector.load %arg5[%c0_109, %c0_110, %c0_111] : memref<1x32x256xf32, #tpu.memory_space<vmem>>, vector<1x32x256xf32>
    %368 = vector.shape_cast %367 : vector<1x32x256xf32> to vector<32x256xf32>
    %369 = vector.shape_cast %366 : vector<32x256xf32> to vector<1x32x256xf32>
    tpu.vector_store %arg5[%c0_109, %c0_110, %c0_111], %369 {strides = array<i32>} : memref<1x32x256xf32, #tpu.memory_space<vmem>>, vector<1x32x256xf32>,
    return
  }
  func.func @transform_0(%arg0: i32) -> (i32, i32, i32) {
    %c0_i32 = arith.constant 0 : i32
    %c0_i32_0 = arith.constant 0 : i32
    %c0_i32_1 = arith.constant 0 : i32
    return %arg0, %c0_i32, %c0_i32_0 : i32, i32, i32
  }
  func.func @transform_1(%arg0: i32) -> (i32, i32, i32, i32) {
    %c0_i32 = arith.constant 0 : i32
    %c0_i32_0 = arith.constant 0 : i32
    %c0_i32_1 = arith.constant 0 : i32
    %c0_i32_2 = arith.constant 0 : i32
    %c0_i32_3 = arith.constant 0 : i32
    return %c0_i32, %c0_i32_0, %c0_i32_1, %c0_i32_2 : i32, i32, i32, i32
  }
  func.func @transform_2(%arg0: i32) -> (i32, i32, i32) {
    %c0_i32 = arith.constant 0 : i32
    %c0_i32_0 = arith.constant 0 : i32
    %c0_i32_1 = arith.constant 0 : i32
    %c0_i32_2 = arith.constant 0 : i32
    return %c0_i32, %c0_i32_0, %c0_i32_1 : i32, i32, i32
  }
  func.func @transform_3(%arg0: i32) -> (i32, i32) {
    %c0_i32 = arith.constant 0 : i32
    %c0_i32_0 = arith.constant 0 : i32
    %c0_i32_1 = arith.constant 0 : i32
    return %c0_i32, %c0_i32_0 : i32, i32
  }
  func.func @transform_4(%arg0: i32) -> (i32, i32, i32) {
    %c0_i32 = arith.constant 0 : i32
    %c0_i32_0 = arith.constant 0 : i32
    %c0_i32_1 = arith.constant 0 : i32
    return %arg0, %c0_i32, %c0_i32_0 : i32, i32, i32
  }
}

</mosaic_0001>

<bundles_post_ra>
// kernel: residual_blocks_with_input_conv.1
= control target key start
LH: loop header
LB: loop body
LE: loop exit
PB: predicated region body
PF: predicated region fallthrough
CT: control target
= control target key end

     0   :  { %9 = vsyncpa [#allocation4], 0  ;;  %s7507_s0 = inlined_call_operand.hbm [shape: f32[2,32,256], index: 0, kind: input, shape index: {}]   ;;  %s7508_s1 = inlined_call_operand.hbm [shape: f32[5,3,32,96], index: 1, kind: input, shape index: {}]   ;;  %s7509_s2 = inlined_call_operand.hbm [shape: f32[5,32,1], index: 2, kind: input, shape index: {}]   ;;  %s7510_s3 = inlined_call_operand.hbm [shape: f32[9,256], index: 3, kind: input, shape index: {}]   ;;  %s7511_s4 = inlined_call_operand.hbm [shape: f32[2,32,256], index: 4, kind: output, shape index: {}]  }
   0x1   :  { %11 = vsyncpa [#allocation4 + $0x1], 0 }
   0x2   :  { %12 = vsyncpa [#allocation7], 0 }
   0x3   :  { %13 = vsyncpa [#allocation10], 0 }
   0x4   :  { %14 = vsyncpa [#allocation5], 0 }
   0x5   :  { %16 = vsyncpa [#allocation5 + $0x1], 0  ;;  %s5083_s15 = smov 0   ;;  %s5085_s16 = smov 0  }
   0x6   :  { %s5087_s17 = smov 0   ;;  %s5089_s18 = smov 0  }
   0x7 LB: > { %s5104_s19 = sadd.s32 4294967295, %s5036_s18   ;;  %s4214_s20 = sadd.s32 4294967294, %s5036_s18   ;;  %s5036_s18 = sphi %s5089_s18, %s7607_s18   ;;  %s5032_s17 = sphi %s5087_s17, %s7606_s17   ;;  %s5028_s16 = sphi %s5085_s16, %s7605_s16   ;;  %s5024_s15 = sphi %s5083_s15, %s7604_s15  }
   0x8   : > { %p42_p0 = scmp.ne.s32.totalorder %s5028_s16, %s5024_s15  ;;  %p7512_p1 = scmp.eq.s32.totalorder %s5104_s19, 0 }
   0x9   : > { %p135_p3 = scmp.eq.s32.totalorder %s4214_s20, 1  ;;  %p4215_p5 = scmp.ge.s32.totalorder %s5036_s18, 1 }
   0xa   : > { %p5113_p4 = por %p7512_p1, %p42_p0  ;;  %p142_p7 = scmp.lt.s32.totalorder %s5036_s18, 3 }
   0xb   : > { %p5118_p6 = por %p135_p3, %p42_p0  ;;  %s5038_s24 = smov [#allocation6]  }
   0xc   : > { %s7541_s21 = scalar_select %p5113_p4, 1, 0 }
   0xd   : > { %s7542_s22 = scalar_select %p5118_p6, 1, 0 }
   0xe   : > { %p5123_p8 = pnand %p4215_p5, %p142_p7  ;;  %s154_s25 = sshll.u32 %s5038_s24, 4  ;;  %s5127_s25 = int_to_ptr.vmem [resolvable:$true] %s154_s25 }
   0xf   : > { %s5039_s27 = smov [#allocation8]   ;;  %s5040_s29 = smov [#allocation9]  }
  0x10   : > { %s7543_s23 = scalar_select %p5123_p8, 1, 0 }
  0x11   : > { %p4766_p9 = pneg %p5123_p8  ;;  %s167_s28 = sshll.u32 %s5039_s27, 4  ;;  %s5138_s28 = int_to_ptr.vmem [resolvable:$true] %s167_s28 }
  0x12   : > { %s5140_s30 = sshll.u32 %s5040_s29, 4  ;;  %s4848_s7 = scalar_lea.hbm %s7508_s1, 7680  ;;  %s181_s30 = int_to_ptr.vmem [resolvable:$true] %s5140_s30 }
  0x13   : > { %p5134_p11 = pnand %p4766_p9, %p7512_p1  ;;  %p4849_p12 = scmp.ne.s32.totalorder %s7508_s1, %s4848_s7 }
  0x14   : > { %p4855_p5 = scmp.lt.u32.totalorder %s4848_s7, %s7508_s1 }
  0x15   : > { %p5150_p13 = pneg %p5134_p11 }
  0x17   : > { %p4851_p0 = pnand %p5150_p13, %p4849_p12 }
  0x19   : > { %p4852_p3 = pneg %p4851_p0 }
  0x1b   : > { %p4857_p7 = pnand %p4855_p5, %p4852_p3 }
  0x1d   : > { %4860 = shalt.err (!%p4857_p7)
}
  0x1e   : > { %s4861_s13 = scalar_lea.vmem %s5127_s25, 7680  ;;  %p4869_p2 = scmp.lt.s32.totalorder %s5127_s25, %s5127_s25 }
  0x1f   : > { %p4862_p9 = scmp.ne.s32.totalorder %s5127_s25, %s4861_s13  ;;  %p4870_p6 = scmp.lt.s32.totalorder %s4861_s13, %s4861_s13 }
  0x21   : > { %p4864_p10 = pnand %p4862_p9, %p5150_p13  ;;  %p4871_p12 = por %p4870_p6, %p4869_p2 }
  0x23   : > { %p4865_p1 = pneg %p4864_p10 }
  0x25   : > { %p4872_p0 = pnand %p4871_p12, %p4865_p1 }
  0x27   : > { %4875 = shalt.err (!%p4872_p0)
}
  0x28   : > { %s5041_s14 = smov 128   ;;  %s5042_s20 = smov 8  }
  0x29   : > { %4769 = dma.hbm_to_vmem [thread:$0]  (!%p5134_p11), %s7508_s1, 7680, %s5127_s25, [#allocation7], %s5041_s14, %s5041_s14, %s5042_s20  }
  0x2a   : > { %s4876_s6 = scalar_lea.hbm %s7509_s2, 2560 }
  0x2b   : > { %p4877_p2 = scmp.ne.s32.totalorder %s7509_s2, %s4876_s6  ;;  %p4883_p10 = scmp.lt.u32.totalorder %s4876_s6, %s7509_s2 }
  0x2d   : > { %p4879_p1 = pnand %p4877_p2, %p5150_p13 }
  0x2f   : > { %p4880_p6 = pneg %p4879_p1 }
  0x31   : > { %p4885_p3 = pnand %p4883_p10, %p4880_p6 }
  0x33   : > { %4888 = shalt.err (!%p4885_p3)
}
  0x34   : > { %s4889_s25 = scalar_lea.vmem %s5138_s28, 2560  ;;  %p4897_p12 = scmp.lt.s32.totalorder %s5138_s28, %s5138_s28 }
  0x35   : > { %p4890_p5 = scmp.ne.s32.totalorder %s5138_s28, %s4889_s25  ;;  %p4898_p0 = scmp.lt.s32.totalorder %s4889_s25, %s4889_s25 }
  0x37   : > { %p4892_p7 = pnand %p4890_p5, %p5150_p13  ;;  %p4899_p2 = por %p4898_p0, %p4897_p12 }
  0x39   : > { %p4893_p9 = pneg %p4892_p7 }
  0x3b   : > { %p4900_p1 = pnand %p4899_p2, %p4893_p9 }
  0x3d   : > { %4903 = shalt.err (!%p4900_p1)
}
  0x3e   : > { %4772 = dma.hbm_to_vmem [thread:$0]  (!%p5134_p11), %s7509_s2, 2560, %s5138_s28, [#allocation7], %s5041_s14, %s5041_s14, %s5042_s20  }
  0x3f   : > { %s4904_s29 = scalar_lea.hbm %s7510_s3, 512 }
  0x40   : > { %p4905_p6 = scmp.ne.s32.totalorder %s7510_s3, %s4904_s29  ;;  %p4911_p5 = scmp.lt.u32.totalorder %s4904_s29, %s7510_s3 }
  0x42   : > { %p4907_p10 = pnand %p4905_p6, %p5150_p13 }
  0x44   : > { %p4908_p3 = pneg %p4907_p10 }
  0x46   : > { %p4913_p7 = pnand %p4911_p5, %p4908_p3 }
  0x48   : > { %4916 = shalt.err (!%p4913_p7)
}
  0x49   : > { %s4917_s9 = scalar_lea.vmem %s181_s30, 512  ;;  %p4925_p2 = scmp.lt.s32.totalorder %s181_s30, %s181_s30 }
  0x4a   : > { %p4918_p9 = scmp.ne.s32.totalorder %s181_s30, %s4917_s9  ;;  %p4926_p1 = scmp.lt.s32.totalorder %s4917_s9, %s4917_s9 }
  0x4c   : > { %p4920_p12 = pnand %p4918_p9, %p5150_p13  ;;  %p4927_p4 = por %p4926_p1, %p4925_p2 }
  0x4e   : > { %p4921_p0 = pneg %p4920_p12 }
  0x50   : > { %p4928_p8 = pnand %p4927_p4, %p4921_p0 }
  0x52   : > { %4931 = shalt.err (!%p4928_p8)
}
  0x53   : > { %s5043_s28 = smov 256   ;;  %s5044_s10 = smov 16  }
  0x54   : > { %4775 = dma.hbm_to_vmem [thread:$0]  (!%p5134_p11), %s7510_s3, 512, %s181_s30, [#allocation10], %s5043_s28, %s5043_s28, %s5044_s10  }
  0x55   : > { %s5217_s11 = sadd.s32 1, %s5036_s18   ;;  %s29_s12 = sadd.s32 1, %s5032_s17 }
  0x56   : > { %s26_s25 = ssub.s32 %s5036_s18, %s5217_s11  ;;  %p36_p8 = scmp.ne.s32.totalorder %s5032_s17, %s5028_s16 }
  0x57   : > { %p27_p4 = scmp.eq.s32.totalorder %s26_s25, 0  ;;  %p37_p13 = scmp.eq.s32.totalorder %s5036_s18, 0 }
  0x58   : > { %p4787_p6 = scmp.lt.s32.totalorder %s5036_s18, 2  ;;  %p7546_p3 = scmp.eq.s32.totalorder %s5104_s19, 1 }
  0x59   : > { %s5227_s13 = scalar_select %p27_p4, %s5032_s17, %s29_s12  }
  0x5a   : > { %p38_p10 = por %p37_p13, %p36_p8  ;;  %p5231_p5 = por %p7546_p3, %p36_p8 }
  0x5b   : > { %s194_s24 = sand.u32 1, %s5032_s17   ;;  %s4296_s27 = sshll.u32 %s5036_s18, 10 }
  0x5c   : > { %s4220_s30 = sshll.u32 %s194_s24, 6  ;;  %s5240_s6 = scalar_lea.hbm %s7507_s0, %s4296_s27 }
  0x5d   : > { %s198_s7 = scalar_lea.vmem [#allocation3], %s4220_s30  ;;  %p5242_p11 = pnand %p4787_p6, %p38_p10 }
  0x5e   : > { %s205_s8 = sshll.u32 %s198_s7, 4  ;;  %s5248_s14 = scalar_lea.sflag [#allocation4], %s194_s24  ;;  %s5246_s8 = int_to_ptr.vmem [resolvable:$true] %s205_s8 }
  0x5f   : > { %s4932_s20 = scalar_lea.hbm %s5240_s6, 1024  ;;  %p4934_p9 = pneg %p5242_p11 }
  0x60   : > { %p4933_p7 = scmp.ne.s32.totalorder %s5240_s6, %s4932_s20  ;;  %s4937_s27 = scalar_lea.hbm %s7507_s0, 2048 }
  0x61   : > { %p4938_p2 = scmp.lt.u32.totalorder %s5240_s6, %s7507_s0  ;;  %p4939_p1 = scmp.lt.u32.totalorder %s4937_s27, %s4932_s20 }
  0x62   : > { %p4935_p12 = pnand %p4934_p9, %p4933_p7  ;;  %p4941_p8 = scmp.lt.u32.totalorder %s4932_s20, %s5240_s6 }
  0x63   : > { %p4940_p4 = por %p4939_p1, %p4938_p2 }
  0x64   : > { %p4936_p0 = pneg %p4935_p12 }
  0x65   : > { %p4942_p13 = por %p4941_p8, %p4940_p4 }
  0x67   : > { %p4943_p6 = pnand %p4942_p13, %p4936_p0 }
  0x69   : > { %4946 = shalt.err (!%p4943_p6)
}
  0x6a   : > { %s4947_s24 = scalar_lea.vmem %s5246_s8, 1024  ;;  %s5045_s5 = smov [#allocation3]  }
  0x6b   : > { %p4948_p10 = scmp.ne.s32.totalorder %s5246_s8, %s4947_s24  ;;  %s4952_s7 = sshll.u32 %s5045_s5, 4  ;;  %s4953_s7 = int_to_ptr.vmem [resolvable:$false] %s4952_s7 }
  0x6c   : > { %s4954_s25 = scalar_lea.vmem %s4953_s7, 2048  ;;  %p4955_p12 = scmp.lt.s32.totalorder %s5246_s8, %s4953_s7 }
  0x6d   : > { %p4950_p3 = pnand %p4948_p10, %p4934_p9  ;;  %p4956_p2 = scmp.lt.s32.totalorder %s4954_s25, %s4947_s24 }
  0x6f   : > { %p4951_p7 = pneg %p4950_p3  ;;  %p4957_p1 = por %p4956_p2, %p4955_p12 }
  0x71   : > { %p4958_p4 = pnand %p4957_p1, %p4951_p7 }
  0x73   : > { %4961 = shalt.err (!%p4958_p4)
}
  0x74   : > { %4779 = dma.hbm_to_vmem [thread:$0]  (!%p5242_p11), %s5240_s6, 1024, %s5246_s8, %s5248_s14, %s5043_s28, %s5043_s28, %s5044_s10  }
  0x75   : > { %p7549_p9 = scmp.ne.s32.totalorder %s7543_s23, 0 }
  0x77   : > { %217 = sbr.rel (%p7549_p9) target bundleno = 2488 (0x9b8), region = 36 }
  0x7e   : > { %s5282_s20 = sand.u32 1, %s5028_s16   ;;  %p7550_p0 = scmp.ne.s32.totalorder %s7541_s21, 0 }
  0x7f   : > { %s4224_s12 = sshll.u32 %s5282_s20, 6  ;;  %s220_s27 = scalar_lea.sflag [#allocation4], %s5282_s20 }
  0x80   : > { %s223_s9 = scalar_lea.vmem [#allocation3], %s4224_s12 }
  0x81   : > { %5007 = dma.done.wait (%p7550_p0), %s220_s27, 1024  }
  0x82   : > { %5009 = vsyncadd (%p7550_p0), %s220_s27, 4294966272  ;;  %p7551_p11 = scmp.eq.s32.totalorder %s5104_s19, 0 }
  0x84   : > { %5011 = dma.done.wait (%p7551_p11), [#allocation7], 10240   ;;  %p7552_p8 = pmov %p7551_p11 }
  0x86   : > { %5013 = vsyncadd (%p7552_p8), [#allocation7], 4294957056  ;;  %p7553_p13 = pmov %p7552_p8 }
  0x87   : > { %p7554_p6 = pmov %p7552_p8 }
  0x88   : > { %5015 = dma.done.wait (%p7553_p13), [#allocation10], 512  }
  0x89   : > { %5017 = vsyncadd (%p7554_p6), [#allocation10], 4294966784  ;;  %v5300_v0 = vld [vmem:[%s223_s9 + $0x8] sm:$0xff]  ;;  %v5302_v1 = vld [vmem:[%s223_s9] sm:$0xff]  ;;  %s5046_s23 = smov 17   ;;  %s5047_s21 = smov 16   ;;  %v317_v9 = vlaneseq }
  0x8a   : > { %276 = vrot.lane.b32.xlu0 %v5300_v0, %s5046_s23  ;;  %292 = vrot.lane.b32.xlu1 %v5302_v1, %s5046_s23  ;;  %v5308_v2 = vld [vmem:[%s223_s9 + $0x18] sm:$0xff]  ;;  %v5310_v3 = vld [vmem:[%s223_s9 + $0x10] sm:$0xff]  ;;  %s5048_s28 = smov 15   ;;  %s5049_s10 = smov 1   ;;  %v7515_v8 = vmov 0.0   ;;  %v5437_v12 = vld [vmem:[#allocation9 + $0x8] sm:$0xff] }
  0x8b   : > { %v5316_v4 = vld [vmem:[%s223_s9 + $0x28] sm:$0xff]  ;;  %v5318_v5 = vld [vmem:[%s223_s9 + $0x38] sm:$0xff]  ;;  %v5324_v6 = vld [vmem:[%s223_s9 + $0x20] sm:$0xff]  ;;  %748 = vmatprep.mubr.f32.mxu0 %v7515_v8  ;;  %647 = vmatprep.mubr.f32.mxu1 %v7515_v8  ;;  %s5051_s6 = smov 113   ;;  %s5052_s8 = smov 112   ;;  %v5426_v10 = vshrl.u32 %v317_v9, 7 }
  0x8c   : > { %v5326_v7 = vld [vmem:[%s223_s9 + $0x30] sm:$0xff]  ;;  %s5053_s14 = smov 127   ;;  %s5054_s30 = smov 111   ;;  %vm300_vm0 = vcmask 138240   ;;  %v5439_v13 = vld [vmem:[#allocation9] sm:$0xff]  ;;  %vm353_vm1 = vcmask 130048  }
  0x8d   : > { %v319_v11 = vsub.s32 0, %v5426_v10  ;;  %v372_v34 = vsub.s32 1, %v5426_v10  ;;  %v1046_v49 = vld [vmem:[#allocation8] sm:$0xff]  ;;  %v1047_v50 = vld [vmem:[#allocation8 + $0x8] sm:$0xff]  ;;  %v5055_v51 = vmov 0   ;;  %v1049_v58 = vld [vmem:[#allocation8 + $0x18] sm:$0xff] }
  0x8e   : > { %278 = vrot.lane.b32.xlu0 %v5308_v2, %s5046_s23  ;;  %294 = vrot.lane.b32.xlu1 %v5310_v3, %s5046_s23  ;;  %v1048_v63 = vld [vmem:[#allocation8 + $0x10] sm:$0xff]  ;;  %vm406_vm2 = vcmask 121856   ;;  %vm463_vm3 = vcmask 7168   ;;  %vm570_vm4 = vcmask 785408   ;;  %vm789_vm5 = vcmask 924672   ;;  %s259_s29 = scalar_lea.vmem [#allocation11], %s4224_s12 }
  0x8f   : > { %v5442_v16 = vrot.slane %v5437_v12, %v319_v11  ;;  %v5450_v18 = vrot.slane %v5439_v13, %v319_v11  ;;  %v5477_v47 = vrot.slane %v5439_v13, %v372_v34  ;;  %v5480_v48 = vrot.slane %v5437_v12, %v372_v34  ;;  %4842 = vset.pattern.permute.xlu0 %v5055_v51  ;;  %s4112_s24 = sshll.u32 %s259_s29, 4  ;;  %s4297_s5 = sshll.u32 %s5104_s19, 10  ;;  %s7455_s24 = int_to_ptr.vmem [resolvable:$true] %s4112_s24 }
  0x90   : > { %4843 = vset.pattern.permute.xlu1 %v5055_v51  ;;  %vm842_vm6 = vcmask 916480   ;;  %vm528_vm7 = vcmask 1039360   ;;  %vm895_vm8 = vcmask 908288   ;;  %s7462_s12 = scalar_lea.hbm %s7511_s4, %s4297_s5  ;;  %s4099_s19 = scalar_lea.sflag [#allocation5], %s5282_s20 }
  0x91   : > { %s4962_s27 = scalar_lea.vmem %s7455_s24, 1024  ;;  %s5056_s9 = smov [#allocation11]  }
  0x92   : > { %280 = vrot.lane.b32.xlu0 %v5316_v4, %s5046_s23  ;;  %282 = vrot.lane.b32.xlu1 %v5318_v5, %s5046_s23  ;;  %p4963_p10 = scmp.ne.s32.totalorder %s7455_s24, %s4962_s27 }
  0x94   : > { %p4964_p3 = pnand %p4963_p10, %p5231_p5 }
  0x96   : > { %296 = vrot.lane.b32.xlu0 %v5324_v6, %s5046_s23  ;;  %298 = vrot.lane.b32.xlu1 %v5326_v7, %s5046_s23  ;;  %p4965_p7 = pneg %p4964_p3 }
  0x9a   : > { %333 = vrot.lane.b32.xlu0 %v5300_v0, %s5047_s21  ;;  %335 = vrot.lane.b32.xlu1 %v5308_v2, %s5047_s21 }
  0x9e   : > { %345 = vrot.lane.b32.xlu0 %v5302_v1, %s5047_s21  ;;  %347 = vrot.lane.b32.xlu1 %v5310_v3, %s5047_s21 }
  0xa2   : > { %337 = vrot.lane.b32.xlu0 %v5316_v4, %s5047_s21  ;;  %339 = vrot.lane.b32.xlu1 %v5318_v5, %s5047_s21 }
  0xa6   : > { %349 = vrot.lane.b32.xlu0 %v5324_v6, %s5047_s21  ;;  %351 = vrot.lane.b32.xlu1 %v5326_v7, %s5047_s21 }
  0xaa   : > { %386 = vrot.lane.b32.xlu0 %v5300_v0, %s5048_s28  ;;  %388 = vrot.lane.b32.xlu1 %v5308_v2, %s5048_s28 }
  0xae   : > { %398 = vrot.lane.b32.xlu0 %v5302_v1, %s5048_s28  ;;  %400 = vrot.lane.b32.xlu1 %v5310_v3, %s5048_s28 }
  0xb2   : > { %390 = vrot.lane.b32.xlu0 %v5316_v4, %s5048_s28  ;;  %392 = vrot.lane.b32.xlu1 %v5318_v5, %s5048_s28 }
  0xb6   : > { %402 = vrot.lane.b32.xlu0 %v5324_v6, %s5048_s28  ;;  %404 = vrot.lane.b32.xlu1 %v5326_v7, %s5048_s28 }
  0xba   : > { %443 = vrot.lane.b32.xlu0 %v5300_v0, %s5049_s10  ;;  %445 = vrot.lane.b32.xlu1 %v5308_v2, %s5049_s10 }
  0xbe   : > { %455 = vrot.lane.b32.xlu0 %v5302_v1, %s5049_s10  ;;  %457 = vrot.lane.b32.xlu1 %v5310_v3, %s5049_s10 }
  0xc2   : > { %773 = vrot.lane.b32.xlu0 %v5302_v1, %s5051_s6  ;;  %775 = vrot.lane.b32.xlu1 %v5300_v0, %s5051_s6 }
  0xc6   : > { %777 = vrot.lane.b32.xlu0 %v5310_v3, %s5051_s6  ;;  %779 = vrot.lane.b32.xlu1 %v5308_v2, %s5051_s6 }
  0xca   : > { %447 = vrot.lane.b32.xlu0 %v5316_v4, %s5049_s10  ;;  %449 = vrot.lane.b32.xlu1 %v5318_v5, %s5049_s10 }
  0xce   : > { %459 = vrot.lane.b32.xlu0 %v5324_v6, %s5049_s10  ;;  %461 = vrot.lane.b32.xlu1 %v5326_v7, %s5049_s10 }
  0xd2   : > { %781 = vrot.lane.b32.xlu0 %v5324_v6, %s5051_s6  ;;  %783 = vrot.lane.b32.xlu1 %v5316_v4, %s5051_s6 }
  0xd6   : > { %785 = vrot.lane.b32.xlu0 %v5326_v7, %s5051_s6  ;;  %787 = vrot.lane.b32.xlu1 %v5318_v5, %s5051_s6 }
  0xda   : > { %826 = vrot.lane.b32.xlu0 %v5302_v1, %s5052_s8  ;;  %828 = vrot.lane.b32.xlu1 %v5300_v0, %s5052_s8 }
  0xde   : > { %830 = vrot.lane.b32.xlu0 %v5310_v3, %s5052_s8  ;;  %832 = vrot.lane.b32.xlu1 %v5308_v2, %s5052_s8 }
  0xe2   : > { %834 = vrot.lane.b32.xlu0 %v5324_v6, %s5052_s8  ;;  %836 = vrot.lane.b32.xlu1 %v5316_v4, %s5052_s8 }
  0xe6   : > { %838 = vrot.lane.b32.xlu0 %v5326_v7, %s5052_s8  ;;  %840 = vrot.lane.b32.xlu1 %v5318_v5, %s5052_s8 }
  0xea   : > { %512 = vrot.lane.b32.xlu0 %v5302_v1, %s5053_s14  ;;  %514 = vrot.lane.b32.xlu1 %v5300_v0, %s5053_s14 }
  0xee   : > { %516 = vrot.lane.b32.xlu0 %v5310_v3, %s5053_s14  ;;  %518 = vrot.lane.b32.xlu1 %v5308_v2, %s5053_s14 }
  0xf2   : > { %879 = vrot.lane.b32.xlu0 %v5302_v1, %s5054_s30  ;;  %881 = vrot.lane.b32.xlu1 %v5300_v0, %s5054_s30 }
  0xf6   : > { %883 = vrot.lane.b32.xlu0 %v5310_v3, %s5054_s30  ;;  %885 = vrot.lane.b32.xlu1 %v5308_v2, %s5054_s30 }
  0xfa   : > { %520 = vrot.lane.b32.xlu0 %v5324_v6, %s5053_s14  ;;  %522 = vrot.lane.b32.xlu1 %v5316_v4, %s5053_s14 }
  0xfc   : > { %v277_v14 = vpop.permute.xlu0 %276  ;;  %v293_v15 = vpop.permute.xlu1 %292 }
  0xfd   : > { %v301_v17 = vsel %vm300_vm0, %v293_v15, %v277_v14  ;;  %v313_v19 = vsel %vm300_vm0, %v277_v14, %v293_v15 }
  0xfe   : > { %524 = vrot.lane.b32.xlu0 %v5326_v7, %s5053_s14  ;;  %526 = vrot.lane.b32.xlu1 %v5318_v5, %s5053_s14  ;;  %v326_v24 = vmul.f32 %v5442_v16, %v301_v17  ;;  %v325_v26 = vmul.f32 %v5450_v18, %v313_v19 }
 0x100   : > { %v279_v20 = vpop.permute.xlu0 %278  ;;  %v295_v21 = vpop.permute.xlu1 %294 }
 0x101   : > { %v314_v22 = vsel %vm300_vm0, %v279_v20, %v295_v21  ;;  %v302_v23 = vsel %vm300_vm0, %v295_v21, %v279_v20  ;;  %v425_v20 = vsub.s32 2, %v5426_v10 }
 0x102   : > { %887 = vrot.lane.b32.xlu0 %v5324_v6, %s5054_s30  ;;  %889 = vrot.lane.b32.xlu1 %v5316_v4, %s5054_s30  ;;  %v328_v25 = vmul.f32 %v5442_v16, %v302_v23  ;;  %v327_v27 = vmul.f32 %v5450_v18, %v314_v22 }
 0x103   : > { %v5503_v34 = vrot.slane %v5437_v12, %v425_v20 }
 0x104   : > { %v281_v28 = vpop.permute.xlu0 %280  ;;  %v283_v29 = vpop.permute.xlu1 %282  ;;  %v4322_v30 = vpack.c.bf16 %v328_v25, %v326_v24  ;;  %v4324_v31 = vpack.c.bf16 %v327_v27, %v325_v26 }
 0x106   : > { %891 = vrot.lane.b32.xlu0 %v5326_v7, %s5054_s30  ;;  %893 = vrot.lane.b32.xlu1 %v5318_v5, %s5054_s30 }
 0x107   : > { %4323 = vmatprep.subr.bf16.mxu0 %v4322_v30 }
 0x108   : > { %4325 = vmatpush1.bf16.msra.mxu0 %v4324_v31  ;;  %v297_v32 = vpop.permute.xlu0 %296  ;;  %v299_v33 = vpop.permute.xlu1 %298 }
 0x109   : > { %v303_v35 = vsel %vm300_vm0, %v297_v32, %v281_v28  ;;  %v315_v36 = vsel %vm300_vm0, %v281_v28, %v297_v32  ;;  %v304_v37 = vsel %vm300_vm0, %v299_v33, %v283_v29  ;;  %v316_v38 = vsel %vm300_vm0, %v283_v29, %v299_v33 }
 0x10a   : > { %v329_v39 = vmul.f32 %v5450_v18, %v315_v36  ;;  %v330_v40 = vmul.f32 %v5442_v16, %v303_v35  ;;  %v331_v41 = vmul.f32 %v5450_v18, %v316_v38  ;;  %v332_v42 = vmul.f32 %v5442_v16, %v304_v37  ;;  %1052 = vperm.xlu0 %4842, %v1046_v49  }
 0x10b   : > { %1057 = vperm.xlu1 %4843, %v1047_v50   ;;  %v5500_v33 = vrot.slane %v5439_v13, %v425_v20 }
 0x10c   : > { %v334_v43 = vpop.permute.xlu0 %333  ;;  %v336_v44 = vpop.permute.xlu1 %335  ;;  %v4326_v45 = vpack.c.bf16 %v332_v42, %v330_v40  ;;  %v4328_v46 = vpack.c.bf16 %v331_v41, %v329_v39 }
 0x10e   : > { %4327 = vmatprep.subr.bf16.mxu0 %v4326_v45  ;;  %1067 = vperm.xlu0 %4842, %v1049_v58  }
 0x10f   : > { %4329 = vmatpush1.bf16.msra.mxu0 %v4328_v46  ;;  %1062 = vperm.xlu1 %4843, %v1048_v63  }
 0x110   : > { %v346_v52 = vpop.permute.xlu0 %345  ;;  %v348_v53 = vpop.permute.xlu1 %347 }
 0x111   : > { %v354_v54 = vsel %vm353_vm1, %v346_v52, %v334_v43  ;;  %v366_v55 = vsel %vm353_vm1, %v334_v43, %v346_v52  ;;  %v355_v56 = vsel %vm353_vm1, %v348_v53, %v336_v44  ;;  %v367_v57 = vsel %vm353_vm1, %v336_v44, %v348_v53 }
 0x112   : > { %v378_v59 = vmul.f32 %v5477_v47, %v366_v55  ;;  %v379_v60 = vmul.f32 %v5480_v48, %v354_v54  ;;  %v380_v61 = vmul.f32 %v5477_v47, %v367_v57  ;;  %v381_v62 = vmul.f32 %v5480_v48, %v355_v56 }
 0x113   : > { %v482_v53 = vsub.s32 3, %v5426_v10 }
 0x114   : > { %v338_v9 = vpop.permute.xlu0 %337  ;;  %v340_v11 = vpop.permute.xlu1 %339  ;;  %v4330_v14 = vpack.c.bf16 %v381_v62, %v379_v60  ;;  %v4332_v15 = vpack.c.bf16 %v380_v61, %v378_v59 }
 0x116   : > { %4331 = vmatprep.subr.bf16.mxu0 %v4330_v14  ;;  %v5523_v14 = vrot.slane %v5437_v12, %v482_v53 }
 0x117   : > { %4333 = vmatpush1.bf16.msra.mxu0 %v4332_v15  ;;  %v5526_v15 = vrot.slane %v5439_v13, %v482_v53 }
 0x118   : > { %v350_v17 = vpop.permute.xlu0 %349  ;;  %v352_v19 = vpop.permute.xlu1 %351 }
 0x119   : > { %v356_v21 = vsel %vm353_vm1, %v350_v17, %v338_v9  ;;  %v368_v22 = vsel %vm353_vm1, %v338_v9, %v350_v17  ;;  %v357_v23 = vsel %vm353_vm1, %v352_v19, %v340_v11  ;;  %v369_v24 = vsel %vm353_vm1, %v340_v11, %v352_v19  ;;  %v439_v17 = vld [vmem:[#allocation6] sm:$0xff] }
 0x11a   : > { %v382_v25 = vmul.f32 %v5477_v47, %v368_v22  ;;  %v383_v26 = vmul.f32 %v5480_v48, %v356_v21  ;;  %v384_v27 = vmul.f32 %v5477_v47, %v369_v24  ;;  %v385_v28 = vmul.f32 %v5480_v48, %v357_v23 }
 0x11b   : > { %v812_v21 = vsub.s32 6, %v5426_v10 }
 0x11c   : > { %v387_v29 = vpop.permute.xlu0 %386  ;;  %v389_v30 = vpop.permute.xlu1 %388  ;;  %v4334_v31 = vpack.c.bf16 %v385_v28, %v383_v26  ;;  %v4336_v32 = vpack.c.bf16 %v384_v27, %v382_v25 }
 0x11e   : > { %4335 = vmatprep.subr.bf16.mxu0 %v4334_v31 }
 0x11f   : > { %4337 = vmatpush1.bf16.msra.mxu0 %v4336_v32 }
 0x120   : > { %v399_v35 = vpop.permute.xlu0 %398  ;;  %v401_v36 = vpop.permute.xlu1 %400 }
 0x121   : > { %v407_v37 = vsel %vm406_vm2, %v399_v35, %v387_v29  ;;  %v419_v38 = vsel %vm406_vm2, %v387_v29, %v399_v35  ;;  %v408_v39 = vsel %vm406_vm2, %v401_v36, %v389_v30  ;;  %v420_v40 = vsel %vm406_vm2, %v389_v30, %v401_v36  ;;  %v440_v30 = vld [vmem:[#allocation6 + $0x8] sm:$0xff] }
 0x122   : > { %v431_v41 = vmul.f32 %v5500_v33, %v419_v38  ;;  %v432_v42 = vmul.f32 %v5503_v34, %v407_v37  ;;  %v433_v43 = vmul.f32 %v5500_v33, %v420_v40  ;;  %v434_v44 = vmul.f32 %v5503_v34, %v408_v39 }
 0x123   : > { %v5540_v37 = vrot.slane %v5439_v13, %v812_v21  ;;  %v5543_v38 = vrot.slane %v5437_v12, %v812_v21 }
 0x124   : > { %v391_v45 = vpop.permute.xlu0 %390  ;;  %v393_v46 = vpop.permute.xlu1 %392  ;;  %v4338_v49 = vpack.c.bf16 %v434_v44, %v432_v42  ;;  %v4340_v50 = vpack.c.bf16 %v433_v43, %v431_v41  ;;  %v498_v41 = vsub.s32 4, %v5426_v10  ;;  %v441_v42 = vld [vmem:[#allocation6 + $0x10] sm:$0xff] }
 0x126   : > { %4339 = vmatprep.subr.bf16.mxu0 %v4338_v49  ;;  %v5558_v53 = vrot.slane %v5437_v12, %v498_v41 }
 0x127   : > { %4341 = vmatpush1.bf16.msra.mxu0 %v4340_v50 }
 0x128   : > { %v403_v51 = vpop.permute.xlu0 %402  ;;  %v405_v52 = vpop.permute.xlu1 %404 }
 0x129   : > { %v409_v54 = vsel %vm406_vm2, %v403_v51, %v391_v45  ;;  %v421_v55 = vsel %vm406_vm2, %v391_v45, %v403_v51  ;;  %v410_v56 = vsel %vm406_vm2, %v405_v52, %v393_v46  ;;  %v422_v57 = vsel %vm406_vm2, %v393_v46, %v405_v52 }
 0x12a   : > { %v435_v58 = vmul.f32 %v5500_v33, %v421_v55  ;;  %v436_v59 = vmul.f32 %v5503_v34, %v409_v54  ;;  %v437_v60 = vmul.f32 %v5500_v33, %v422_v57  ;;  %v438_v61 = vmul.f32 %v5503_v34, %v410_v56  ;;  %v442_v54 = vld [vmem:[#allocation6 + $0x18] sm:$0xff] }
 0x12c   : > { %v444_v62 = vpop.permute.xlu0 %443  ;;  %v446_v63 = vpop.permute.xlu1 %445  ;;  %v4342_v9 = vpack.c.bf16 %v438_v61, %v436_v59  ;;  %v4344_v11 = vpack.c.bf16 %v437_v60, %v435_v58  ;;  %v5562_v59 = vrot.slane %v5439_v13, %v498_v41  ;;  %v505_v60 = vmul.f32 %v5558_v53, %v5300_v0 }
 0x12d   : > { %v507_v61 = vmul.f32 %v5558_v53, %v5308_v2  ;;  %v865_v41 = vsub.s32 7, %v5426_v10 }
 0x12e   : > { %4343 = vmatprep.subr.bf16.mxu0 %v4342_v9  ;;  %v504_v9 = vmul.f32 %v5562_v59, %v5302_v1 }
 0x12f   : > { %4345 = vmatpush1.bf16.msra.mxu0 %v4344_v11  ;;  %v506_v11 = vmul.f32 %v5562_v59, %v5310_v3  ;;  %v4306_v1 = vpack.c.bf16 %v507_v61, %v505_v60 }
 0x130   : > { %v456_v19 = vpop.permute.xlu0 %455  ;;  %v458_v20 = vpop.permute.xlu1 %457 }
 0x131   : > { %v476_v22 = vsel %vm463_vm3, %v444_v62, %v456_v19  ;;  %v477_v23 = vsel %vm463_vm3, %v446_v63, %v458_v20  ;;  %v464_v24 = vsel %vm463_vm3, %v456_v19, %v444_v62  ;;  %v465_v25 = vsel %vm463_vm3, %v458_v20, %v446_v63 }
 0x132   : > { %v489_v26 = vmul.f32 %v5523_v14, %v464_v24  ;;  %v491_v27 = vmul.f32 %v5523_v14, %v465_v25  ;;  %v488_v28 = vmul.f32 %v5526_v15, %v476_v22  ;;  %v490_v29 = vmul.f32 %v5526_v15, %v477_v23  ;;  %4233 = vmatmul.mubr.msk.f32.vlgmr.msra.gmra.mrb[0].mxu0 %vm570_vm4, %v439_v17 }
 0x133   : > { %754 = vmatprep.mubr.f32.mxu0 %v7515_v8 }
 0x134   : > { %v774_v31 = vpop.permute.xlu0 %773  ;;  %v776_v32 = vpop.permute.xlu1 %775  ;;  %v4298_v35 = vpack.c.bf16 %v491_v27, %v489_v26  ;;  %v4300_v36 = vpack.c.bf16 %v490_v29, %v488_v28  ;;  %v509_v27 = vmul.f32 %v5558_v53, %v5316_v4  ;;  %v511_v28 = vmul.f32 %v5558_v53, %v5318_v5 }
 0x135   : > { %v790_v39 = vsel %vm789_vm5, %v774_v31, %v776_v32  ;;  %v806_v40 = vsel %vm789_vm5, %v776_v32, %v774_v31  ;;  %v4308_v29 = vpack.c.bf16 %v506_v11, %v504_v9  ;;  %v508_v32 = vmul.f32 %v5562_v59, %v5324_v6 }
 0x136   : > { %4299 = vmatprep.subr.bf16.mxu1 %v4298_v35  ;;  %4234 = vmatmul.mubr.msk.f32.gmra.mrb[2].mxu0 %vm570_vm4, %v440_v30  ;;  %v818_v49 = vmul.f32 %v5540_v37, %v790_v39  ;;  %v819_v50 = vmul.f32 %v5543_v38, %v806_v40  ;;  %v510_v35 = vmul.f32 %v5562_v59, %v5326_v7 }
 0x137   : > { %4301 = vmatpush1.bf16.msra.mxu1 %v4300_v36  ;;  %760 = vmatprep.mubr.f32.mxu0 %v7515_v8  ;;  %v4310_v4 = vpack.c.bf16 %v511_v28, %v509_v27 }
 0x138   : > { %v778_v43 = vpop.permute.xlu0 %777  ;;  %v780_v44 = vpop.permute.xlu1 %779  ;;  %v4312_v7 = vpack.c.bf16 %v510_v35, %v508_v32 }
 0x139   : > { %v791_v45 = vsel %vm789_vm5, %v778_v43, %v780_v44  ;;  %v807_v46 = vsel %vm789_vm5, %v780_v44, %v778_v43 }
 0x13a   : > { %v820_v51 = vmul.f32 %v5540_v37, %v791_v45  ;;  %v821_v52 = vmul.f32 %v5543_v38, %v807_v46  ;;  %4235 = vmatmul.mubr.msk.f32.gmra.mrb[4].mxu0 %vm570_vm4, %v441_v42 }
 0x13b   : > { %766 = vmatprep.mubr.f32.mxu0 %v7515_v8 }
 0x13c   : > { %v4348_v55 = vpack.c.bf16 %v820_v51, %v818_v49  ;;  %v448_v56 = vpop.permute.xlu0 %447  ;;  %v450_v57 = vpop.permute.xlu1 %449  ;;  %v4346_v58 = vpack.c.bf16 %v821_v52, %v819_v50  ;;  %v5600_v51 = vrot.slane %v5439_v13, %v865_v41  ;;  %v5603_v52 = vrot.slane %v5437_v12, %v865_v41 }
 0x13e   : > { %4347 = vmatprep.subr.bf16.mxu0 %v4346_v58  ;;  %4236 = vmatmul.mubr.msk.f32.gmra.mrb[6].mxu0 %vm570_vm4, %v442_v54  ;;  %7555 = vst [vmem:[#allocation16_spill] sm:$0xff] %v5600_v51 }
 0x13f   : > { %4349 = vmatpush1.bf16.msra.mxu0 %v4348_v55  ;;  %1013 = vmatprep.mubr.f32.mxu0 %v7515_v8 }
 0x140   : > { %v460_v62 = vpop.permute.xlu0 %459  ;;  %v462_v63 = vpop.permute.xlu1 %461 }
 0x141   : > { %v466_v17 = vsel %vm463_vm3, %v460_v62, %v448_v56  ;;  %v478_v19 = vsel %vm463_vm3, %v448_v56, %v460_v62  ;;  %v467_v20 = vsel %vm463_vm3, %v462_v63, %v450_v57  ;;  %v479_v0 = vsel %vm463_vm3, %v450_v57, %v462_v63 }
 0x142   : > { %v492_v2 = vmul.f32 %v5526_v15, %v478_v19  ;;  %v493_v21 = vmul.f32 %v5523_v14, %v466_v17  ;;  %v494_v22 = vmul.f32 %v5526_v15, %v479_v0  ;;  %v495_v23 = vmul.f32 %v5523_v14, %v467_v20 }
 0x144   : > { %v782_v24 = vpop.permute.xlu0 %781  ;;  %v784_v25 = vpop.permute.xlu1 %783  ;;  %v4302_v3 = vpack.c.bf16 %v495_v23, %v493_v21  ;;  %v4304_v26 = vpack.c.bf16 %v494_v22, %v492_v2 }
 0x145   : > { %v792_v30 = vsel %vm789_vm5, %v782_v24, %v784_v25  ;;  %v808_v31 = vsel %vm789_vm5, %v784_v25, %v782_v24  ;;  %v551_v24 = vsub.s32 5, %v5426_v10 }
 0x146   : > { %4303 = vmatprep.subr.bf16.mxu1 %v4302_v3  ;;  %v822_v42 = vmul.f32 %v5540_v37, %v792_v30  ;;  %v823_v43 = vmul.f32 %v5543_v38, %v808_v31 }
 0x147   : > { %4305 = vmatpush1.bf16.msra.mxu1 %v4304_v26  ;;  %v5623_v32 = vrot.slane %v5439_v13, %v551_v24  ;;  %v5626_v35 = vrot.slane %v5437_v12, %v551_v24 }
 0x148   : > { %v786_v36 = vpop.permute.xlu0 %785  ;;  %v788_v39 = vpop.permute.xlu1 %787  ;;  %4307 = vmatprep.subr.bf16.mxu1 %v4306_v1 }
 0x149   : > { %v793_v40 = vsel %vm789_vm5, %v786_v36, %v788_v39  ;;  %v809_v5 = vsel %vm789_vm5, %v788_v39, %v786_v36 }
 0x14a   : > { %v824_v44 = vmul.f32 %v5540_v37, %v793_v40  ;;  %v825_v6 = vmul.f32 %v5543_v38, %v809_v5 }
 0x14b   : > { %4309 = vmatpush1.bf16.msra.mxu1 %v4308_v29 }
 0x14c   : > { %v4352_v45 = vpack.c.bf16 %v824_v44, %v822_v42  ;;  %v827_v46 = vpop.permute.xlu0 %826  ;;  %v829_v49 = vpop.permute.xlu1 %828  ;;  %v4350_v50 = vpack.c.bf16 %v825_v6, %v823_v43  ;;  %4311 = vmatprep.subr.bf16.mxu1 %v4310_v4 }
 0x14d   : > { %v843_v54 = vsel %vm842_vm6, %v827_v46, %v829_v49  ;;  %v859_v55 = vsel %vm842_vm6, %v829_v49, %v827_v46  ;;  %v5638_v46 = vld [vmem:[#allocation9 + $0x18] ss:$0 sm:$0xff] }
 0x14e   : > { %4351 = vmatprep.subr.bf16.mxu0 %v4350_v50  ;;  %v871_v61 = vmul.f32 %v5600_v51, %v843_v54  ;;  %v872_v62 = vmul.f32 %v5603_v52, %v859_v55 }
 0x14f   : > { %4353 = vmatpush1.bf16.msra.mxu0 %v4352_v45  ;;  %4313 = vmatpush1.bf16.msra.mxu1 %v4312_v7  ;;  %v5636_v45 = vld [vmem:[#allocation9 + $0x10] ss:$0 sm:$0xff] }
 0x150   : > { %v831_v56 = vpop.permute.xlu0 %830  ;;  %v833_v57 = vpop.permute.xlu1 %832  ;;  %7556 = vst [vmem:[#allocation17_spill] sm:$0xff] %v5636_v45 }
 0x151   : > { %v844_v58 = vsel %vm842_vm6, %v831_v56, %v833_v57  ;;  %v860_v60 = vsel %vm842_vm6, %v833_v57, %v831_v56 }
 0x152   : > { %v873_v63 = vmul.f32 %v5600_v51, %v844_v58  ;;  %v874_v9 = vmul.f32 %v5603_v52, %v860_v60 }
 0x154   : > { %v4356_v11 = vpack.c.bf16 %v873_v63, %v871_v61  ;;  %v835_v17 = vpop.permute.xlu0 %834  ;;  %v837_v19 = vpop.permute.xlu1 %836  ;;  %v4354_v20 = vpack.c.bf16 %v874_v9, %v872_v62 }
 0x155   : > { %v845_v0 = vsel %vm842_vm6, %v835_v17, %v837_v19  ;;  %v861_v2 = vsel %vm842_vm6, %v837_v19, %v835_v17 }
 0x156   : > { %4355 = vmatprep.subr.bf16.mxu0 %v4354_v20  ;;  %v875_v25 = vmul.f32 %v5600_v51, %v845_v0  ;;  %v876_v3 = vmul.f32 %v5603_v52, %v861_v2 }
 0x157   : > { %4357 = vmatpush1.bf16.msra.mxu0 %v4356_v11 }
 0x158   : > { %v839_v21 = vpop.permute.xlu0 %838  ;;  %v841_v22 = vpop.permute.xlu1 %840 }
 0x159   : > { %v846_v23 = vsel %vm842_vm6, %v839_v21, %v841_v22  ;;  %v862_v1 = vsel %vm842_vm6, %v841_v22, %v839_v21 }
 0x15a   : > { %v877_v26 = vmul.f32 %v5600_v51, %v846_v23  ;;  %v878_v27 = vmul.f32 %v5603_v52, %v862_v1 }
 0x15c   : > { %v4360_v28 = vpack.c.bf16 %v877_v26, %v875_v25  ;;  %v513_v29 = vpop.permute.xlu0 %512  ;;  %v515_v30 = vpop.permute.xlu1 %514  ;;  %v4358_v31 = vpack.c.bf16 %v878_v27, %v876_v3 }
 0x15d   : > { %v529_v10 = vsel %vm528_vm7, %v513_v29, %v515_v30  ;;  %v545_v36 = vsel %vm528_vm7, %v515_v30, %v513_v29 }
 0x15e   : > { %4359 = vmatprep.subr.bf16.mxu0 %v4358_v31  ;;  %v557_v41 = vmul.f32 %v5623_v32, %v529_v10  ;;  %v558_v13 = vmul.f32 %v5626_v35, %v545_v36  ;;  %v566_v31 = vld [vmem:[#allocation6 + $0x20] sm:$0xff] }
 0x15f   : > { %4361 = vmatpush1.bf16.msra.mxu0 %v4360_v28 }
 0x160   : > { %v517_v39 = vpop.permute.xlu0 %516  ;;  %v519_v4 = vpop.permute.xlu1 %518 }
 0x161   : > { %v530_v40 = vsel %vm528_vm7, %v517_v39, %v519_v4  ;;  %v546_v5 = vsel %vm528_vm7, %v519_v4, %v517_v39 }
 0x162   : > { %v559_v42 = vmul.f32 %v5623_v32, %v530_v40  ;;  %v560_v12 = vmul.f32 %v5626_v35, %v546_v5 }
 0x164   : > { %v880_v43 = vpop.permute.xlu0 %879  ;;  %v882_v44 = vpop.permute.xlu1 %881  ;;  %v4314_v6 = vpack.c.bf16 %v560_v12, %v558_v13  ;;  %v4316_v7 = vpack.c.bf16 %v559_v42, %v557_v41  ;;  %v567_v42 = vld [vmem:[#allocation6 + $0x28] sm:$0xff] }
 0x165   : > { %v896_v49 = vsel %vm895_vm8, %v880_v43, %v882_v44  ;;  %v912_v50 = vsel %vm895_vm8, %v882_v44, %v880_v43  ;;  %v933_v44 = vld [vmem:[#allocation6 + $0x40] sm:$0xff] }
 0x166   : > { %4315 = vmatprep.subr.bf16.mxu1 %v4314_v6  ;;  %v924_v58 = vmul.f32 %v5636_v45, %v896_v49  ;;  %v925_v60 = vmul.f32 %v5638_v46, %v912_v50  ;;  %v568_v6 = vld [vmem:[#allocation6 + $0x30] sm:$0xff]  ;;  %v569_v49 = vld [vmem:[#allocation6 + $0x38] sm:$0xff] }
 0x167   : > { %4317 = vmatpush1.bf16.msra.mxu1 %v4316_v7  ;;  %v934_v7 = vld [vmem:[#allocation6 + $0x48] sm:$0xff]  ;;  %v935_v50 = vld [vmem:[#allocation6 + $0x50] sm:$0xff] }
 0x168   : > { %v884_v54 = vpop.permute.xlu0 %883  ;;  %v886_v55 = vpop.permute.xlu1 %885 }
 0x169   : > { %v897_v56 = vsel %vm895_vm8, %v884_v54, %v886_v55  ;;  %v913_v57 = vsel %vm895_vm8, %v886_v55, %v884_v54  ;;  %v936_v54 = vld [vmem:[#allocation6 + $0x58] sm:$0xff] }
 0x16a   : > { %v926_v61 = vmul.f32 %v5636_v45, %v897_v56  ;;  %v927_v62 = vmul.f32 %v5638_v46, %v913_v57 }
 0x16c   : > { %v4364_v63 = vpack.c.bf16 %v926_v61, %v924_v58  ;;  %v521_v9 = vpop.permute.xlu0 %520  ;;  %v523_v11 = vpop.permute.xlu1 %522  ;;  %v4362_v17 = vpack.c.bf16 %v927_v62, %v925_v60 }
 0x16d   : > { %v531_v19 = vsel %vm528_vm7, %v521_v9, %v523_v11  ;;  %v547_v20 = vsel %vm528_vm7, %v523_v11, %v521_v9 }
 0x16e   : > { %4363 = vmatprep.subr.bf16.mxu0 %v4362_v17  ;;  %v561_v23 = vmul.f32 %v5623_v32, %v531_v19  ;;  %v562_v1 = vmul.f32 %v5626_v35, %v547_v20 }
 0x16f   : > { %4365 = vmatpush1.bf16.msra.mxu0 %v4364_v63 }
 0x170   : > { %v525_v0 = vpop.permute.xlu0 %524  ;;  %v527_v2 = vpop.permute.xlu1 %526 }
 0x171   : > { %v532_v21 = vsel %vm528_vm7, %v525_v0, %v527_v2  ;;  %v548_v22 = vsel %vm528_vm7, %v527_v2, %v525_v0 }
 0x172   : > { %v563_v24 = vmul.f32 %v5623_v32, %v532_v21  ;;  %v564_v25 = vmul.f32 %v5626_v35, %v548_v22 }
 0x174   : > { %v888_v3 = vpop.permute.xlu0 %887  ;;  %v890_v26 = vpop.permute.xlu1 %889  ;;  %v4318_v27 = vpack.c.bf16 %v564_v25, %v562_v1  ;;  %v4320_v28 = vpack.c.bf16 %v563_v24, %v561_v23 }
 0x175   : > { %v898_v29 = vsel %vm895_vm8, %v888_v3, %v890_v26  ;;  %v914_v30 = vsel %vm895_vm8, %v890_v26, %v888_v3 }
 0x176   : > { %4319 = vmatprep.subr.bf16.mxu1 %v4318_v27  ;;  %v928_v40 = vmul.f32 %v5636_v45, %v898_v29  ;;  %v929_v5 = vmul.f32 %v5638_v46, %v914_v30 }
 0x177   : > { %4321 = vmatpush1.bf16.msra.mxu1 %v4320_v28 }
 0x178   : > { %v892_v10 = vpop.permute.xlu0 %891  ;;  %v894_v36 = vpop.permute.xlu1 %893 }
 0x179   : > { %v899_v39 = vsel %vm895_vm8, %v892_v10, %v894_v36  ;;  %v915_v4 = vsel %vm895_vm8, %v894_v36, %v892_v10 }
 0x17a   : > { %v930_v41 = vmul.f32 %v5636_v45, %v899_v39  ;;  %v931_v13 = vmul.f32 %v5638_v46, %v915_v4  ;;  %4229 = vmatmul.mubr.msk.f32.vlgmr.msra.gmra.mrb[0].mxu1 %vm570_vm4, %v566_v31 }
 0x17b   : > { %653 = vmatprep.mubr.f32.mxu1 %v7515_v8 }
 0x17c   : > { %v4368_v12 = vpack.c.bf16 %v930_v41, %v928_v40  ;;  %v4366_v43 = vpack.c.bf16 %v931_v13, %v929_v5 }
 0x17e   : > { %4367 = vmatprep.subr.bf16.mxu0 %v4366_v43  ;;  %4230 = vmatmul.mubr.msk.f32.gmra.mrb[2].mxu1 %vm570_vm4, %v567_v42 }
 0x17f   : > { %4369 = vmatpush1.bf16.msra.mxu0 %v4368_v12  ;;  %659 = vmatprep.mubr.f32.mxu1 %v7515_v8 }
 0x182   : > { %4239 = vmatmul.mubr.msk.f32.vlgmr.msra.gmra.mrb[0].mxu0 %vm570_vm4, %v933_v44  ;;  %4231 = vmatmul.mubr.msk.f32.gmra.mrb[4].mxu1 %vm570_vm4, %v568_v6 }
 0x183   : > { %1019 = vmatprep.mubr.f32.mxu0 %v7515_v8  ;;  %665 = vmatprep.mubr.f32.mxu1 %v7515_v8 }
 0x186   : > { %4240 = vmatmul.mubr.msk.f32.gmra.mrb[2].mxu0 %vm570_vm4, %v934_v7  ;;  %4232 = vmatmul.mubr.msk.f32.gmra.mrb[6].mxu1 %vm570_vm4, %v569_v49 }
 0x187   : > { %1025 = vmatprep.mubr.f32.mxu0 %v7515_v8  ;;  %1440 = vmatprep.mubr.f32.mxu1 %v7515_v8 }
 0x189   : > { %v1053_v11 = vpop.permute.xlu0 %1052 }
 0x18a   : > { %4241 = vmatmul.mubr.msk.f32.gmra.mrb[4].mxu0 %vm570_vm4, %v935_v50  ;;  %v1058_v25 = vpop.permute.xlu1 %1057 }
 0x18b   : > { %1031 = vmatprep.mubr.f32.mxu0 %v7515_v8 }
 0x18d   : > { %v1068_v7 = vpop.permute.xlu0 %1067 }
 0x18e   : > { %4242 = vmatmul.mubr.msk.f32.gmra.mrb[6].mxu0 %vm570_vm4, %v936_v54  ;;  %v1063_v43 = vpop.permute.xlu1 %1062 }
 0x18f   : > { %2175 = vmatprep.mubr.f32.mxu0 %v7515_v8 }
 0x24d   : > { %v649_v55 = vpop.f32.mrb[0].mxu1 }
 0x24e   : > { %v651_v56 = vpop.f32.mrb[1].mxu1 }
 0x251   : > { %v655_v57 = vpop.f32.mrb[2].mxu1 }
 0x252   : > { %v657_v58 = vpop.f32.mrb[3].mxu1 }
 0x255   : > { %v1015_v60 = vpop.f32.mrb[0].mxu0  ;;  %v661_v61 = vpop.f32.mrb[4].mxu1 }
 0x256   : > { %v4670_v62 = vadd.f32 %v1015_v60, %v649_v55  ;;  %v1017_v63 = vpop.f32.mrb[1].mxu0  ;;  %v663_v9 = vpop.f32.mrb[5].mxu1 }
 0x257   : > { %v4671_v17 = vadd.f32 %v1017_v63, %v651_v56 }
 0x258   : > { %v1070_v19 = vadd.f32 %v4670_v62, %v1053_v11 }
 0x259   : > { %v1071_v20 = vadd.f32 %v4671_v17, %v1053_v11  ;;  %v1021_v0 = vpop.f32.mrb[2].mxu0  ;;  %v667_v2 = vpop.f32.mrb[6].mxu1 }
 0x25a   : > { %vm1078_vm9 = vcmp.ge.f32.partialorder %v1070_v19, 0.0  ;;  %v1086_v21 = vmul.f32 0.1, %v1070_v19  ;;  %v4672_v22 = vadd.f32 %v1021_v0, %v655_v57  ;;  %v1023_v23 = vpop.f32.mrb[3].mxu0  ;;  %v669_v1 = vpop.f32.mrb[7].mxu1  ;;  %v1813_v0 = vld [vmem:[#allocation8 + $0x20] sm:$0xff] }
 0x25b   : > { %vm1079_vm10 = vcmp.ge.f32.partialorder %v1071_v20, 0.0  ;;  %v1087_v24 = vmul.f32 0.1, %v1071_v20  ;;  %v4673_v3 = vadd.f32 %v1023_v23, %v657_v58  ;;  %v1815_v23 = vld [vmem:[#allocation8 + $0x30] sm:$0xff] }
 0x25c   : > { %v5680_v26 = vsel %vm1078_vm9, %v1070_v19, %v1086_v21  ;;  %v1072_v27 = vadd.f32 %v4672_v22, %v1058_v25  ;;  %v1814_v21 = vld [vmem:[#allocation8 + $0x28] sm:$0xff] }
 0x25d   : > { %7557 = vst [vmem:[#allocation18_spill] sm:$0xff] %v5680_v26  ;;  %v5682_v28 = vsel %vm1079_vm10, %v1071_v20, %v1087_v24  ;;  %1275 = vrot.lane.b32.xlu1 %v5680_v26, %s5049_s10  ;;  %v1027_v29 = vpop.f32.mrb[4].mxu0  ;;  %v1073_v13 = vadd.f32 %v4673_v3, %v1058_v25  ;;  %v1816_v24 = vld [vmem:[#allocation8 + $0x38] sm:$0xff] }
 0x25e   : > { %7558 = vst [vmem:[#allocation19_spill] sm:$0xff] %v5682_v28  ;;  %vm1080_vm11 = vcmp.ge.f32.partialorder %v1072_v27, 0.0  ;;  %v1088_v30 = vmul.f32 0.1, %v1072_v27  ;;  %v4674_v31 = vadd.f32 %v1027_v29, %v661_v61  ;;  %1317 = vrot.lane.b32.xlu0 %v5682_v28, %s5053_s14  ;;  %v1029_v10 = vpop.f32.mrb[5].mxu0 }
 0x25f   : > { %v4675_v36 = vadd.f32 %v1029_v10, %v663_v9  ;;  %v1089_v42 = vmul.f32 0.1, %v1073_v13  ;;  %vm1081_vm12 = vcmp.ge.f32.partialorder %v1073_v13, 0.0 }
 0x260   : > { %v5688_v39 = vsel %vm1080_vm11, %v1072_v27, %v1088_v30  ;;  %v1074_v44 = vadd.f32 %v4674_v31, %v1063_v43 }
 0x261   : > { %7559 = vst [vmem:[#allocation20_spill] sm:$0xff] %v5688_v39  ;;  %1315 = vrot.lane.b32.xlu1 %v5680_v26, %s5053_s14  ;;  %v1033_v4 = vpop.f32.mrb[6].mxu0  ;;  %v5706_v12 = vsel %vm1081_vm12, %v1073_v13, %v1089_v42  ;;  %v1075_v6 = vadd.f32 %v4675_v36, %v1063_v43 }
 0x262   : > { %v4676_v40 = vadd.f32 %v1033_v4, %v667_v2  ;;  %1277 = vrot.lane.b32.xlu0 %v5688_v39, %s5049_s10  ;;  %v1035_v5 = vpop.f32.mrb[7].mxu0  ;;  %7560 = vst [vmem:[#allocation21_spill] sm:$0xff] %v5706_v12  ;;  %v1090_v49 = vmul.f32 0.1, %v1074_v44  ;;  %vm1082_vm13 = vcmp.ge.f32.partialorder %v1074_v44, 0.0 }
 0x263   : > { %v4677_v41 = vadd.f32 %v1035_v5, %v669_v1  ;;  %v1091_v50 = vmul.f32 0.1, %v1075_v6  ;;  %vm1083_vm14 = vcmp.ge.f32.partialorder %v1075_v6, 0.0 }
 0x264   : > { %v1076_v54 = vadd.f32 %v4676_v40, %v1068_v7  ;;  %v5728_v55 = vsel %vm1082_vm13, %v1074_v44, %v1090_v49 }
 0x265   : > { %1138 = vrot.lane.b32.xlu1 %v5680_v26, %s5046_s23  ;;  %7561 = vst [vmem:[#allocation22_spill] sm:$0xff] %v5728_v55  ;;  %v5730_v56 = vsel %vm1083_vm14, %v1075_v6, %v1091_v50  ;;  %v1077_v60 = vadd.f32 %v4677_v41, %v1068_v7 }
 0x266   : > { %1140 = vrot.lane.b32.xlu0 %v5688_v39, %s5046_s23  ;;  %7562 = vst [vmem:[#allocation23_spill] sm:$0xff] %v5730_v56  ;;  %v1092_v57 = vmul.f32 0.1, %v1076_v54  ;;  %vm1084_vm15 = vcmp.ge.f32.partialorder %v1076_v54, 0.0 }
 0x267   : > { %v1093_v61 = vmul.f32 0.1, %v1077_v60  ;;  %vm1085_vm9 = vcmp.ge.f32.partialorder %v1077_v60, 0.0 }
 0x268   : > { %v5736_v58 = vsel %vm1084_vm15, %v1076_v54, %v1092_v57 }
 0x269   : > { %1182 = vrot.lane.b32.xlu1 %v5680_v26, %s5047_s21  ;;  %7563 = vst [vmem:[#allocation24_spill] sm:$0xff] %v5736_v58  ;;  %v5754_v62 = vsel %vm1085_vm9, %v1077_v60, %v1093_v61 }
 0x26a   : > { %1184 = vrot.lane.b32.xlu0 %v5688_v39, %s5047_s21  ;;  %7564 = vst [vmem:[#allocation25_spill] sm:$0xff] %v5754_v62 }
 0x26d   : > { %1226 = vrot.lane.b32.xlu1 %v5680_v26, %s5048_s28 }
 0x26e   : > { %1228 = vrot.lane.b32.xlu0 %v5688_v39, %s5048_s28 }
 0x271   : > { %1263 = vrot.lane.b32.xlu1 %v5682_v28, %s5049_s10 }
 0x272   : > { %1265 = vrot.lane.b32.xlu0 %v5706_v12, %s5049_s10 }
 0x275   : > { %1122 = vrot.lane.b32.xlu1 %v5682_v28, %s5046_s23 }
 0x276   : > { %1321 = vrot.lane.b32.xlu0 %v5706_v12, %s5053_s14 }
 0x279   : > { %1170 = vrot.lane.b32.xlu1 %v5682_v28, %s5047_s21 }
 0x27a   : > { %1124 = vrot.lane.b32.xlu0 %v5706_v12, %s5046_s23 }
 0x27d   : > { %1214 = vrot.lane.b32.xlu1 %v5682_v28, %s5048_s28 }
 0x27e   : > { %1172 = vrot.lane.b32.xlu0 %v5706_v12, %s5047_s21 }
 0x281   : > { %1319 = vrot.lane.b32.xlu1 %v5688_v39, %s5053_s14 }
 0x282   : > { %1216 = vrot.lane.b32.xlu0 %v5706_v12, %s5048_s28 }
 0x285   : > { %1279 = vrot.lane.b32.xlu1 %v5728_v55, %s5049_s10 }
 0x286   : > { %1325 = vrot.lane.b32.xlu0 %v5730_v56, %s5053_s14 }
 0x289   : > { %1323 = vrot.lane.b32.xlu1 %v5728_v55, %s5053_s14 }
 0x28a   : > { %1281 = vrot.lane.b32.xlu0 %v5736_v58, %s5049_s10 }
 0x28d   : > { %1142 = vrot.lane.b32.xlu1 %v5728_v55, %s5046_s23 }
 0x28e   : > { %1144 = vrot.lane.b32.xlu0 %v5736_v58, %s5046_s23 }
 0x291   : > { %1186 = vrot.lane.b32.xlu1 %v5728_v55, %s5047_s21 }
 0x292   : > { %1188 = vrot.lane.b32.xlu0 %v5736_v58, %s5047_s21 }
 0x295   : > { %1230 = vrot.lane.b32.xlu1 %v5728_v55, %s5048_s28 }
 0x296   : > { %1232 = vrot.lane.b32.xlu0 %v5736_v58, %s5048_s28 }
 0x299   : > { %1267 = vrot.lane.b32.xlu1 %v5730_v56, %s5049_s10 }
 0x29a   : > { %1269 = vrot.lane.b32.xlu0 %v5754_v62, %s5049_s10 }
 0x29d   : > { %1126 = vrot.lane.b32.xlu1 %v5730_v56, %s5046_s23 }
 0x29e   : > { %1568 = vrot.lane.b32.xlu0 %v5682_v28, %s5051_s6 }
 0x2a1   : > { %1174 = vrot.lane.b32.xlu1 %v5730_v56, %s5047_s21 }
 0x2a2   : > { %1572 = vrot.lane.b32.xlu0 %v5706_v12, %s5051_s6 }
 0x2a5   : > { %1218 = vrot.lane.b32.xlu1 %v5730_v56, %s5048_s28 }
 0x2a6   : > { %1576 = vrot.lane.b32.xlu0 %v5730_v56, %s5051_s6 }
 0x2a9   : > { %1327 = vrot.lane.b32.xlu1 %v5736_v58, %s5053_s14 }
 0x2aa   : > { %1329 = vrot.lane.b32.xlu0 %v5754_v62, %s5053_s14 }
 0x2ad   : > { %1566 = vrot.lane.b32.xlu1 %v5680_v26, %s5051_s6 }
 0x2ae   : > { %1612 = vrot.lane.b32.xlu0 %v5682_v28, %s5052_s8 }
 0x2b1   : > { %1570 = vrot.lane.b32.xlu1 %v5688_v39, %s5051_s6 }
 0x2b2   : > { %1128 = vrot.lane.b32.xlu0 %v5754_v62, %s5046_s23 }
 0x2b5   : > { %1574 = vrot.lane.b32.xlu1 %v5728_v55, %s5051_s6 }
 0x2b6   : > { %1616 = vrot.lane.b32.xlu0 %v5706_v12, %s5052_s8 }
 0x2b9   : > { %1578 = vrot.lane.b32.xlu1 %v5736_v58, %s5051_s6 }
 0x2ba   : > { %1176 = vrot.lane.b32.xlu0 %v5754_v62, %s5047_s21 }
 0x2bd   : > { %1610 = vrot.lane.b32.xlu1 %v5680_v26, %s5052_s8 }
 0x2be   : > { %1620 = vrot.lane.b32.xlu0 %v5730_v56, %s5052_s8 }
 0x2c1   : > { %1614 = vrot.lane.b32.xlu1 %v5688_v39, %s5052_s8 }
 0x2c2   : > { %1220 = vrot.lane.b32.xlu0 %v5754_v62, %s5048_s28 }
 0x2c5   : > { %1618 = vrot.lane.b32.xlu1 %v5728_v55, %s5052_s8 }
 0x2c6   : > { %1656 = vrot.lane.b32.xlu0 %v5682_v28, %s5054_s30 }
 0x2c9   : > { %1622 = vrot.lane.b32.xlu1 %v5736_v58, %s5052_s8 }
 0x2ca   : > { %1580 = vrot.lane.b32.xlu0 %v5754_v62, %s5051_s6 }
 0x2cd   : > { %1654 = vrot.lane.b32.xlu1 %v5680_v26, %s5054_s30 }
 0x2ce   : > { %1660 = vrot.lane.b32.xlu0 %v5706_v12, %s5054_s30 }
 0x2cf   : > { %v1276_v63 = vpop.permute.xlu1 %1275 }
 0x2d0   : > { %v5812_v9 = vpop.permute.xlu0 %1317 }
 0x2d1   : > { %1658 = vrot.lane.b32.xlu1 %v5688_v39, %s5054_s30 }
 0x2d2   : > { %1624 = vrot.lane.b32.xlu0 %v5754_v62, %s5052_s8 }
 0x2d3   : > { %v5818_v11 = vpop.permute.xlu1 %1315 }
 0x2d4   : > { %v1278_v17 = vpop.permute.xlu0 %1277 }
 0x2d5   : > { %1662 = vrot.lane.b32.xlu1 %v5728_v55, %s5054_s30 }
 0x2d6   : > { %1664 = vrot.lane.b32.xlu0 %v5730_v56, %s5054_s30 }
 0x2d7   : > { %v5824_v19 = vpop.permute.xlu1 %1138 }
 0x2d8   : > { %v5826_v20 = vpop.permute.xlu0 %1140 }
 0x2d9   : > { %1666 = vrot.lane.b32.xlu1 %v5736_v58, %s5054_s30 }
 0x2da   : > { %1668 = vrot.lane.b32.xlu0 %v5754_v62, %s5054_s30 }
 0x2db   : > { %v5832_v2 = vpop.permute.xlu1 %1182 }
 0x2dc   : > { %v5834_v22 = vpop.permute.xlu0 %1184 }
 0x2dd   : > { %1819 = vperm.xlu1 %4843, %v1813_v0  }
 0x2de   : > { %1824 = vperm.xlu0 %4842, %v1814_v21  }
 0x2df   : > { %v5836_v1 = vpop.permute.xlu1 %1226 }
 0x2e0   : > { %v5838_v25 = vpop.permute.xlu0 %1228 }
 0x2e1   : > { %1829 = vperm.xlu1 %4843, %v1815_v23  }
 0x2e2   : > { %1834 = vperm.xlu0 %4842, %v1816_v24  }
 0x2e3   : > { %v1264_v3 = vpop.permute.xlu1 %1263 }
 0x2e4   : > { %v1283_v27 = vsel %vm463_vm3, %v1276_v63, %v1264_v3  ;;  %v1295_v29 = vsel %vm463_vm3, %v1264_v3, %v1276_v63  ;;  %v1266_v30 = vpop.permute.xlu0 %1265 }
 0x2e5   : > { %v1299_v31 = vmul.f32 %v1295_v29, %v5526_v15  ;;  %v1300_v10 = vmul.f32 %v1283_v27, %v5523_v14  ;;  %v1284_v36 = vsel %vm463_vm3, %v1278_v17, %v1266_v30  ;;  %v1296_v4 = vsel %vm463_vm3, %v1266_v30, %v1278_v17 }
 0x2e6   : > { %v1301_v40 = vmul.f32 %v1296_v4, %v5526_v15  ;;  %v1302_v5 = vmul.f32 %v1284_v36, %v5523_v14 }
 0x2e7   : > { %v5848_v41 = vpop.permute.xlu1 %1122 }
 0x2e8   : > { %v4372_v13 = vpack.c.bf16 %v1301_v40, %v1299_v31  ;;  %v1322_v42 = vpop.permute.xlu0 %1321  ;;  %v4370_v43 = vpack.c.bf16 %v1302_v5, %v1300_v10 }
 0x2ea   : > { %4371 = vmatprep.subr.bf16.mxu1 %v4370_v43  ;;  %v1310_v43 = vmul.f32 %v5706_v12, %v5558_v53 }
 0x2eb   : > { %v5850_v44 = vpop.permute.xlu1 %1170  ;;  %4373 = vmatpush1.bf16.msra.mxu1 %v4372_v13 }
 0x2ec   : > { %v5852_v6 = vpop.permute.xlu0 %1124 }
 0x2ef   : > { %v5854_v7 = vpop.permute.xlu1 %1214 }
 0x2f0   : > { %v5856_v49 = vpop.permute.xlu0 %1172 }
 0x2f3   : > { %v1320_v50 = vpop.permute.xlu1 %1319 }
 0x2f4   : > { %v5858_v54 = vpop.permute.xlu0 %1216 }
 0x2f7   : > { %v1280_v57 = vpop.permute.xlu1 %1279 }
 0x2f8   : > { %v1326_v60 = vpop.permute.xlu0 %1325 }
 0x2fb   : > { %v1324_v61 = vpop.permute.xlu1 %1323 }
 0x2fc   : > { %v1282_v63 = vpop.permute.xlu0 %1281 }
 0x2ff   : > { %v5860_v17 = vpop.permute.xlu1 %1142 }
 0x300   : > { %v5862_v0 = vpop.permute.xlu0 %1144 }
 0x303   : > { %v5864_v21 = vpop.permute.xlu1 %1186 }
 0x304   : > { %v5866_v23 = vpop.permute.xlu0 %1188 }
 0x307   : > { %v5868_v24 = vpop.permute.xlu1 %1230 }
 0x308   : > { %v5870_v3 = vpop.permute.xlu0 %1232 }
 0x30b   : > { %v1268_v27 = vpop.permute.xlu1 %1267 }
 0x30c   : > { %v1285_v29 = vsel %vm463_vm3, %v1280_v57, %v1268_v27  ;;  %v1297_v30 = vsel %vm463_vm3, %v1268_v27, %v1280_v57  ;;  %v1270_v31 = vpop.permute.xlu0 %1269 }
 0x30d   : > { %v1303_v10 = vmul.f32 %v1297_v30, %v5526_v15  ;;  %v1304_v36 = vmul.f32 %v1285_v29, %v5523_v14  ;;  %v1286_v4 = vsel %vm463_vm3, %v1282_v63, %v1270_v31  ;;  %v1298_v40 = vsel %vm463_vm3, %v1270_v31, %v1282_v63 }
 0x30e   : > { %v1305_v5 = vmul.f32 %v1298_v40, %v5526_v15  ;;  %v1306_v13 = vmul.f32 %v1286_v4, %v5523_v14  ;;  %v1308_v29 = vmul.f32 %v5682_v28, %v5558_v53  ;;  %v1309_v30 = vmul.f32 %v5688_v39, %v5562_v59 }
 0x30f   : > { %v5882_v8 = vpop.permute.xlu1 %1126  ;;  %v1314_v31 = vmul.f32 %v5754_v62, %v5558_v53  ;;  %v1348_v4 = vsel %vm528_vm7, %v1322_v42, %v1320_v50 }
 0x310   : > { %v4376_v45 = vpack.c.bf16 %v1305_v5, %v1303_v10  ;;  %v5884_v57 = vpop.permute.xlu0 %1568  ;;  %v4374_v27 = vpack.c.bf16 %v1306_v13, %v1304_v36  ;;  %v4378_v63 = vpack.c.bf16 %v1310_v43, %v1308_v29  ;;  %v1307_v10 = vmul.f32 %v5680_v26, %v5562_v59 }
 0x311   : > { %v1312_v5 = vmul.f32 %v5730_v56, %v5558_v53  ;;  %v1347_v13 = vsel %vm528_vm7, %v5812_v9, %v5818_v11  ;;  %v1332_v29 = vsel %vm528_vm7, %v1320_v50, %v1322_v42  ;;  %v1331_v56 = vsel %vm528_vm7, %v5818_v11, %v5812_v9 }
 0x312   : > { %4375 = vmatprep.subr.bf16.mxu1 %v4374_v27  ;;  %v4380_v43 = vpack.c.bf16 %v1309_v30, %v1307_v10  ;;  %v1313_v27 = vmul.f32 %v5736_v58, %v5562_v59  ;;  %v1352_v30 = vmul.f32 %v1347_v13, %v5626_v35  ;;  %v1353_v42 = vmul.f32 %v1332_v29, %v5623_v32 }
 0x313   : > { %v5893_v40 = vpop.permute.xlu1 %1174  ;;  %4377 = vmatpush1.bf16.msra.mxu1 %v4376_v45  ;;  %v1354_v45 = vmul.f32 %v1348_v4, %v5626_v35  ;;  %v4382_v62 = vpack.c.bf16 %v1314_v31, %v1312_v5  ;;  %v1147_v31 = vsel %vm300_vm0, %v5826_v20, %v5852_v6  ;;  %v1351_v5 = vmul.f32 %v1331_v56, %v5623_v32 }
 0x314   : > { %4379 = vmatprep.subr.bf16.mxu1 %v4378_v63  ;;  %v5897_v36 = vpop.permute.xlu0 %1572  ;;  %v1311_v63 = vmul.f32 %v5728_v55, %v5562_v59  ;;  %v1349_v58 = vsel %vm528_vm7, %v1326_v60, %v1324_v61  ;;  %v1159_v11 = vsel %vm300_vm0, %v5852_v6, %v5826_v20  ;;  %v1158_v20 = vsel %vm300_vm0, %v5848_v41, %v5824_v19 }
 0x315   : > { %v4386_v4 = vpack.c.bf16 %v1354_v45, %v1352_v30  ;;  %v4388_v29 = vpack.c.bf16 %v1353_v42, %v1351_v5 }
 0x316   : > { %v4384_v50 = vpack.c.bf16 %v1313_v27, %v1311_v63  ;;  %v1165_v27 = vmul.f32 %v1147_v31, %v5442_v16 }
 0x317   : > { %v5908_v12 = vpop.permute.xlu1 %1218  ;;  %4381 = vmatpush1.bf16.msra.mxu1 %v4380_v43  ;;  %v1333_v43 = vsel %vm528_vm7, %v1324_v61, %v1326_v60  ;;  %v1356_v61 = vmul.f32 %v1349_v58, %v5626_v35  ;;  %v1162_v58 = vmul.f32 %v1158_v20, %v5450_v18  ;;  %v7565_v20 = vmov 0.0  }
 0x318   : > { %v5916_v10 = vpop.permute.xlu0 %1576  ;;  %4383 = vmatprep.subr.bf16.mxu1 %v4382_v62  ;;  %v1146_v62 = vsel %vm300_vm0, %v5824_v19, %v5848_v41  ;;  %v1355_v60 = vmul.f32 %v1333_v43, %v5623_v32  ;;  %v1191_v43 = vsel %vm353_vm1, %v5834_v22, %v5856_v49  ;;  %v1148_v19 = vsel %vm300_vm0, %v5860_v17, %v5882_v8 }
 0x319   : > { %v1163_v42 = vmul.f32 %v1146_v62, %v5442_v16  ;;  %v1160_v41 = vsel %vm300_vm0, %v5882_v8, %v5860_v17 }
 0x31b   : > { %v1328_v9 = vpop.permute.xlu1 %1327  ;;  %4385 = vmatpush1.bf16.msra.mxu1 %v4384_v50  ;;  %v1164_v50 = vmul.f32 %v1159_v11, %v5450_v18  ;;  %v1360_v11 = vld [vmem:[#allocation6 + $0x80] sm:$0xff] }
 0x31c   : > { %v1330_v13 = vpop.permute.xlu0 %1329  ;;  %4387 = vmatprep.subr.bf16.mxu1 %v4386_v4 }
 0x31d   : > { %v1334_v56 = vsel %vm528_vm7, %v1328_v9, %v1330_v13  ;;  %v1350_v45 = vsel %vm528_vm7, %v1330_v13, %v1328_v9  ;;  %v4394_v9 = vpack.c.bf16 %v1165_v27, %v1163_v42  ;;  %v1190_v13 = vsel %vm353_vm1, %v5832_v2, %v5850_v44 }
 0x31e   : > { %v1357_v63 = vmul.f32 %v1334_v56, %v5623_v32  ;;  %v1358_v30 = vmul.f32 %v1350_v45, %v5626_v35  ;;  %v1203_v27 = vsel %vm353_vm1, %v5856_v49, %v5834_v22  ;;  %v1209_v45 = vmul.f32 %v1191_v43, %v5480_v48 }
 0x31f   : > { %v5941_v6 = vpop.permute.xlu1 %1566  ;;  %4389 = vmatpush1.bf16.msra.mxu1 %v4388_v29  ;;  %v4396_v29 = vpack.c.bf16 %v1164_v50, %v1162_v58  ;;  %v1202_v22 = vsel %vm353_vm1, %v5850_v44, %v5832_v2  ;;  %v1207_v42 = vmul.f32 %v1190_v13, %v5480_v48  ;;  %v1208_v50 = vmul.f32 %v1203_v27, %v5477_v47 }
 0x320   : > { %v4392_v31 = vpack.c.bf16 %v1357_v63, %v1355_v60  ;;  %v5945_v4 = vpop.permute.xlu0 %1612  ;;  %v4390_v5 = vpack.c.bf16 %v1358_v30, %v1356_v61  ;;  %v1166_v60 = vmul.f32 %v1160_v41, %v5450_v18  ;;  %v1167_v61 = vmul.f32 %v1148_v19, %v5442_v16 }
 0x321   : > { %v1206_v43 = vmul.f32 %v1202_v22, %v5477_v47  ;;  %v1235_v2 = vsel %vm406_vm2, %v5838_v25, %v5858_v54  ;;  %v4402_v44 = vpack.c.bf16 %v1209_v45, %v1207_v42  ;;  %v1204_v19 = vsel %vm353_vm1, %v5893_v40, %v5864_v21 }
 0x322   : > { %4391 = vmatprep.subr.bf16.mxu1 %v4390_v5  ;;  %v1234_v13 = vsel %vm406_vm2, %v5836_v1, %v5854_v7  ;;  %v1247_v27 = vsel %vm406_vm2, %v5858_v54, %v5838_v25  ;;  %v1253_v45 = vmul.f32 %v1235_v2, %v5503_v34  ;;  %v1246_v25 = vsel %vm406_vm2, %v5854_v7, %v5836_v1 }
 0x323   : > { %v5957_v62 = vpop.permute.xlu1 %1570  ;;  %4393 = vmatpush1.bf16.msra.mxu1 %v4392_v31  ;;  %v1236_v7 = vsel %vm406_vm2, %v5868_v24, %v5908_v12 }
 0x324   : > { %v1129_v56 = vpop.permute.xlu0 %1128  ;;  %4395 = vmatprep.subr.bf16.mxu1 %v4394_v9  ;;  %v1192_v9 = vsel %vm353_vm1, %v5864_v21, %v5893_v40 }
 0x325   : > { %v1149_v8 = vsel %vm300_vm0, %v5862_v0, %v1129_v56  ;;  %v1161_v17 = vsel %vm300_vm0, %v1129_v56, %v5862_v0  ;;  %v1361_v0 = vld [vmem:[#allocation6 + $0x88] sm:$0xff] }
 0x326   : > { %v1168_v63 = vmul.f32 %v1161_v17, %v5450_v18  ;;  %v1169_v30 = vmul.f32 %v1149_v8, %v5442_v16  ;;  %4243 = vmatmul.mubr.msk.f32.vlgmr.msra.gmra.mrb[8].mxu1 %vm570_vm4, %v1360_v11  ;;  %v1362_v11 = vld [vmem:[#allocation6 + $0x90] sm:$0xff]  ;;  %v1210_v8 = vmul.f32 %v1204_v19, %v5477_v47  ;;  %v1211_v17 = vmul.f32 %v1192_v9, %v5480_v48 }
 0x327   : > { %v5978_v49 = vpop.permute.xlu1 %1574  ;;  %4397 = vmatpush1.bf16.msra.mxu1 %v4396_v29  ;;  %1446 = vmatprep.mubr.f32.mxu1 %v7565_v20  ;;  %v4404_v29 = vpack.c.bf16 %v1208_v50, %v1206_v43  ;;  %v1248_v50 = vsel %vm406_vm2, %v5908_v12, %v5868_v24  ;;  %v1598_v19 = vsel %vm789_vm5, %v5884_v57, %v5941_v6 }
 0x328   : > { %v4400_v31 = vpack.c.bf16 %v1168_v63, %v1166_v60  ;;  %v5983_v5 = vpop.permute.xlu0 %1616  ;;  %v4398_v58 = vpack.c.bf16 %v1169_v30, %v1167_v61  ;;  %v1363_v63 = vld [vmem:[#allocation6 + $0x98] sm:$0xff]  ;;  %v1252_v30 = vmul.f32 %v1247_v27, %v5500_v33  ;;  %v1583_v12 = vsel %vm789_vm5, %v5957_v62, %v5897_v36 }
 0x32a   : > { %4399 = vmatprep.subr.bf16.mxu1 %v4398_v58  ;;  %4244 = vmatmul.mubr.msk.f32.gmra.mrb[10].mxu1 %vm570_vm4, %v1361_v0  ;;  %v1599_v58 = vsel %vm789_vm5, %v5897_v36, %v5957_v62  ;;  %v1603_v36 = vmul.f32 %v1598_v19, %v5543_v38  ;;  %v1604_v62 = vmul.f32 %v1583_v12, %v5540_v37 }
 0x32b   : > { %v5996_v41 = vpop.permute.xlu1 %1578  ;;  %4401 = vmatpush1.bf16.msra.mxu1 %v4400_v31  ;;  %1452 = vmatprep.mubr.f32.mxu1 %v7565_v20  ;;  %v1250_v31 = vmul.f32 %v1246_v25, %v5500_v33 }
 0x32c   : > { %v1177_v56 = vpop.permute.xlu0 %1176  ;;  %4403 = vmatprep.subr.bf16.mxu1 %v4402_v44  ;;  %v1254_v44 = vmul.f32 %v1248_v50, %v5500_v33 }
 0x32d   : > { %v1193_v21 = vsel %vm353_vm1, %v5866_v23, %v1177_v56  ;;  %v1205_v40 = vsel %vm353_vm1, %v1177_v56, %v5866_v23  ;;  %v1251_v23 = vmul.f32 %v1234_v13, %v5503_v34  ;;  %v4412_v2 = vpack.c.bf16 %v1252_v30, %v1250_v31 }
 0x32e   : > { %v1212_v60 = vmul.f32 %v1205_v40, %v5477_v47  ;;  %v1213_v61 = vmul.f32 %v1193_v21, %v5480_v48  ;;  %4245 = vmatmul.mubr.msk.f32.gmra.mrb[12].mxu1 %vm570_vm4, %v1362_v11  ;;  %v1255_v13 = vmul.f32 %v1236_v7, %v5503_v34 }
 0x32f   : > { %v1611_v54 = vpop.permute.xlu1 %1610  ;;  %4405 = vmatpush1.bf16.msra.mxu1 %v4404_v29  ;;  %1458 = vmatprep.mubr.f32.mxu1 %v7565_v20  ;;  %v4410_v1 = vpack.c.bf16 %v1253_v45, %v1251_v23  ;;  %v1605_v29 = vmul.f32 %v1599_v58, %v5543_v38  ;;  %v1582_v45 = vsel %vm789_vm5, %v5941_v6, %v5884_v57 }
 0x330   : > { %v4408_v22 = vpack.c.bf16 %v1212_v60, %v1210_v8  ;;  %v6021_v0 = vpop.permute.xlu0 %1620  ;;  %v4406_v42 = vpack.c.bf16 %v1213_v61, %v1211_v17  ;;  %v1584_v17 = vsel %vm789_vm5, %v5978_v49, %v5916_v10  ;;  %v1602_v60 = vmul.f32 %v1582_v45, %v5540_v37 }
 0x331   : > { %v4418_v61 = vpack.c.bf16 %v1605_v29, %v1603_v36  ;;  %v1600_v57 = vsel %vm789_vm5, %v5916_v10, %v5978_v49  ;;  %v1606_v30 = vmul.f32 %v1584_v17, %v5540_v37  ;;  %v1261_v29 = vld [vmem:[#allocation6 + $0x70] sm:$0xff] }
 0x332   : > { %4407 = vmatprep.subr.bf16.mxu1 %v4406_v42  ;;  %4246 = vmatmul.mubr.msk.f32.gmra.mrb[14].mxu1 %vm570_vm4, %v1363_v63  ;;  %v1259_v63 = vld [vmem:[#allocation6 + $0x60] sm:$0xff]  ;;  %v4420_v23 = vpack.c.bf16 %v1604_v62, %v1602_v60  ;;  %v1642_v42 = vsel %vm842_vm6, %v5945_v4, %v1611_v54  ;;  %v1607_v31 = vmul.f32 %v1600_v57, %v5543_v38 }
 0x333   : > { %v1615_v43 = vpop.permute.xlu1 %1614  ;;  %4409 = vmatpush1.bf16.msra.mxu1 %v4408_v22  ;;  %1541 = vmatprep.mubr.f32.mxu1 %v7565_v20 }
 0x334   : > { %v1221_v9 = vpop.permute.xlu0 %1220  ;;  %4411 = vmatprep.subr.bf16.mxu1 %v4410_v1  ;;  %v1643_v6 = vsel %vm842_vm6, %v5983_v5, %v1615_v43  ;;  %v1627_v50 = vsel %vm842_vm6, %v1615_v43, %v5983_v5  ;;  %v1260_v43 = vld [vmem:[#allocation6 + $0x68] sm:$0xff] }
 0x335   : > { %v1237_v24 = vsel %vm406_vm2, %v5870_v3, %v1221_v9  ;;  %v1249_v11 = vsel %vm406_vm2, %v1221_v9, %v5870_v3  ;;  %v1649_v1 = vmul.f32 %v1643_v6, %v5603_v52  ;;  %v1262_v6 = vld [vmem:[#allocation6 + $0x78] sm:$0xff] }
 0x336   : > { %v1256_v56 = vmul.f32 %v1249_v11, %v5500_v33  ;;  %v1257_v27 = vmul.f32 %v1237_v24, %v5503_v34 }
 0x337   : > { %v1619_v21 = vpop.permute.xlu1 %1618  ;;  %4413 = vmatpush1.bf16.msra.mxu1 %v4412_v2  ;;  %v1626_v2 = vsel %vm842_vm6, %v1611_v54, %v5945_v4 }
 0x338   : > { %v4416_v40 = vpack.c.bf16 %v1256_v56, %v1254_v44  ;;  %v6055_v3 = vpop.permute.xlu0 %1656  ;;  %v4414_v8 = vpack.c.bf16 %v1257_v27, %v1255_v13  ;;  %v1648_v44 = vmul.f32 %v1627_v50, %v5600_v51  ;;  %v1628_v24 = vsel %vm842_vm6, %v1619_v21, %v6021_v0 }
 0x339   : > { %v1646_v11 = vmul.f32 %v1626_v2, %v5600_v51  ;;  %v1644_v4 = vsel %vm842_vm6, %v6021_v0, %v1619_v21  ;;  %v1650_v27 = vmul.f32 %v1628_v24, %v5600_v51  ;;  %v1699_v24 = vld [vmem:[#allocation6 + $0xa0] sm:$0xff] }
 0x33a   : > { %4415 = vmatprep.subr.bf16.mxu1 %v4414_v8  ;;  %v1651_v62 = vmul.f32 %v1644_v4, %v5603_v52  ;;  %v1701_v4 = vld [vmem:[#allocation6 + $0xb0] sm:$0xff] }
 0x33b   : > { %v1623_v25 = vpop.permute.xlu1 %1622  ;;  %4417 = vmatpush1.bf16.msra.mxu1 %v4416_v40  ;;  %v4428_v56 = vpack.c.bf16 %v1648_v44, %v1646_v11  ;;  %v1700_v11 = vld [vmem:[#allocation6 + $0xa8] sm:$0xff] }
 0x33c   : > { %v1581_v22 = vpop.permute.xlu0 %1580  ;;  %4419 = vmatprep.subr.bf16.mxu1 %v4418_v61 }
 0x33d   : > { %v1585_v10 = vsel %vm789_vm5, %v5996_v41, %v1581_v22  ;;  %v1601_v49 = vsel %vm789_vm5, %v1581_v22, %v5996_v41  ;;  %v1647_v41 = vmul.f32 %v1642_v42, %v5603_v52  ;;  %v7566_v42 = vld [vmem:[#allocation17_spill] sm:$0xff] }
 0x33e   : > { %v1608_v7 = vmul.f32 %v1585_v10, %v5540_v37  ;;  %v1609_v58 = vmul.f32 %v1601_v49, %v5543_v38  ;;  %4247 = vmatmul.mubr.msk.f32.vlgmr.msra.gmra.mrb[8].mxu1 %vm570_vm4, %v1259_v63 }
 0x33f   : > { %v1655_v5 = vpop.permute.xlu1 %1654  ;;  %4421 = vmatpush1.bf16.msra.mxu1 %v4420_v23  ;;  %1547 = vmatprep.mubr.f32.mxu1 %v7565_v20  ;;  %v4426_v54 = vpack.c.bf16 %v1649_v1, %v1647_v41 }
 0x340   : > { %v4424_v9 = vpack.c.bf16 %v1608_v7, %v1606_v30  ;;  %v1661_v19 = vpop.permute.xlu0 %1660  ;;  %v4422_v12 = vpack.c.bf16 %v1609_v58, %v1607_v31  ;;  %v1686_v0 = vsel %vm895_vm8, %v6055_v3, %v1655_v5  ;;  %v1670_v63 = vsel %vm895_vm8, %v1655_v5, %v6055_v3 }
 0x341   : > { %v1690_v49 = vmul.f32 %v7566_v42, %v1670_v63 }
 0x342   : > { %4423 = vmatprep.subr.bf16.mxu1 %v4422_v12  ;;  %4248 = vmatmul.mubr.msk.f32.gmra.mrb[10].mxu1 %vm570_vm4, %v1260_v43 }
 0x343   : > { %v1659_v13 = vpop.permute.xlu1 %1658  ;;  %4425 = vmatpush1.bf16.msra.mxu1 %v4424_v9  ;;  %1553 = vmatprep.mubr.f32.mxu1 %v7565_v20 }
 0x344   : > { %v1687_v45 = vsel %vm895_vm8, %v1661_v19, %v1659_v13  ;;  %v1625_v36 = vpop.permute.xlu0 %1624  ;;  %4427 = vmatprep.subr.bf16.mxu1 %v4426_v54  ;;  %v1671_v8 = vsel %vm895_vm8, %v1659_v13, %v1661_v19 }
 0x345   : > { %v1629_v21 = vsel %vm842_vm6, %v1623_v25, %v1625_v36  ;;  %v1645_v40 = vsel %vm842_vm6, %v1625_v36, %v1623_v25  ;;  %v1693_v17 = vmul.f32 %v5638_v46, %v1687_v45  ;;  %v1691_v25 = vmul.f32 %v5638_v46, %v1686_v0 }
 0x346   : > { %v1652_v60 = vmul.f32 %v1629_v21, %v5600_v51  ;;  %v1653_v61 = vmul.f32 %v1645_v40, %v5603_v52  ;;  %4249 = vmatmul.mubr.msk.f32.gmra.mrb[12].mxu1 %vm570_vm4, %v1261_v29  ;;  %v1692_v50 = vmul.f32 %v7566_v42, %v1671_v8 }
 0x347   : > { %v1663_v57 = vpop.permute.xlu1 %1662  ;;  %4429 = vmatpush1.bf16.msra.mxu1 %v4428_v56  ;;  %1559 = vmatprep.mubr.f32.mxu1 %v7565_v20  ;;  %v4434_v10 = vpack.c.bf16 %v1693_v17, %v1691_v25 }
 0x348   : > { %v4432_v23 = vpack.c.bf16 %v1652_v60, %v1650_v27  ;;  %v1665_v30 = vpop.permute.xlu0 %1664  ;;  %v4430_v22 = vpack.c.bf16 %v1653_v61, %v1651_v62  ;;  %v4436_v58 = vpack.c.bf16 %v1692_v50, %v1690_v49 }
 0x349   : > { %v1672_v31 = vsel %vm895_vm8, %v1663_v57, %v1665_v30  ;;  %v1688_v1 = vsel %vm895_vm8, %v1665_v30, %v1663_v57 }
 0x34a   : > { %4431 = vmatprep.subr.bf16.mxu1 %v4430_v22  ;;  %4250 = vmatmul.mubr.msk.f32.gmra.mrb[14].mxu1 %vm570_vm4, %v1262_v6  ;;  %v1694_v43 = vmul.f32 %v7566_v42, %v1672_v31  ;;  %v1695_v41 = vmul.f32 %v5638_v46, %v1688_v1 }
 0x34b   : > { %v1667_v7 = vpop.permute.xlu1 %1666  ;;  %4433 = vmatpush1.bf16.msra.mxu1 %v4432_v23  ;;  %1779 = vmatprep.mubr.f32.mxu1 %v7565_v20 }
 0x34c   : > { %v1669_v3 = vpop.permute.xlu0 %1668  ;;  %4435 = vmatprep.subr.bf16.mxu1 %v4434_v10 }
 0x34d   : > { %v1673_v2 = vsel %vm895_vm8, %v1667_v7, %v1669_v3  ;;  %v1689_v5 = vsel %vm895_vm8, %v1669_v3, %v1667_v7 }
 0x34e   : > { %v1696_v44 = vmul.f32 %v7566_v42, %v1673_v2  ;;  %v1697_v9 = vmul.f32 %v5638_v46, %v1689_v5  ;;  %v1702_v46 = vld [vmem:[#allocation6 + $0xb8] sm:$0xff] }
 0x34f   : > { %4437 = vmatpush1.bf16.msra.mxu1 %v4436_v58 }
 0x350   : > { %v4440_v19 = vpack.c.bf16 %v1696_v44, %v1694_v43  ;;  %v4438_v12 = vpack.c.bf16 %v1697_v9, %v1695_v41  ;;  %v2548_v41 = vld [vmem:[#allocation8 + $0x40] sm:$0xff]  ;;  %v2549_v9 = vld [vmem:[#allocation8 + $0x48] sm:$0xff] }
 0x352   : > { %4439 = vmatprep.subr.bf16.mxu1 %v4438_v12  ;;  %v2550_v12 = vld [vmem:[#allocation8 + $0x50] sm:$0xff] }
 0x353   : > { %4441 = vmatpush1.bf16.msra.mxu1 %v4440_v19 }
 0x356   : > { %4251 = vmatmul.mubr.msk.f32.vlgmr.msra.gmra.mrb[8].mxu1 %vm570_vm4, %v1699_v24 }
 0x357   : > { %1785 = vmatprep.mubr.f32.mxu1 %v7565_v20 }
 0x35a   : > { %4252 = vmatmul.mubr.msk.f32.gmra.mrb[10].mxu1 %vm570_vm4, %v1700_v11  ;;  %v2551_v11 = vld [vmem:[#allocation8 + $0x58] sm:$0xff] }
 0x35b   : > { %1791 = vmatprep.mubr.f32.mxu1 %v7565_v20 }
 0x35c   : > { %v1820_v54 = vpop.permute.xlu1 %1819 }
 0x35d   : > { %v1825_v36 = vpop.permute.xlu0 %1824 }
 0x35e   : > { %4253 = vmatmul.mubr.msk.f32.gmra.mrb[12].mxu1 %vm570_vm4, %v1701_v4 }
 0x35f   : > { %1797 = vmatprep.mubr.f32.mxu1 %v7565_v20 }
 0x360   : > { %v1830_v25 = vpop.permute.xlu1 %1829 }
 0x361   : > { %v1835_v22 = vpop.permute.xlu0 %1834 }
 0x362   : > { %4254 = vmatmul.mubr.msk.f32.gmra.mrb[14].mxu1 %vm570_vm4, %v1702_v46 }
 0x363   : > { %2926 = vmatprep.mubr.f32.mxu1 %v7565_v20 }
 0x429   : > { %v1781_v13 = vpop.f32.mrb[8].mxu1 }
 0x42a   : > { %v1837_v29 = vadd.f32 %v1820_v54, %v1781_v13  ;;  %v1783_v56 = vpop.f32.mrb[9].mxu1 }
 0x42b   : > { %v1838_v27 = vadd.f32 %v1820_v54, %v1783_v56 }
 0x42c   : > { %v6128_v45 = vmax.f32 %v1837_v29, 0.0 }
 0x42d   : > { %v6130_v62 = vmax.f32 %v1838_v27, 0.0  ;;  %v1787_v0 = vpop.f32.mrb[10].mxu1 }
 0x42e   : > { %v1839_v21 = vadd.f32 %v1825_v36, %v1787_v0  ;;  %2010 = vrot.lane.b32.xlu1 %v6128_v45, %s5049_s10  ;;  %v1789_v40 = vpop.f32.mrb[11].mxu1 }
 0x42f   : > { %2052 = vrot.lane.b32.xlu0 %v6130_v62, %s5053_s14  ;;  %v1840_v6 = vadd.f32 %v1825_v36, %v1789_v40 }
 0x430   : > { %v6136_v8 = vmax.f32 %v1839_v21, 0.0 }
 0x431   : > { %v1793_v17 = vpop.f32.mrb[12].mxu1  ;;  %v6154_v63 = vmax.f32 %v1840_v6, 0.0 }
 0x432   : > { %2050 = vrot.lane.b32.xlu1 %v6128_v45, %s5053_s14  ;;  %v1795_v60 = vpop.f32.mrb[13].mxu1  ;;  %v1841_v23 = vadd.f32 %v1830_v25, %v1793_v17 }
 0x433   : > { %2012 = vrot.lane.b32.xlu0 %v6136_v8, %s5049_s10  ;;  %v1842_v30 = vadd.f32 %v1830_v25, %v1795_v60  ;;  %v2045_v39 = vmul.f32 %v6154_v63, %v5558_v53 }
 0x434   : > { %v6176_v42 = vmax.f32 %v1841_v23, 0.0 }
 0x435   : > { %v1799_v61 = vpop.f32.mrb[14].mxu1  ;;  %v6178_v50 = vmax.f32 %v1842_v30, 0.0 }
 0x436   : > { %1873 = vrot.lane.b32.xlu1 %v6128_v45, %s5046_s23  ;;  %v1801_v57 = vpop.f32.mrb[15].mxu1  ;;  %v1843_v10 = vadd.f32 %v1835_v22, %v1799_v61 }
 0x437   : > { %1875 = vrot.lane.b32.xlu0 %v6136_v8, %s5046_s23  ;;  %v1844_v31 = vadd.f32 %v1835_v22, %v1801_v57 }
 0x438   : > { %v6184_v49 = vmax.f32 %v1843_v10, 0.0 }
 0x439   : > { %v6202_v1 = vmax.f32 %v1844_v31, 0.0 }
 0x43a   : > { %1917 = vrot.lane.b32.xlu1 %v6128_v45, %s5047_s21 }
 0x43b   : > { %1919 = vrot.lane.b32.xlu0 %v6136_v8, %s5047_s21 }
 0x43e   : > { %1961 = vrot.lane.b32.xlu1 %v6128_v45, %s5048_s28 }
 0x43f   : > { %1963 = vrot.lane.b32.xlu0 %v6136_v8, %s5048_s28 }
 0x442   : > { %1998 = vrot.lane.b32.xlu1 %v6130_v62, %s5049_s10 }
 0x443   : > { %2000 = vrot.lane.b32.xlu0 %v6154_v63, %s5049_s10 }
 0x446   : > { %1857 = vrot.lane.b32.xlu1 %v6130_v62, %s5046_s23 }
 0x447   : > { %2056 = vrot.lane.b32.xlu0 %v6154_v63, %s5053_s14 }
 0x44a   : > { %1905 = vrot.lane.b32.xlu1 %v6130_v62, %s5047_s21 }
 0x44b   : > { %1859 = vrot.lane.b32.xlu0 %v6154_v63, %s5046_s23 }
 0x44e   : > { %1949 = vrot.lane.b32.xlu1 %v6130_v62, %s5048_s28 }
 0x44f   : > { %1907 = vrot.lane.b32.xlu0 %v6154_v63, %s5047_s21 }
 0x452   : > { %2054 = vrot.lane.b32.xlu1 %v6136_v8, %s5053_s14 }
 0x453   : > { %1951 = vrot.lane.b32.xlu0 %v6154_v63, %s5048_s28 }
 0x456   : > { %2014 = vrot.lane.b32.xlu1 %v6176_v42, %s5049_s10 }
 0x457   : > { %2060 = vrot.lane.b32.xlu0 %v6178_v50, %s5053_s14 }
 0x45a   : > { %2058 = vrot.lane.b32.xlu1 %v6176_v42, %s5053_s14 }
 0x45b   : > { %2016 = vrot.lane.b32.xlu0 %v6184_v49, %s5049_s10 }
 0x45e   : > { %1877 = vrot.lane.b32.xlu1 %v6176_v42, %s5046_s23 }
 0x45f   : > { %1879 = vrot.lane.b32.xlu0 %v6184_v49, %s5046_s23 }
 0x462   : > { %1921 = vrot.lane.b32.xlu1 %v6176_v42, %s5047_s21 }
 0x463   : > { %1923 = vrot.lane.b32.xlu0 %v6184_v49, %s5047_s21 }
 0x466   : > { %1965 = vrot.lane.b32.xlu1 %v6176_v42, %s5048_s28 }
 0x467   : > { %1967 = vrot.lane.b32.xlu0 %v6184_v49, %s5048_s28 }
 0x46a   : > { %2002 = vrot.lane.b32.xlu1 %v6178_v50, %s5049_s10 }
 0x46b   : > { %2004 = vrot.lane.b32.xlu0 %v6202_v1, %s5049_s10 }
 0x46e   : > { %1861 = vrot.lane.b32.xlu1 %v6178_v50, %s5046_s23 }
 0x46f   : > { %2303 = vrot.lane.b32.xlu0 %v6130_v62, %s5051_s6 }
 0x472   : > { %1909 = vrot.lane.b32.xlu1 %v6178_v50, %s5047_s21 }
 0x473   : > { %2307 = vrot.lane.b32.xlu0 %v6154_v63, %s5051_s6 }
 0x476   : > { %1953 = vrot.lane.b32.xlu1 %v6178_v50, %s5048_s28 }
 0x477   : > { %2311 = vrot.lane.b32.xlu0 %v6178_v50, %s5051_s6 }
 0x47a   : > { %2062 = vrot.lane.b32.xlu1 %v6184_v49, %s5053_s14 }
 0x47b   : > { %2064 = vrot.lane.b32.xlu0 %v6202_v1, %s5053_s14 }
 0x47e   : > { %2301 = vrot.lane.b32.xlu1 %v6128_v45, %s5051_s6 }
 0x47f   : > { %2347 = vrot.lane.b32.xlu0 %v6130_v62, %s5052_s8 }
 0x482   : > { %2305 = vrot.lane.b32.xlu1 %v6136_v8, %s5051_s6 }
 0x483   : > { %1863 = vrot.lane.b32.xlu0 %v6202_v1, %s5046_s23 }
 0x486   : > { %2309 = vrot.lane.b32.xlu1 %v6176_v42, %s5051_s6 }
 0x487   : > { %2351 = vrot.lane.b32.xlu0 %v6154_v63, %s5052_s8 }
 0x48a   : > { %2313 = vrot.lane.b32.xlu1 %v6184_v49, %s5051_s6 }
 0x48b   : > { %1911 = vrot.lane.b32.xlu0 %v6202_v1, %s5047_s21 }
 0x48e   : > { %2345 = vrot.lane.b32.xlu1 %v6128_v45, %s5052_s8 }
 0x48f   : > { %2355 = vrot.lane.b32.xlu0 %v6178_v50, %s5052_s8 }
 0x492   : > { %2349 = vrot.lane.b32.xlu1 %v6136_v8, %s5052_s8 }
 0x493   : > { %1955 = vrot.lane.b32.xlu0 %v6202_v1, %s5048_s28 }
 0x496   : > { %2353 = vrot.lane.b32.xlu1 %v6176_v42, %s5052_s8 }
 0x497   : > { %2391 = vrot.lane.b32.xlu0 %v6130_v62, %s5054_s30 }
 0x49a   : > { %2357 = vrot.lane.b32.xlu1 %v6184_v49, %s5052_s8 }
 0x49b   : > { %2315 = vrot.lane.b32.xlu0 %v6202_v1, %s5051_s6 }
 0x49e   : > { %2389 = vrot.lane.b32.xlu1 %v6128_v45, %s5054_s30 }
 0x49f   : > { %2395 = vrot.lane.b32.xlu0 %v6154_v63, %s5054_s30 }
 0x4a0   : > { %v2011_v7 = vpop.permute.xlu1 %2010 }
 0x4a1   : > { %v6260_v3 = vpop.permute.xlu0 %2052 }
 0x4a2   : > { %2393 = vrot.lane.b32.xlu1 %v6136_v8, %s5054_s30 }
 0x4a3   : > { %2359 = vrot.lane.b32.xlu0 %v6202_v1, %s5052_s8 }
 0x4a4   : > { %v6266_v58 = vpop.permute.xlu1 %2050 }
 0x4a5   : > { %v2013_v2 = vpop.permute.xlu0 %2012 }
 0x4a6   : > { %2397 = vrot.lane.b32.xlu1 %v6176_v42, %s5054_s30 }
 0x4a7   : > { %2399 = vrot.lane.b32.xlu0 %v6178_v50, %s5054_s30 }
 0x4a8   : > { %v6272_v5 = vpop.permute.xlu1 %1873 }
 0x4a9   : > { %v6274_v43 = vpop.permute.xlu0 %1875 }
 0x4aa   : > { %2401 = vrot.lane.b32.xlu1 %v6184_v49, %s5054_s30 }
 0x4ab   : > { %2403 = vrot.lane.b32.xlu0 %v6202_v1, %s5054_s30 }
 0x4ac   : > { %v6280_v44 = vpop.permute.xlu1 %1917 }
 0x4ad   : > { %v6282_v19 = vpop.permute.xlu0 %1919 }
 0x4ae   : > { %2554 = vperm.xlu1 %4843, %v2548_v41  }
 0x4af   : > { %2559 = vperm.xlu0 %4842, %v2549_v9  }
 0x4b0   : > { %v6284_v24 = vpop.permute.xlu1 %1961 }
 0x4b1   : > { %v6286_v4 = vpop.permute.xlu0 %1963 }
 0x4b2   : > { %2564 = vperm.xlu1 %4843, %v2550_v12  }
 0x4b3   : > { %2569 = vperm.xlu0 %4842, %v2551_v11  }
 0x4b4   : > { %v1999_v46 = vpop.permute.xlu1 %1998 }
 0x4b5   : > { %v2018_v54 = vsel %vm463_vm3, %v2011_v7, %v1999_v46  ;;  %v2030_v13 = vsel %vm463_vm3, %v1999_v46, %v2011_v7  ;;  %v2001_v29 = vpop.permute.xlu0 %2000 }
 0x4b6   : > { %v2034_v56 = vmul.f32 %v2030_v13, %v5526_v15  ;;  %v2035_v27 = vmul.f32 %v2018_v54, %v5523_v14  ;;  %v2019_v36 = vsel %vm463_vm3, %v2013_v2, %v2001_v29  ;;  %v2031_v0 = vsel %vm463_vm3, %v2001_v29, %v2013_v2 }
 0x4b7   : > { %v2036_v21 = vmul.f32 %v2031_v0, %v5526_v15  ;;  %v2037_v40 = vmul.f32 %v2019_v36, %v5523_v14 }
 0x4b8   : > { %v6296_v17 = vpop.permute.xlu1 %1857 }
 0x4b9   : > { %v4444_v60 = vpack.c.bf16 %v2036_v21, %v2034_v56  ;;  %v2057_v61 = vpop.permute.xlu0 %2056  ;;  %v4442_v57 = vpack.c.bf16 %v2037_v40, %v2035_v27 }
 0x4bb   : > { %4443 = vmatprep.subr.bf16.mxu0 %v4442_v57 }
 0x4bc   : > { %v6298_v6 = vpop.permute.xlu1 %1905  ;;  %4445 = vmatpush1.bf16.msra.mxu0 %v4444_v60 }
 0x4bd   : > { %v6300_v25 = vpop.permute.xlu0 %1859 }
 0x4c0   : > { %v6302_v23 = vpop.permute.xlu1 %1949 }
 0x4c1   : > { %v6304_v30 = vpop.permute.xlu0 %1907 }
 0x4c4   : > { %v2055_v22 = vpop.permute.xlu1 %2054 }
 0x4c5   : > { %v6306_v10 = vpop.permute.xlu0 %1951 }
 0x4c8   : > { %v2015_v31 = vpop.permute.xlu1 %2014 }
 0x4c9   : > { %v2061_v7 = vpop.permute.xlu0 %2060 }
 0x4cc   : > { %v2059_v2 = vpop.permute.xlu1 %2058 }
 0x4cd   : > { %v2017_v41 = vpop.permute.xlu0 %2016 }
 0x4d0   : > { %v6308_v9 = vpop.permute.xlu1 %1877 }
 0x4d1   : > { %v6310_v12 = vpop.permute.xlu0 %1879 }
 0x4d4   : > { %v6312_v11 = vpop.permute.xlu1 %1921 }
 0x4d5   : > { %v6314_v46 = vpop.permute.xlu0 %1923 }
 0x4d8   : > { %v6316_v54 = vpop.permute.xlu1 %1965 }
 0x4d9   : > { %v6318_v13 = vpop.permute.xlu0 %1967 }
 0x4dc   : > { %v2003_v29 = vpop.permute.xlu1 %2002 }
 0x4dd   : > { %v2020_v56 = vsel %vm463_vm3, %v2015_v31, %v2003_v29  ;;  %v2032_v27 = vsel %vm463_vm3, %v2003_v29, %v2015_v31  ;;  %v2005_v36 = vpop.permute.xlu0 %2004 }
 0x4de   : > { %v2038_v0 = vmul.f32 %v2032_v27, %v5526_v15  ;;  %v2039_v21 = vmul.f32 %v2020_v56, %v5523_v14  ;;  %v2021_v40 = vsel %vm463_vm3, %v2017_v41, %v2005_v36  ;;  %v2033_v60 = vsel %vm463_vm3, %v2005_v36, %v2017_v41 }
 0x4df   : > { %v2040_v57 = vmul.f32 %v2033_v60, %v5526_v15  ;;  %v2041_v55 = vmul.f32 %v2021_v40, %v5523_v14  ;;  %v2043_v56 = vmul.f32 %v6130_v62, %v5558_v53  ;;  %v2044_v27 = vmul.f32 %v6136_v8, %v5562_v59 }
 0x4e0   : > { %v6330_v28 = vpop.permute.xlu1 %1861  ;;  %v2049_v36 = vmul.f32 %v6202_v1, %v5558_v53  ;;  %v2083_v40 = vsel %vm528_vm7, %v2057_v61, %v2055_v22  ;;  %v2047_v62 = vmul.f32 %v6178_v50, %v5558_v53  ;;  %v2048_v1 = vmul.f32 %v6184_v49, %v5562_v59 }
 0x4e1   : > { %v4448_v26 = vpack.c.bf16 %v2040_v57, %v2038_v0  ;;  %v6332_v31 = vpop.permute.xlu0 %2303  ;;  %v4446_v29 = vpack.c.bf16 %v2041_v55, %v2039_v21  ;;  %v4450_v41 = vpack.c.bf16 %v2045_v39, %v2043_v56  ;;  %v2042_v0 = vmul.f32 %v6128_v45, %v5562_v59 }
 0x4e2   : > { %v2082_v39 = vsel %vm528_vm7, %v6260_v3, %v6266_v58  ;;  %v2067_v21 = vsel %vm528_vm7, %v2055_v22, %v2057_v61  ;;  %v4454_v60 = vpack.c.bf16 %v2049_v36, %v2047_v62  ;;  %v2046_v57 = vmul.f32 %v6176_v42, %v5562_v59 }
 0x4e3   : > { %4447 = vmatprep.subr.bf16.mxu0 %v4446_v29  ;;  %v4452_v8 = vpack.c.bf16 %v2044_v27, %v2042_v0  ;;  %v2066_v50 = vsel %vm528_vm7, %v6266_v58, %v6260_v3  ;;  %v2087_v29 = vmul.f32 %v2082_v39, %v5626_v35  ;;  %v2088_v49 = vmul.f32 %v2067_v21, %v5623_v32 }
 0x4e4   : > { %v6341_v63 = vpop.permute.xlu1 %1909  ;;  %4449 = vmatpush1.bf16.msra.mxu0 %v4448_v26  ;;  %v2089_v26 = vmul.f32 %v2083_v40, %v5626_v35  ;;  %v4456_v61 = vpack.c.bf16 %v2048_v1, %v2046_v57  ;;  %v1882_v22 = vsel %vm300_vm0, %v6274_v43, %v6300_v25  ;;  %v2068_v42 = vsel %vm528_vm7, %v2059_v2, %v2061_v7 }
 0x4e5   : > { %4451 = vmatprep.subr.bf16.mxu0 %v4450_v41  ;;  %v6345_v55 = vpop.permute.xlu0 %2307  ;;  %v2086_v41 = vmul.f32 %v2066_v50, %v5623_v32  ;;  %v2084_v36 = vsel %vm528_vm7, %v2061_v7, %v2059_v2  ;;  %v1881_v58 = vsel %vm300_vm0, %v6272_v5, %v6296_v17  ;;  %v1894_v40 = vsel %vm300_vm0, %v6300_v25, %v6274_v43 }
 0x4e6   : > { %v4458_v27 = vpack.c.bf16 %v2089_v26, %v2087_v29  ;;  %v1900_v62 = vmul.f32 %v1882_v22, %v5442_v16  ;;  %v2090_v7 = vmul.f32 %v2068_v42, %v5623_v32  ;;  %v2091_v2 = vmul.f32 %v2084_v36, %v5626_v35  ;;  %v2095_v42 = vld [vmem:[#allocation6 + $0xe0] sm:$0xff] }
 0x4e7   : > { %v4460_v39 = vpack.c.bf16 %v2088_v49, %v2086_v41  ;;  %v1893_v43 = vsel %vm300_vm0, %v6296_v17, %v6272_v5  ;;  %v1899_v57 = vmul.f32 %v1894_v40, %v5450_v18  ;;  %v1926_v22 = vsel %vm353_vm1, %v6282_v19, %v6304_v30 }
 0x4e8   : > { %v6356_v45 = vpop.permute.xlu1 %1953  ;;  %4453 = vmatpush1.bf16.msra.mxu0 %v4452_v8  ;;  %v1883_v5 = vsel %vm300_vm0, %v6308_v9, %v6330_v28  ;;  %v1895_v17 = vsel %vm300_vm0, %v6330_v28, %v6308_v9  ;;  %v1925_v36 = vsel %vm353_vm1, %v6280_v44, %v6298_v6  ;;  %v1938_v40 = vsel %vm353_vm1, %v6304_v30, %v6282_v19 }
 0x4e9   : > { %v6364_v56 = vpop.permute.xlu0 %2311  ;;  %4455 = vmatprep.subr.bf16.mxu0 %v4454_v60  ;;  %v1898_v60 = vmul.f32 %v1881_v58, %v5442_v16  ;;  %v1937_v19 = vsel %vm353_vm1, %v6298_v6, %v6280_v44  ;;  %v1970_v44 = vsel %vm406_vm2, %v6286_v4, %v6306_v10 }
 0x4ec   : > { %v2063_v3 = vpop.permute.xlu1 %2062  ;;  %4457 = vmatpush1.bf16.msra.mxu0 %v4456_v61  ;;  %v1897_v61 = vmul.f32 %v1893_v43, %v5450_v18 }
 0x4ed   : > { %v2065_v0 = vpop.permute.xlu0 %2064  ;;  %4459 = vmatprep.subr.bf16.mxu0 %v4458_v27  ;;  %v4466_v27 = vpack.c.bf16 %v1900_v62, %v1898_v60  ;;  %v1901_v62 = vmul.f32 %v1895_v17, %v5450_v18  ;;  %v1941_v60 = vmul.f32 %v1937_v19, %v5477_v47  ;;  %v1982_v17 = vsel %vm406_vm2, %v6306_v10, %v6286_v4 }
 0x4ee   : > { %v2069_v8 = vsel %vm528_vm7, %v2063_v3, %v2065_v0  ;;  %v2085_v1 = vsel %vm528_vm7, %v2065_v0, %v2063_v3  ;;  %v4468_v3 = vpack.c.bf16 %v1899_v57, %v1897_v61  ;;  %v1944_v0 = vmul.f32 %v1926_v22, %v5480_v48  ;;  %v2097_v61 = vld [vmem:[#allocation6 + $0xf0] sm:$0xff] }
 0x4ef   : > { %v2092_v21 = vmul.f32 %v2069_v8, %v5623_v32  ;;  %v2093_v26 = vmul.f32 %v2085_v1, %v5626_v35  ;;  %v1927_v57 = vsel %vm353_vm1, %v6312_v11, %v6341_v63  ;;  %v1969_v22 = vsel %vm406_vm2, %v6284_v24, %v6302_v23 }
 0x4f0   : > { %v6389_v25 = vpop.permute.xlu1 %2301  ;;  %4461 = vmatpush1.bf16.msra.mxu0 %v4460_v39  ;;  %v1902_v39 = vmul.f32 %v1883_v5, %v5442_v16  ;;  %v1981_v4 = vsel %vm406_vm2, %v6302_v23, %v6284_v24  ;;  %v1971_v23 = vsel %vm406_vm2, %v6316_v54, %v6356_v45 }
 0x4f1   : > { %v4464_v50 = vpack.c.bf16 %v2092_v21, %v2090_v7  ;;  %v6393_v29 = vpop.permute.xlu0 %2347  ;;  %v4462_v49 = vpack.c.bf16 %v2093_v26, %v2091_v2  ;;  %v1942_v7 = vmul.f32 %v1925_v36, %v5480_v48  ;;  %v1943_v2 = vmul.f32 %v1938_v40, %v5477_v47 }
 0x4f3   : > { %4463 = vmatprep.subr.bf16.mxu0 %v4462_v49  ;;  %v4474_v6 = vpack.c.bf16 %v1944_v0, %v1942_v7  ;;  %v2098_v0 = vld [vmem:[#allocation6 + $0xf8] sm:$0xff] }
 0x4f4   : > { %v6405_v41 = vpop.permute.xlu1 %2305  ;;  %4465 = vmatpush1.bf16.msra.mxu0 %v4464_v50  ;;  %v1939_v50 = vsel %vm353_vm1, %v6341_v63, %v6312_v11 }
 0x4f5   : > { %v1864_v58 = vpop.permute.xlu0 %1863  ;;  %4467 = vmatprep.subr.bf16.mxu0 %v4466_v27  ;;  %v4476_v27 = vpack.c.bf16 %v1943_v2, %v1941_v60  ;;  %v1945_v36 = vmul.f32 %v1939_v50, %v5477_v47  ;;  %v2334_v19 = vsel %vm789_vm5, %v6345_v55, %v6405_v41 }
 0x4f6   : > { %v1884_v28 = vsel %vm300_vm0, %v6310_v12, %v1864_v58  ;;  %v1896_v9 = vsel %vm300_vm0, %v1864_v58, %v6310_v12  ;;  %v2096_v12 = vld [vmem:[#allocation6 + $0xe8] sm:$0xff] }
 0x4f7   : > { %v1903_v8 = vmul.f32 %v1896_v9, %v5450_v18  ;;  %v1904_v1 = vmul.f32 %v1884_v28, %v5442_v16  ;;  %4255 = vmatmul.mubr.msk.f32.vlgmr.msra.gmra.mrb[8].mxu0 %vm570_vm4, %v2095_v42  ;;  %v1988_v42 = vmul.f32 %v1970_v44, %v5503_v34  ;;  %v1987_v28 = vmul.f32 %v1982_v17, %v5500_v33 }
 0x4f8   : > { %v6426_v30 = vpop.permute.xlu1 %2309  ;;  %4469 = vmatpush1.bf16.msra.mxu0 %v4468_v3  ;;  %2181 = vmatprep.mubr.f32.mxu0 %v7565_v20  ;;  %v1946_v3 = vmul.f32 %v1927_v57, %v5480_v48  ;;  %v1990_v44 = vmul.f32 %v1971_v23, %v5503_v34 }
 0x4f9   : > { %v4472_v21 = vpack.c.bf16 %v1903_v8, %v1901_v62  ;;  %v6431_v26 = vpop.permute.xlu0 %2351  ;;  %v4470_v43 = vpack.c.bf16 %v1904_v1, %v1902_v39  ;;  %v1983_v8 = vsel %vm406_vm2, %v6356_v45, %v6316_v54  ;;  %v1985_v1 = vmul.f32 %v1981_v4, %v5500_v33 }
 0x4fa   : > { %v1989_v2 = vmul.f32 %v1983_v8, %v5500_v33  ;;  %v2318_v54 = vsel %vm789_vm5, %v6405_v41, %v6345_v55  ;;  %v2319_v17 = vsel %vm789_vm5, %v6426_v30, %v6364_v56 }
 0x4fb   : > { %4471 = vmatprep.subr.bf16.mxu0 %v4470_v43  ;;  %4256 = vmatmul.mubr.msk.f32.gmra.mrb[10].mxu0 %vm570_vm4, %v2096_v12  ;;  %v4484_v7 = vpack.c.bf16 %v1987_v28, %v1985_v1  ;;  %v2333_v43 = vsel %vm789_vm5, %v6332_v31, %v6389_v25  ;;  %v2339_v41 = vmul.f32 %v2318_v54, %v5540_v37  ;;  %v1995_v1 = vld [vmem:[#allocation6 + $0xc8] sm:$0xff] }
 0x4fc   : > { %v6444_v49 = vpop.permute.xlu1 %2313  ;;  %4473 = vmatpush1.bf16.msra.mxu0 %v4472_v21  ;;  %2187 = vmatprep.mubr.f32.mxu0 %v7565_v20  ;;  %v2338_v55 = vmul.f32 %v2333_v43, %v5543_v38  ;;  %v1996_v43 = vld [vmem:[#allocation6 + $0xd0] sm:$0xff] }
 0x4fd   : > { %v1912_v5 = vpop.permute.xlu0 %1911  ;;  %4475 = vmatprep.subr.bf16.mxu0 %v4474_v6  ;;  %v2340_v6 = vmul.f32 %v2334_v19, %v5543_v38 }
 0x4fe   : > { %v1928_v11 = vsel %vm353_vm1, %v6314_v46, %v1912_v5  ;;  %v1940_v63 = vsel %vm353_vm1, %v1912_v5, %v6314_v46  ;;  %v1986_v46 = vmul.f32 %v1969_v22, %v5503_v34 }
 0x4ff   : > { %v1947_v58 = vmul.f32 %v1940_v63, %v5477_v47  ;;  %v1948_v40 = vmul.f32 %v1928_v11, %v5480_v48  ;;  %4257 = vmatmul.mubr.msk.f32.gmra.mrb[12].mxu0 %vm570_vm4, %v2097_v61  ;;  %v2317_v61 = vsel %vm789_vm5, %v6389_v25, %v6332_v31  ;;  %v4490_v11 = vpack.c.bf16 %v2340_v6, %v2338_v55 }
 0x500   : > { %v2346_v10 = vpop.permute.xlu1 %2345  ;;  %4477 = vmatpush1.bf16.msra.mxu0 %v4476_v27  ;;  %2193 = vmatprep.mubr.f32.mxu0 %v7565_v20  ;;  %v4482_v24 = vpack.c.bf16 %v1988_v42, %v1986_v46  ;;  %v2337_v42 = vmul.f32 %v2317_v61, %v5540_v37  ;;  %v2335_v31 = vsel %vm789_vm5, %v6364_v56, %v6426_v30 }
 0x501   : > { %v4480_v9 = vpack.c.bf16 %v1947_v58, %v1945_v36  ;;  %v6469_v62 = vpop.permute.xlu0 %2355  ;;  %v4478_v39 = vpack.c.bf16 %v1948_v40, %v1946_v3  ;;  %v1994_v36 = vld [vmem:[#allocation6 + $0xc0] sm:$0xff]  ;;  %v2341_v58 = vmul.f32 %v2319_v17, %v5540_v37  ;;  %v2377_v4 = vsel %vm842_vm6, %v6393_v29, %v2346_v10  ;;  %v1997_v17 = vld [vmem:[#allocation6 + $0xd8] sm:$0xff] }
 0x502   : > { %v4492_v3 = vpack.c.bf16 %v2339_v41, %v2337_v42  ;;  %v2342_v46 = vmul.f32 %v2335_v31, %v5543_v38  ;;  %v2361_v8 = vsel %vm842_vm6, %v2346_v10, %v6393_v29 }
 0x503   : > { %4479 = vmatprep.subr.bf16.mxu0 %v4478_v39  ;;  %4258 = vmatmul.mubr.msk.f32.gmra.mrb[14].mxu0 %vm570_vm4, %v2098_v0 }
 0x504   : > { %v2350_v12 = vpop.permute.xlu1 %2349  ;;  %4481 = vmatpush1.bf16.msra.mxu0 %v4480_v9  ;;  %2276 = vmatprep.mubr.f32.mxu0 %v7565_v20 }
 0x505   : > { %v1956_v21 = vpop.permute.xlu0 %1955  ;;  %4483 = vmatprep.subr.bf16.mxu0 %v4482_v24  ;;  %v2378_v25 = vsel %vm842_vm6, %v6431_v26, %v2350_v12  ;;  %v2362_v0 = vsel %vm842_vm6, %v2350_v12, %v6431_v26 }
 0x506   : > { %v1972_v45 = vsel %vm406_vm2, %v6318_v13, %v1956_v21  ;;  %v1984_v60 = vsel %vm406_vm2, %v1956_v21, %v6318_v13  ;;  %v2384_v28 = vmul.f32 %v2378_v25, %v5603_v52  ;;  %v2383_v24 = vmul.f32 %v2362_v0, %v5600_v51 }
 0x507   : > { %v1991_v57 = vmul.f32 %v1984_v60, %v5500_v33  ;;  %v1992_v50 = vmul.f32 %v1972_v45, %v5503_v34 }
 0x508   : > { %v2354_v22 = vpop.permute.xlu1 %2353  ;;  %4485 = vmatpush1.bf16.msra.mxu0 %v4484_v7 }
 0x509   : > { %v4488_v27 = vpack.c.bf16 %v1991_v57, %v1989_v2  ;;  %v6503_v13 = vpop.permute.xlu0 %2391  ;;  %v4486_v5 = vpack.c.bf16 %v1992_v50, %v1990_v44  ;;  %v2363_v7 = vsel %vm842_vm6, %v2354_v22, %v6469_v62  ;;  %v2381_v2 = vmul.f32 %v2361_v8, %v5600_v51 }
 0x50a   : > { %v2379_v29 = vsel %vm842_vm6, %v6469_v62, %v2354_v22  ;;  %v2385_v45 = vmul.f32 %v2363_v7, %v5600_v51  ;;  %v6548_v22 = vld [vmem:[#allocation9 + $0x18] ss:$0 sm:$0xff] }
 0x50b   : > { %4487 = vmatprep.subr.bf16.mxu0 %v4486_v5  ;;  %v4500_v54 = vpack.c.bf16 %v2383_v24, %v2381_v2  ;;  %v2386_v6 = vmul.f32 %v2379_v29, %v5603_v52  ;;  %7567 = vst [vmem:[#allocation17_spill] sm:$0xff] %v6548_v22  ;;  %v2434_v24 = vld [vmem:[#allocation6 + $0x100] sm:$0xff] }
 0x50c   : > { %v2358_v63 = vpop.permute.xlu1 %2357  ;;  %4489 = vmatpush1.bf16.msra.mxu0 %v4488_v27 }
 0x50d   : > { %v2316_v40 = vpop.permute.xlu0 %2315  ;;  %4491 = vmatprep.subr.bf16.mxu0 %v4490_v11 }
 0x50e   : > { %v2320_v56 = vsel %vm789_vm5, %v6444_v49, %v2316_v40  ;;  %v2336_v30 = vsel %vm789_vm5, %v2316_v40, %v6444_v49  ;;  %v2382_v49 = vmul.f32 %v2377_v4, %v5603_v52 }
 0x50f   : > { %v2343_v9 = vmul.f32 %v2320_v56, %v5540_v37  ;;  %v2344_v39 = vmul.f32 %v2336_v30, %v5543_v38  ;;  %4259 = vmatmul.mubr.msk.f32.vlgmr.msra.gmra.mrb[8].mxu0 %vm570_vm4, %v1994_v36  ;;  %v6558_v36 = vld [vmem:[#allocation9 + $0x10] ss:$0 sm:$0xff] }
 0x510   : > { %v2390_v26 = vpop.permute.xlu1 %2389  ;;  %4493 = vmatpush1.bf16.msra.mxu0 %v4492_v3  ;;  %2282 = vmatprep.mubr.f32.mxu0 %v7565_v20  ;;  %v4498_v10 = vpack.c.bf16 %v2384_v28, %v2382_v49  ;;  %7568 = vst [vmem:[#allocation26_spill] sm:$0xff] %v6558_v36 }
 0x511   : > { %v4496_v23 = vpack.c.bf16 %v2343_v9, %v2341_v58  ;;  %v2396_v19 = vpop.permute.xlu0 %2395  ;;  %v4494_v12 = vpack.c.bf16 %v2344_v39, %v2342_v46  ;;  %v2421_v62 = vsel %vm895_vm8, %v6503_v13, %v2390_v26  ;;  %v2405_v42 = vsel %vm895_vm8, %v2390_v26, %v6503_v13 }
 0x512   : > { %v2426_v11 = vmul.f32 %v6548_v22, %v2421_v62  ;;  %v2425_v40 = vmul.f32 %v6558_v36, %v2405_v42  ;;  %v7575_v42 = vld [vmem:[#allocation21_spill] sm:$0xff] }
 0x513   : > { %4495 = vmatprep.subr.bf16.mxu0 %v4494_v12  ;;  %4260 = vmatmul.mubr.msk.f32.gmra.mrb[10].mxu0 %vm570_vm4, %v1995_v1  ;;  %v2437_v12 = vld [vmem:[#allocation6 + $0x118] sm:$0xff] }
 0x514   : > { %v2394_v21 = vpop.permute.xlu1 %2393  ;;  %4497 = vmatpush1.bf16.msra.mxu0 %v4496_v23  ;;  %2288 = vmatprep.mubr.f32.mxu0 %v7565_v20  ;;  %v2435_v23 = vld [vmem:[#allocation6 + $0x108] sm:$0xff] }
 0x515   : > { %v2422_v60 = vsel %vm895_vm8, %v2396_v19, %v2394_v21  ;;  %v2360_v44 = vpop.permute.xlu0 %2359  ;;  %4499 = vmatprep.subr.bf16.mxu0 %v4498_v10  ;;  %v2406_v61 = vsel %vm895_vm8, %v2394_v21, %v2396_v19  ;;  %v2436_v19 = vld [vmem:[#allocation6 + $0x110] sm:$0xff] }
 0x516   : > { %v2364_v57 = vsel %vm842_vm6, %v2358_v63, %v2360_v44  ;;  %v2380_v50 = vsel %vm842_vm6, %v2360_v44, %v2358_v63  ;;  %v2428_v55 = vmul.f32 %v6548_v22, %v2422_v60  ;;  %v2427_v3 = vmul.f32 %v6558_v36, %v2406_v61  ;;  %v7571_v60 = vld [vmem:[#allocation19_spill] sm:$0xff] }
 0x517   : > { %v2387_v41 = vmul.f32 %v2364_v57, %v5600_v51  ;;  %v2388_v27 = vmul.f32 %v2380_v50, %v5603_v52  ;;  %4261 = vmatmul.mubr.msk.f32.gmra.mrb[12].mxu0 %vm570_vm4, %v1996_v43  ;;  %v7569_v43 = vld [vmem:[#allocation18_spill] sm:$0xff]  ;;  %v7573_v50 = vld [vmem:[#allocation20_spill] sm:$0xff] }
 0x518   : > { %v2398_v5 = vpop.permute.xlu1 %2397  ;;  %4501 = vmatpush1.bf16.msra.mxu0 %v4500_v54  ;;  %2294 = vmatprep.mubr.f32.mxu0 %v7565_v20  ;;  %v4506_v58 = vpack.c.bf16 %v2428_v55, %v2426_v11  ;;  %v4508_v30 = vpack.c.bf16 %v2427_v3, %v2425_v40 }
 0x519   : > { %v4504_v31 = vpack.c.bf16 %v2387_v41, %v2385_v45  ;;  %v2400_v25 = vpop.permute.xlu0 %2399  ;;  %v4502_v63 = vpack.c.bf16 %v2388_v27, %v2386_v6 }
 0x51a   : > { %v2407_v4 = vsel %vm895_vm8, %v2398_v5, %v2400_v25  ;;  %v2423_v0 = vsel %vm895_vm8, %v2400_v25, %v2398_v5 }
 0x51b   : > { %4503 = vmatprep.subr.bf16.mxu0 %v4502_v63  ;;  %4262 = vmatmul.mubr.msk.f32.gmra.mrb[14].mxu0 %vm570_vm4, %v1997_v17  ;;  %v2429_v9 = vmul.f32 %v6558_v36, %v2407_v4  ;;  %v2430_v39 = vmul.f32 %v6548_v22, %v2423_v0  ;;  %v7579_v4 = vld [vmem:[#allocation23_spill] sm:$0xff] }
 0x51c   : > { %v2402_v13 = vpop.permute.xlu1 %2401  ;;  %4505 = vmatpush1.bf16.msra.mxu0 %v4504_v31  ;;  %2514 = vmatprep.mubr.f32.mxu0 %v7565_v20 }
 0x51d   : > { %v2404_v56 = vpop.permute.xlu0 %2403  ;;  %4507 = vmatprep.subr.bf16.mxu0 %v4506_v58  ;;  %v7577_v58 = vld [vmem:[#allocation22_spill] sm:$0xff] }
 0x51e   : > { %v2408_v46 = vsel %vm895_vm8, %v2402_v13, %v2404_v56  ;;  %v2424_v28 = vsel %vm895_vm8, %v2404_v56, %v2402_v13  ;;  %v7581_v56 = vld [vmem:[#allocation24_spill] sm:$0xff] }
 0x51f   : > { %v2431_v8 = vmul.f32 %v6558_v36, %v2408_v46  ;;  %v2432_v26 = vmul.f32 %v6548_v22, %v2424_v28  ;;  %v7583_v28 = vld [vmem:[#allocation25_spill] sm:$0xff] }
 0x520   : > { %4509 = vmatpush1.bf16.msra.mxu0 %v4508_v30 }
 0x521   : > { %v4512_v1 = vpack.c.bf16 %v2431_v8, %v2429_v9  ;;  %v4510_v49 = vpack.c.bf16 %v2432_v26, %v2430_v39 }
 0x523   : > { %4511 = vmatprep.subr.bf16.mxu0 %v4510_v49 }
 0x524   : > { %4513 = vmatpush1.bf16.msra.mxu0 %v4512_v1 }
 0x527   : > { %4263 = vmatmul.mubr.msk.f32.vlgmr.msra.gmra.mrb[8].mxu0 %vm570_vm4, %v2434_v24 }
 0x528   : > { %2520 = vmatprep.mubr.f32.mxu0 %v7565_v20 }
 0x52b   : > { %4264 = vmatmul.mubr.msk.f32.gmra.mrb[10].mxu0 %vm570_vm4, %v2435_v23  ;;  %v3299_v23 = vld [vmem:[#allocation8 + $0x60] sm:$0xff] }
 0x52c   : > { %2526 = vmatprep.mubr.f32.mxu0 %v7565_v20 }
 0x52d   : > { %v2555_v7 = vpop.permute.xlu1 %2554 }
 0x52e   : > { %v2560_v45 = vpop.permute.xlu0 %2559 }
 0x52f   : > { %4265 = vmatmul.mubr.msk.f32.gmra.mrb[12].mxu0 %vm570_vm4, %v2436_v19 }
 0x530   : > { %2532 = vmatprep.mubr.f32.mxu0 %v7565_v20 }
 0x531   : > { %v2565_v31 = vpop.permute.xlu1 %2564 }
 0x532   : > { %v2570_v3 = vpop.permute.xlu0 %2569 }
 0x533   : > { %4266 = vmatmul.mubr.msk.f32.gmra.mrb[14].mxu0 %vm570_vm4, %v2437_v12  ;;  %v3300_v12 = vld [vmem:[#allocation8 + $0x68] sm:$0xff] }
 0x534   : > { %3661 = vmatprep.mubr.f32.mxu0 %v7565_v20 }
 0x5fa   : > { %v2516_v2 = vpop.f32.mrb[8].mxu0 }
 0x5fb   : > { %v2572_v29 = vadd.f32 %v2555_v7, %v2516_v2  ;;  %v2518_v10 = vpop.f32.mrb[9].mxu0  ;;  %v3301_v2 = vld [vmem:[#allocation8 + $0x70] sm:$0xff] }
 0x5fc   : > { %v2573_v21 = vadd.f32 %v2555_v7, %v2518_v10  ;;  %v3302_v10 = vld [vmem:[#allocation8 + $0x78] sm:$0xff] }
 0x5fd   : > { %v6581_v54 = vadd.f32 %v2572_v29, %v7569_v43 }
 0x5fe   : > { %v6584_v44 = vadd.f32 %v2573_v21, %v7571_v60  ;;  %v2522_v6 = vpop.f32.mrb[10].mxu0 }
 0x5ff   : > { %7570 = vst [vmem:[#allocation18_spill] sm:$0xff] %v6581_v54  ;;  %v2574_v62 = vadd.f32 %v2560_v45, %v2522_v6  ;;  %2761 = vrot.lane.b32.xlu1 %v6581_v54, %s5049_s10  ;;  %v2524_v57 = vpop.f32.mrb[11].mxu0 }
 0x600   : > { %7572 = vst [vmem:[#allocation19_spill] sm:$0xff] %v6584_v44  ;;  %2803 = vrot.lane.b32.xlu0 %v6584_v44, %s5053_s14  ;;  %v2575_v17 = vadd.f32 %v2560_v45, %v2524_v57 }
 0x601   : > { %v6591_v61 = vadd.f32 %v2574_v62, %v7573_v50 }
 0x602   : > { %v2528_v55 = vpop.f32.mrb[12].mxu0  ;;  %v6610_v11 = vadd.f32 %v2575_v17, %v7575_v42 }
 0x603   : > { %7574 = vst [vmem:[#allocation20_spill] sm:$0xff] %v6591_v61  ;;  %2801 = vrot.lane.b32.xlu1 %v6581_v54, %s5053_s14  ;;  %v2530_v41 = vpop.f32.mrb[13].mxu0  ;;  %v2576_v25 = vadd.f32 %v2565_v31, %v2528_v55 }
 0x604   : > { %2763 = vrot.lane.b32.xlu0 %v6591_v61, %s5049_s10  ;;  %7576 = vst [vmem:[#allocation21_spill] sm:$0xff] %v6610_v11  ;;  %v2577_v63 = vadd.f32 %v2565_v31, %v2530_v41 }
 0x605   : > { %v6633_v40 = vadd.f32 %v2576_v25, %v7577_v58 }
 0x606   : > { %v2534_v27 = vpop.f32.mrb[14].mxu0  ;;  %v6636_v0 = vadd.f32 %v2577_v63, %v7579_v4 }
 0x607   : > { %2624 = vrot.lane.b32.xlu1 %v6581_v54, %s5046_s23  ;;  %v2536_v5 = vpop.f32.mrb[15].mxu0  ;;  %7578 = vst [vmem:[#allocation22_spill] sm:$0xff] %v6633_v40  ;;  %v2578_v13 = vadd.f32 %v2570_v3, %v2534_v27 }
 0x608   : > { %2626 = vrot.lane.b32.xlu0 %v6591_v61, %s5046_s23  ;;  %7580 = vst [vmem:[#allocation23_spill] sm:$0xff] %v6636_v0  ;;  %v2579_v46 = vadd.f32 %v2570_v3, %v2536_v5 }
 0x609   : > { %v6643_v30 = vadd.f32 %v2578_v13, %v7581_v56 }
 0x60a   : > { %v6662_v9 = vadd.f32 %v2579_v46, %v7583_v28 }
 0x60b   : > { %2668 = vrot.lane.b32.xlu1 %v6581_v54, %s5047_s21  ;;  %7582 = vst [vmem:[#allocation24_spill] sm:$0xff] %v6643_v30 }
 0x60c   : > { %2670 = vrot.lane.b32.xlu0 %v6591_v61, %s5047_s21  ;;  %7584 = vst [vmem:[#allocation25_spill] sm:$0xff] %v6662_v9 }
 0x60f   : > { %2712 = vrot.lane.b32.xlu1 %v6581_v54, %s5048_s28 }
 0x610   : > { %2714 = vrot.lane.b32.xlu0 %v6591_v61, %s5048_s28 }
 0x613   : > { %2749 = vrot.lane.b32.xlu1 %v6584_v44, %s5049_s10 }
 0x614   : > { %2751 = vrot.lane.b32.xlu0 %v6610_v11, %s5049_s10 }
 0x617   : > { %2608 = vrot.lane.b32.xlu1 %v6584_v44, %s5046_s23 }
 0x618   : > { %2807 = vrot.lane.b32.xlu0 %v6610_v11, %s5053_s14 }
 0x61b   : > { %2656 = vrot.lane.b32.xlu1 %v6584_v44, %s5047_s21 }
 0x61c   : > { %2610 = vrot.lane.b32.xlu0 %v6610_v11, %s5046_s23 }
 0x61f   : > { %2700 = vrot.lane.b32.xlu1 %v6584_v44, %s5048_s28 }
 0x620   : > { %2658 = vrot.lane.b32.xlu0 %v6610_v11, %s5047_s21 }
 0x623   : > { %2805 = vrot.lane.b32.xlu1 %v6591_v61, %s5053_s14 }
 0x624   : > { %2702 = vrot.lane.b32.xlu0 %v6610_v11, %s5048_s28 }
 0x627   : > { %2765 = vrot.lane.b32.xlu1 %v6633_v40, %s5049_s10 }
 0x628   : > { %2811 = vrot.lane.b32.xlu0 %v6636_v0, %s5053_s14 }
 0x62b   : > { %2809 = vrot.lane.b32.xlu1 %v6633_v40, %s5053_s14 }
 0x62c   : > { %2767 = vrot.lane.b32.xlu0 %v6643_v30, %s5049_s10 }
 0x62f   : > { %2628 = vrot.lane.b32.xlu1 %v6633_v40, %s5046_s23 }
 0x630   : > { %2630 = vrot.lane.b32.xlu0 %v6643_v30, %s5046_s23 }
 0x633   : > { %2672 = vrot.lane.b32.xlu1 %v6633_v40, %s5047_s21 }
 0x634   : > { %2674 = vrot.lane.b32.xlu0 %v6643_v30, %s5047_s21 }
 0x637   : > { %2716 = vrot.lane.b32.xlu1 %v6633_v40, %s5048_s28 }
 0x638   : > { %2718 = vrot.lane.b32.xlu0 %v6643_v30, %s5048_s28 }
 0x63b   : > { %2753 = vrot.lane.b32.xlu1 %v6636_v0, %s5049_s10 }
 0x63c   : > { %2755 = vrot.lane.b32.xlu0 %v6662_v9, %s5049_s10 }
 0x63f   : > { %2612 = vrot.lane.b32.xlu1 %v6636_v0, %s5046_s23 }
 0x640   : > { %3054 = vrot.lane.b32.xlu0 %v6584_v44, %s5051_s6 }
 0x643   : > { %2660 = vrot.lane.b32.xlu1 %v6636_v0, %s5047_s21 }
 0x644   : > { %3058 = vrot.lane.b32.xlu0 %v6610_v11, %s5051_s6 }
 0x647   : > { %2704 = vrot.lane.b32.xlu1 %v6636_v0, %s5048_s28 }
 0x648   : > { %3062 = vrot.lane.b32.xlu0 %v6636_v0, %s5051_s6 }
 0x64b   : > { %2813 = vrot.lane.b32.xlu1 %v6643_v30, %s5053_s14 }
 0x64c   : > { %2815 = vrot.lane.b32.xlu0 %v6662_v9, %s5053_s14 }
 0x64f   : > { %3052 = vrot.lane.b32.xlu1 %v6581_v54, %s5051_s6 }
 0x650   : > { %3098 = vrot.lane.b32.xlu0 %v6584_v44, %s5052_s8 }
 0x653   : > { %3056 = vrot.lane.b32.xlu1 %v6591_v61, %s5051_s6 }
 0x654   : > { %2614 = vrot.lane.b32.xlu0 %v6662_v9, %s5046_s23 }
 0x657   : > { %3060 = vrot.lane.b32.xlu1 %v6633_v40, %s5051_s6 }
 0x658   : > { %3102 = vrot.lane.b32.xlu0 %v6610_v11, %s5052_s8 }
 0x65b   : > { %3064 = vrot.lane.b32.xlu1 %v6643_v30, %s5051_s6 }
 0x65c   : > { %2662 = vrot.lane.b32.xlu0 %v6662_v9, %s5047_s21 }
 0x65f   : > { %3096 = vrot.lane.b32.xlu1 %v6581_v54, %s5052_s8 }
 0x660   : > { %3106 = vrot.lane.b32.xlu0 %v6636_v0, %s5052_s8 }
 0x663   : > { %3100 = vrot.lane.b32.xlu1 %v6591_v61, %s5052_s8 }
 0x664   : > { %2706 = vrot.lane.b32.xlu0 %v6662_v9, %s5048_s28 }
 0x667   : > { %3104 = vrot.lane.b32.xlu1 %v6633_v40, %s5052_s8 }
 0x668   : > { %3142 = vrot.lane.b32.xlu0 %v6584_v44, %s5054_s30 }
 0x66b   : > { %3108 = vrot.lane.b32.xlu1 %v6643_v30, %s5052_s8 }
 0x66c   : > { %3066 = vrot.lane.b32.xlu0 %v6662_v9, %s5051_s6 }
 0x66f   : > { %3140 = vrot.lane.b32.xlu1 %v6581_v54, %s5054_s30 }
 0x670   : > { %3146 = vrot.lane.b32.xlu0 %v6610_v11, %s5054_s30 }
 0x671   : > { %v2762_v39 = vpop.permute.xlu1 %2761 }
 0x672   : > { %v6720_v8 = vpop.permute.xlu0 %2803 }
 0x673   : > { %3144 = vrot.lane.b32.xlu1 %v6591_v61, %s5054_s30 }
 0x674   : > { %3110 = vrot.lane.b32.xlu0 %v6662_v9, %s5052_s8 }
 0x675   : > { %v6726_v26 = vpop.permute.xlu1 %2801 }
 0x676   : > { %v2764_v1 = vpop.permute.xlu0 %2763 }
 0x677   : > { %3148 = vrot.lane.b32.xlu1 %v6633_v40, %s5054_s30 }
 0x678   : > { %3150 = vrot.lane.b32.xlu0 %v6636_v0, %s5054_s30 }
 0x679   : > { %v6732_v49 = vpop.permute.xlu1 %2624 }
 0x67a   : > { %v6734_v24 = vpop.permute.xlu0 %2626 }
 0x67b   : > { %3152 = vrot.lane.b32.xlu1 %v6643_v30, %s5054_s30 }
 0x67c   : > { %3154 = vrot.lane.b32.xlu0 %v6662_v9, %s5054_s30 }
 0x67d   : > { %v6740_v19 = vpop.permute.xlu1 %2668 }
 0x67e   : > { %v6742_v7 = vpop.permute.xlu0 %2670 }
 0x67f   : > { %3305 = vperm.xlu1 %4843, %v3299_v23  }
 0x680   : > { %3310 = vperm.xlu0 %4842, %v3300_v12  }
 0x681   : > { %v6744_v29 = vpop.permute.xlu1 %2712 }
 0x682   : > { %v6746_v21 = vpop.permute.xlu0 %2714 }
 0x683   : > { %3315 = vperm.xlu1 %4843, %v3301_v2  }
 0x684   : > { %3320 = vperm.xlu0 %4842, %v3302_v10  }
 0x685   : > { %v2750_v43 = vpop.permute.xlu1 %2749 }
 0x686   : > { %v2769_v45 = vsel %vm463_vm3, %v2762_v39, %v2750_v43  ;;  %v2781_v60 = vsel %vm463_vm3, %v2750_v43, %v2762_v39  ;;  %v2752_v6 = vpop.permute.xlu0 %2751 }
 0x687   : > { %v2785_v62 = vmul.f32 %v2781_v60, %v5526_v15  ;;  %v2786_v57 = vmul.f32 %v2769_v45, %v5523_v14  ;;  %v2770_v50 = vsel %vm463_vm3, %v2764_v1, %v2752_v6  ;;  %v2782_v55 = vsel %vm463_vm3, %v2752_v6, %v2764_v1 }
 0x688   : > { %v2787_v41 = vmul.f32 %v2782_v55, %v5526_v15  ;;  %v2788_v27 = vmul.f32 %v2770_v50, %v5523_v14 }
 0x689   : > { %v6756_v5 = vpop.permute.xlu1 %2608 }
 0x68a   : > { %v4516_v17 = vpack.c.bf16 %v2787_v41, %v2785_v62  ;;  %v2808_v42 = vpop.permute.xlu0 %2807  ;;  %v4514_v31 = vpack.c.bf16 %v2788_v27, %v2786_v57 }
 0x68c   : > { %4515 = vmatprep.subr.bf16.mxu1 %v4514_v31  ;;  %v2796_v31 = vmul.f32 %v6610_v11, %v5558_v53 }
 0x68d   : > { %v6758_v25 = vpop.permute.xlu1 %2656  ;;  %4517 = vmatpush1.bf16.msra.mxu1 %v4516_v17 }
 0x68e   : > { %v6760_v63 = vpop.permute.xlu0 %2610 }
 0x691   : > { %v6762_v3 = vpop.permute.xlu1 %2700 }
 0x692   : > { %v6764_v58 = vpop.permute.xlu0 %2658 }
 0x695   : > { %v2806_v4 = vpop.permute.xlu1 %2805 }
 0x696   : > { %v6766_v13 = vpop.permute.xlu0 %2702 }
 0x699   : > { %v2766_v56 = vpop.permute.xlu1 %2765 }
 0x69a   : > { %v2812_v46 = vpop.permute.xlu0 %2811 }
 0x69d   : > { %v2810_v28 = vpop.permute.xlu1 %2809 }
 0x69e   : > { %v2768_v39 = vpop.permute.xlu0 %2767 }
 0x6a1   : > { %v6768_v1 = vpop.permute.xlu1 %2628 }
 0x6a2   : > { %v6770_v23 = vpop.permute.xlu0 %2630 }
 0x6a5   : > { %v6772_v12 = vpop.permute.xlu1 %2672 }
 0x6a6   : > { %v6774_v2 = vpop.permute.xlu0 %2674 }
 0x6a9   : > { %v6776_v10 = vpop.permute.xlu1 %2716 }
 0x6aa   : > { %v6778_v43 = vpop.permute.xlu0 %2718 }
 0x6ad   : > { %v2754_v45 = vpop.permute.xlu1 %2753 }
 0x6ae   : > { %v2771_v60 = vsel %vm463_vm3, %v2766_v56, %v2754_v45  ;;  %v2783_v6 = vsel %vm463_vm3, %v2754_v45, %v2766_v56  ;;  %v2756_v62 = vpop.permute.xlu0 %2755 }
 0x6af   : > { %v2789_v57 = vmul.f32 %v2783_v6, %v5526_v15  ;;  %v2790_v50 = vmul.f32 %v2771_v60, %v5523_v14  ;;  %v2772_v55 = vsel %vm463_vm3, %v2768_v39, %v2756_v62  ;;  %v2784_v41 = vsel %vm463_vm3, %v2756_v62, %v2768_v39 }
 0x6b0   : > { %v2791_v27 = vmul.f32 %v2784_v41, %v5526_v15  ;;  %v2792_v17 = vmul.f32 %v2772_v55, %v5523_v14  ;;  %v2794_v60 = vmul.f32 %v6584_v44, %v5558_v53  ;;  %v2795_v6 = vmul.f32 %v6591_v61, %v5562_v59 }
 0x6b1   : > { %v6790_v36 = vpop.permute.xlu1 %2612  ;;  %v2800_v62 = vmul.f32 %v6662_v9, %v5558_v53  ;;  %v2834_v55 = vsel %vm528_vm7, %v2808_v42, %v2806_v4  ;;  %v2817_v61 = vsel %vm528_vm7, %v6726_v26, %v6720_v8 }
 0x6b2   : > { %v4520_v22 = vpack.c.bf16 %v2791_v27, %v2789_v57  ;;  %v6792_v56 = vpop.permute.xlu0 %3054  ;;  %v4518_v45 = vpack.c.bf16 %v2792_v17, %v2790_v50  ;;  %v4522_v39 = vpack.c.bf16 %v2796_v31, %v2794_v60  ;;  %v2793_v57 = vmul.f32 %v6581_v54, %v5562_v59 }
 0x6b3   : > { %v2798_v27 = vmul.f32 %v6636_v0, %v5558_v53  ;;  %v2833_v17 = vsel %vm528_vm7, %v6720_v8, %v6726_v26  ;;  %v2818_v60 = vsel %vm528_vm7, %v2806_v4, %v2808_v42  ;;  %v2645_v26 = vsel %vm300_vm0, %v6760_v63, %v6734_v24 }
 0x6b4   : > { %4519 = vmatprep.subr.bf16.mxu1 %v4518_v45  ;;  %v4524_v31 = vpack.c.bf16 %v2795_v6, %v2793_v57  ;;  %v2799_v45 = vmul.f32 %v6643_v30, %v5562_v59  ;;  %v2838_v6 = vmul.f32 %v2833_v17, %v5626_v35  ;;  %v2839_v42 = vmul.f32 %v2818_v60, %v5623_v32 }
 0x6b5   : > { %v6801_v41 = vpop.permute.xlu1 %2660  ;;  %4521 = vmatpush1.bf16.msra.mxu1 %v4520_v22  ;;  %v2840_v22 = vmul.f32 %v2834_v55, %v5626_v35  ;;  %v4526_v9 = vpack.c.bf16 %v2800_v62, %v2798_v27  ;;  %v2633_v62 = vsel %vm300_vm0, %v6734_v24, %v6760_v63  ;;  %v2837_v27 = vmul.f32 %v2817_v61, %v5623_v32 }
 0x6b6   : > { %4523 = vmatprep.subr.bf16.mxu1 %v4522_v39  ;;  %v6805_v50 = vpop.permute.xlu0 %3058  ;;  %v2797_v39 = vmul.f32 %v6633_v40, %v5562_v59  ;;  %v2835_v30 = vsel %vm528_vm7, %v2812_v46, %v2810_v28  ;;  %v2644_v24 = vsel %vm300_vm0, %v6756_v5, %v6732_v49 }
 0x6b7   : > { %v4530_v55 = vpack.c.bf16 %v2840_v22, %v2838_v6  ;;  %v4532_v60 = vpack.c.bf16 %v2839_v42, %v2837_v27 }
 0x6b8   : > { %v4528_v4 = vpack.c.bf16 %v2799_v45, %v2797_v39  ;;  %v2651_v45 = vmul.f32 %v2633_v62, %v5442_v16 }
 0x6b9   : > { %v6816_v11 = vpop.permute.xlu1 %2704  ;;  %4525 = vmatpush1.bf16.msra.mxu1 %v4524_v31  ;;  %v2819_v31 = vsel %vm528_vm7, %v2810_v28, %v2812_v46  ;;  %v2842_v28 = vmul.f32 %v2835_v30, %v5626_v35  ;;  %v2648_v30 = vmul.f32 %v2644_v24, %v5450_v18 }
 0x6ba   : > { %v6824_v57 = vpop.permute.xlu0 %3062  ;;  %4527 = vmatprep.subr.bf16.mxu1 %v4526_v9  ;;  %v2632_v9 = vsel %vm300_vm0, %v6732_v49, %v6756_v5  ;;  %v2841_v46 = vmul.f32 %v2819_v31, %v5623_v32  ;;  %v2677_v31 = vsel %vm353_vm1, %v6742_v7, %v6764_v58  ;;  %v2634_v49 = vsel %vm300_vm0, %v6768_v1, %v6790_v36 }
 0x6bb   : > { %v2649_v42 = vmul.f32 %v2632_v9, %v5442_v16  ;;  %v2646_v5 = vsel %vm300_vm0, %v6790_v36, %v6768_v1 }
 0x6bd   : > { %v2814_v8 = vpop.permute.xlu1 %2813  ;;  %4529 = vmatpush1.bf16.msra.mxu1 %v4528_v4  ;;  %v2650_v4 = vmul.f32 %v2645_v26, %v5450_v18  ;;  %v2846_v26 = vld [vmem:[#allocation6 + $0x140] sm:$0xff] }
 0x6be   : > { %v2816_v17 = vpop.permute.xlu0 %2815  ;;  %4531 = vmatprep.subr.bf16.mxu1 %v4530_v55 }
 0x6bf   : > { %v2820_v61 = vsel %vm528_vm7, %v2814_v8, %v2816_v17  ;;  %v2836_v22 = vsel %vm528_vm7, %v2816_v17, %v2814_v8  ;;  %v4538_v8 = vpack.c.bf16 %v2651_v45, %v2649_v42  ;;  %v2676_v17 = vsel %vm353_vm1, %v6740_v19, %v6758_v25 }
 0x6c0   : > { %v2843_v39 = vmul.f32 %v2820_v61, %v5623_v32  ;;  %v2844_v6 = vmul.f32 %v2836_v22, %v5626_v35  ;;  %v2689_v45 = vsel %vm353_vm1, %v6764_v58, %v6742_v7  ;;  %v2695_v22 = vmul.f32 %v2677_v31, %v5480_v48 }
 0x6c1   : > { %v6849_v63 = vpop.permute.xlu1 %3052  ;;  %4533 = vmatpush1.bf16.msra.mxu1 %v4532_v60  ;;  %v4540_v60 = vpack.c.bf16 %v2650_v4, %v2648_v30  ;;  %v2688_v7 = vsel %vm353_vm1, %v6758_v25, %v6740_v19  ;;  %v2693_v24 = vmul.f32 %v2676_v17, %v5480_v48  ;;  %v2694_v42 = vmul.f32 %v2689_v45, %v5477_v47 }
 0x6c2   : > { %v4536_v62 = vpack.c.bf16 %v2843_v39, %v2841_v46  ;;  %v6853_v55 = vpop.permute.xlu0 %3098  ;;  %v4534_v27 = vpack.c.bf16 %v2844_v6, %v2842_v28  ;;  %v2652_v46 = vmul.f32 %v2646_v5, %v5450_v18  ;;  %v2653_v28 = vmul.f32 %v2634_v49, %v5442_v16  ;;  %v2848_v5 = vld [vmem:[#allocation6 + $0x150] sm:$0xff] }
 0x6c3   : > { %v2692_v30 = vmul.f32 %v2688_v7, %v5477_v47  ;;  %v2721_v19 = vsel %vm406_vm2, %v6746_v21, %v6766_v13  ;;  %v4546_v25 = vpack.c.bf16 %v2695_v22, %v2693_v24  ;;  %v2678_v31 = vsel %vm353_vm1, %v6772_v12, %v6801_v41 }
 0x6c4   : > { %4535 = vmatprep.subr.bf16.mxu1 %v4534_v27  ;;  %v2739_v45 = vmul.f32 %v2721_v19, %v5503_v34  ;;  %v2734_v24 = vsel %vm406_vm2, %v6816_v11, %v6776_v10 }
 0x6c5   : > { %v6865_v9 = vpop.permute.xlu1 %3056  ;;  %4537 = vmatpush1.bf16.msra.mxu1 %v4536_v62  ;;  %v4548_v17 = vpack.c.bf16 %v2694_v42, %v2692_v30  ;;  %v2740_v19 = vmul.f32 %v2734_v24, %v5500_v33 }
 0x6c6   : > { %v2615_v61 = vpop.permute.xlu0 %2614  ;;  %4539 = vmatprep.subr.bf16.mxu1 %v4538_v8  ;;  %v2690_v8 = vsel %vm353_vm1, %v6801_v41, %v6772_v12 }
 0x6c7   : > { %v2635_v36 = vsel %vm300_vm0, %v6770_v23, %v2615_v61  ;;  %v2647_v1 = vsel %vm300_vm0, %v2615_v61, %v6770_v23  ;;  %v2847_v23 = vld [vmem:[#allocation6 + $0x148] sm:$0xff]  ;;  %v2733_v61 = vsel %vm406_vm2, %v6766_v13, %v6746_v21  ;;  %v2696_v22 = vmul.f32 %v2690_v8, %v5477_v47 }
 0x6c8   : > { %v2654_v39 = vmul.f32 %v2647_v1, %v5450_v18  ;;  %v2655_v6 = vmul.f32 %v2635_v36, %v5442_v16  ;;  %4267 = vmatmul.mubr.msk.f32.vlgmr.msra.gmra.mrb[16].mxu1 %vm570_vm4, %v2846_v26  ;;  %v2720_v26 = vsel %vm406_vm2, %v6744_v29, %v6762_v3  ;;  %v2697_v36 = vmul.f32 %v2678_v31, %v5480_v48 }
 0x6c9   : > { %v6886_v58 = vpop.permute.xlu1 %3060  ;;  %4541 = vmatpush1.bf16.msra.mxu1 %v4540_v60  ;;  %2932 = vmatprep.mubr.f32.mxu1 %v7565_v20  ;;  %v2732_v21 = vsel %vm406_vm2, %v6762_v3, %v6744_v29  ;;  %v2722_v3 = vsel %vm406_vm2, %v6776_v10, %v6816_v11  ;;  %v3084_v31 = vsel %vm789_vm5, %v6792_v56, %v6849_v63 }
 0x6ca   : > { %v4544_v4 = vpack.c.bf16 %v2654_v39, %v2652_v46  ;;  %v6891_v62 = vpop.permute.xlu0 %3102  ;;  %v4542_v27 = vpack.c.bf16 %v2655_v6, %v2653_v28  ;;  %v2849_v28 = vld [vmem:[#allocation6 + $0x158] sm:$0xff]  ;;  %v2738_v39 = vmul.f32 %v2733_v61, %v5500_v33  ;;  %v2736_v42 = vmul.f32 %v2732_v21, %v5500_v33  ;;  %v2745_v21 = vld [vmem:[#allocation6 + $0x120] sm:$0xff] }
 0x6cb   : > { %v3069_v11 = vsel %vm789_vm5, %v6865_v9, %v6805_v50  ;;  %v3068_v61 = vsel %vm789_vm5, %v6849_v63, %v6792_v56  ;;  %v3086_v56 = vsel %vm789_vm5, %v6824_v57, %v6886_v58 }
 0x6cc   : > { %4543 = vmatprep.subr.bf16.mxu1 %v4542_v27  ;;  %4268 = vmatmul.mubr.msk.f32.gmra.mrb[18].mxu1 %vm570_vm4, %v2847_v23  ;;  %v4556_v30 = vpack.c.bf16 %v2738_v39, %v2736_v42  ;;  %v3093_v24 = vmul.f32 %v3086_v56, %v5543_v38 }
 0x6cd   : > { %v6904_v49 = vpop.permute.xlu1 %3064  ;;  %4545 = vmatpush1.bf16.msra.mxu1 %v4544_v4  ;;  %2938 = vmatprep.mubr.f32.mxu1 %v7565_v20  ;;  %v3085_v4 = vsel %vm789_vm5, %v6805_v50, %v6865_v9  ;;  %v3089_v50 = vmul.f32 %v3084_v31, %v5543_v38  ;;  %v3090_v9 = vmul.f32 %v3069_v11, %v5540_v37 }
 0x6ce   : > { %v2663_v60 = vpop.permute.xlu0 %2662  ;;  %4547 = vmatprep.subr.bf16.mxu1 %v4546_v25 }
 0x6cf   : > { %v2679_v12 = vsel %vm353_vm1, %v6774_v2, %v2663_v60  ;;  %v2691_v41 = vsel %vm353_vm1, %v2663_v60, %v6774_v2  ;;  %v2737_v2 = vmul.f32 %v2720_v26, %v5503_v34  ;;  %v3091_v26 = vmul.f32 %v3085_v4, %v5543_v38 }
 0x6d0   : > { %v2698_v1 = vmul.f32 %v2691_v41, %v5477_v47  ;;  %v2699_v46 = vmul.f32 %v2679_v12, %v5480_v48  ;;  %4269 = vmatmul.mubr.msk.f32.gmra.mrb[20].mxu1 %vm570_vm4, %v2848_v5  ;;  %v2741_v5 = vmul.f32 %v2722_v3, %v5503_v34 }
 0x6d1   : > { %v3097_v13 = vpop.permute.xlu1 %3096  ;;  %4549 = vmatpush1.bf16.msra.mxu1 %v4548_v17  ;;  %2944 = vmatprep.mubr.f32.mxu1 %v7565_v20  ;;  %v4554_v29 = vpack.c.bf16 %v2739_v45, %v2737_v2 }
 0x6d2   : > { %v4552_v6 = vpack.c.bf16 %v2698_v1, %v2696_v22  ;;  %v6929_v7 = vpop.permute.xlu0 %3106  ;;  %v4550_v23 = vpack.c.bf16 %v2699_v46, %v2697_v36  ;;  %v3070_v22 = vsel %vm789_vm5, %v6886_v58, %v6824_v57  ;;  %v3088_v36 = vmul.f32 %v3068_v61, %v5540_v37 }
 0x6d3   : > { %v4562_v1 = vpack.c.bf16 %v3091_v26, %v3089_v50  ;;  %v3092_v2 = vmul.f32 %v3070_v22, %v5540_v37  ;;  %v3112_v4 = vsel %vm842_vm6, %v3097_v13, %v6853_v55 }
 0x6d4   : > { %4551 = vmatprep.subr.bf16.mxu1 %v4550_v23  ;;  %4270 = vmatmul.mubr.msk.f32.gmra.mrb[22].mxu1 %vm570_vm4, %v2849_v28  ;;  %v4564_v28 = vpack.c.bf16 %v3090_v9, %v3088_v36 }
 0x6d5   : > { %v3101_v27 = vpop.permute.xlu1 %3100  ;;  %4553 = vmatpush1.bf16.msra.mxu1 %v4552_v6  ;;  %3027 = vmatprep.mubr.f32.mxu1 %v7565_v20  ;;  %v3128_v6 = vsel %vm842_vm6, %v6853_v55, %v3097_v13 }
 0x6d6   : > { %v2707_v25 = vpop.permute.xlu0 %2706  ;;  %4555 = vmatprep.subr.bf16.mxu1 %v4554_v29  ;;  %v3129_v63 = vsel %vm842_vm6, %v6891_v62, %v3101_v27  ;;  %v3113_v23 = vsel %vm842_vm6, %v3101_v27, %v6891_v62  ;;  %v2746_v27 = vld [vmem:[#allocation6 + $0x128] sm:$0xff] }
 0x6d7   : > { %v2723_v10 = vsel %vm406_vm2, %v6778_v43, %v2707_v25  ;;  %v2735_v8 = vsel %vm406_vm2, %v2707_v25, %v6778_v43  ;;  %v3135_v42 = vmul.f32 %v3129_v63, %v5603_v52  ;;  %v2748_v63 = vld [vmem:[#allocation6 + $0x138] sm:$0xff] }
 0x6d8   : > { %v2742_v17 = vmul.f32 %v2735_v8, %v5500_v33  ;;  %v2743_v60 = vmul.f32 %v2723_v10, %v5503_v34  ;;  %v3132_v10 = vmul.f32 %v3112_v4, %v5600_v51 }
 0x6d9   : > { %v3105_v45 = vpop.permute.xlu1 %3104  ;;  %4557 = vmatpush1.bf16.msra.mxu1 %v4556_v30  ;;  %v3134_v30 = vmul.f32 %v3113_v23, %v5600_v51 }
 0x6da   : > { %v4560_v12 = vpack.c.bf16 %v2742_v17, %v2740_v19  ;;  %v6963_v43 = vpop.permute.xlu0 %3142  ;;  %v4558_v41 = vpack.c.bf16 %v2743_v60, %v2741_v5  ;;  %v3114_v11 = vsel %vm842_vm6, %v3105_v45, %v6929_v7  ;;  %v3130_v55 = vsel %vm842_vm6, %v6929_v7, %v3105_v45  ;;  %v2747_v5 = vld [vmem:[#allocation6 + $0x130] sm:$0xff] }
 0x6db   : > { %v4572_v26 = vpack.c.bf16 %v3134_v30, %v3132_v10  ;;  %v3136_v17 = vmul.f32 %v3114_v11, %v5600_v51  ;;  %v3137_v50 = vmul.f32 %v3130_v55, %v5603_v52  ;;  %v3185_v11 = vld [vmem:[#allocation6 + $0x160] sm:$0xff]  ;;  %v3186_v10 = vld [vmem:[#allocation6 + $0x168] sm:$0xff]  ;;  %v3187_v55 = vld [vmem:[#allocation6 + $0x170] sm:$0xff] }
 0x6dc   : > { %4559 = vmatprep.subr.bf16.mxu1 %v4558_v41  ;;  %v7585_v41 = vld [vmem:[#allocation17_spill] sm:$0xff] }
 0x6dd   : > { %v3109_v46 = vpop.permute.xlu1 %3108  ;;  %4561 = vmatpush1.bf16.msra.mxu1 %v4560_v12 }
 0x6de   : > { %v3067_v39 = vpop.permute.xlu0 %3066  ;;  %4563 = vmatprep.subr.bf16.mxu1 %v4562_v1 }
 0x6df   : > { %v3071_v57 = vsel %vm789_vm5, %v6904_v49, %v3067_v39  ;;  %v3087_v58 = vsel %vm789_vm5, %v3067_v39, %v6904_v49  ;;  %v3133_v49 = vmul.f32 %v3128_v6, %v5603_v52  ;;  %v7586_v6 = vld [vmem:[#allocation26_spill] sm:$0xff] }
 0x6e0   : > { %v3094_v29 = vmul.f32 %v3071_v57, %v5540_v37  ;;  %v3095_v3 = vmul.f32 %v3087_v58, %v5543_v38  ;;  %4271 = vmatmul.mubr.msk.f32.vlgmr.msra.gmra.mrb[16].mxu1 %vm570_vm4, %v2745_v21 }
 0x6e1   : > { %v3141_v62 = vpop.permute.xlu1 %3140  ;;  %4565 = vmatpush1.bf16.msra.mxu1 %v4564_v28  ;;  %3033 = vmatprep.mubr.f32.mxu1 %v7565_v20  ;;  %v4570_v13 = vpack.c.bf16 %v3135_v42, %v3133_v49 }
 0x6e2   : > { %v4568_v19 = vpack.c.bf16 %v3094_v29, %v3092_v2  ;;  %v3147_v25 = vpop.permute.xlu0 %3146  ;;  %v4566_v31 = vpack.c.bf16 %v3095_v3, %v3093_v24  ;;  %v3172_v7 = vsel %vm895_vm8, %v6963_v43, %v3141_v62  ;;  %v3156_v21 = vsel %vm895_vm8, %v3141_v62, %v6963_v43 }
 0x6e3   : > { %v3176_v58 = vmul.f32 %v7586_v6, %v3156_v21 }
 0x6e4   : > { %4567 = vmatprep.subr.bf16.mxu1 %v4566_v31  ;;  %4272 = vmatmul.mubr.msk.f32.gmra.mrb[18].mxu1 %vm570_vm4, %v2746_v27 }
 0x6e5   : > { %v3145_v8 = vpop.permute.xlu1 %3144  ;;  %4569 = vmatpush1.bf16.msra.mxu1 %v4568_v19  ;;  %3039 = vmatprep.mubr.f32.mxu1 %v7565_v20 }
 0x6e6   : > { %v3173_v60 = vsel %vm895_vm8, %v3147_v25, %v3145_v8  ;;  %v3111_v61 = vpop.permute.xlu0 %3110  ;;  %4571 = vmatprep.subr.bf16.mxu1 %v4570_v13  ;;  %v3157_v12 = vsel %vm895_vm8, %v3145_v8, %v3147_v25  ;;  %v3188_v13 = vld [vmem:[#allocation6 + $0x178] sm:$0xff] }
 0x6e7   : > { %v3115_v45 = vsel %vm842_vm6, %v3109_v46, %v3111_v61  ;;  %v3131_v9 = vsel %vm842_vm6, %v3111_v61, %v3109_v46  ;;  %v3179_v22 = vmul.f32 %v7585_v41, %v3173_v60  ;;  %v3177_v46 = vmul.f32 %v7585_v41, %v3172_v7 }
 0x6e8   : > { %v3138_v36 = vmul.f32 %v3115_v45, %v5600_v51  ;;  %v3139_v1 = vmul.f32 %v3131_v9, %v5603_v52  ;;  %4273 = vmatmul.mubr.msk.f32.gmra.mrb[20].mxu1 %vm570_vm4, %v2747_v5  ;;  %v3178_v23 = vmul.f32 %v7586_v6, %v3157_v12 }
 0x6e9   : > { %v3149_v56 = vpop.permute.xlu1 %3148  ;;  %4573 = vmatpush1.bf16.msra.mxu1 %v4572_v26  ;;  %3045 = vmatprep.mubr.f32.mxu1 %v7565_v20  ;;  %v4578_v57 = vpack.c.bf16 %v3179_v22, %v3177_v46 }
 0x6ea   : > { %v4576_v28 = vpack.c.bf16 %v3138_v36, %v3136_v17  ;;  %v3151_v2 = vpop.permute.xlu0 %3150  ;;  %v4574_v39 = vpack.c.bf16 %v3139_v1, %v3137_v50  ;;  %v4580_v3 = vpack.c.bf16 %v3178_v23, %v3176_v58 }
 0x6eb   : > { %v3158_v24 = vsel %vm895_vm8, %v3149_v56, %v3151_v2  ;;  %v3174_v42 = vsel %vm895_vm8, %v3151_v2, %v3149_v56 }
 0x6ec   : > { %4575 = vmatprep.subr.bf16.mxu1 %v4574_v39  ;;  %4274 = vmatmul.mubr.msk.f32.gmra.mrb[22].mxu1 %vm570_vm4, %v2748_v63  ;;  %v3180_v27 = vmul.f32 %v7586_v6, %v3158_v24  ;;  %v3181_v49 = vmul.f32 %v7585_v41, %v3174_v42 }
 0x6ed   : > { %v3153_v29 = vpop.permute.xlu1 %3152  ;;  %4577 = vmatpush1.bf16.msra.mxu1 %v4576_v28  ;;  %3265 = vmatprep.mubr.f32.mxu1 %v7565_v20 }
 0x6ee   : > { %v3155_v43 = vpop.permute.xlu0 %3154  ;;  %4579 = vmatprep.subr.bf16.mxu1 %v4578_v57 }
 0x6ef   : > { %v3159_v4 = vsel %vm895_vm8, %v3153_v29, %v3155_v43  ;;  %v3175_v62 = vsel %vm895_vm8, %v3155_v43, %v3153_v29 }
 0x6f0   : > { %v3182_v30 = vmul.f32 %v7586_v6, %v3159_v4  ;;  %v3183_v19 = vmul.f32 %v7585_v41, %v3175_v62 }
 0x6f1   : > { %4581 = vmatpush1.bf16.msra.mxu1 %v4580_v3 }
 0x6f2   : > { %v4584_v25 = vpack.c.bf16 %v3182_v30, %v3180_v27  ;;  %v4582_v31 = vpack.c.bf16 %v3183_v19, %v3181_v49  ;;  %v4034_v19 = vld [vmem:[#allocation8 + $0x80] sm:$0xff] }
 0x6f4   : > { %4583 = vmatprep.subr.bf16.mxu1 %v4582_v31  ;;  %v4035_v31 = vld [vmem:[#allocation8 + $0x88] sm:$0xff] }
 0x6f5   : > { %4585 = vmatpush1.bf16.msra.mxu1 %v4584_v25 }
 0x6f8   : > { %4275 = vmatmul.mubr.msk.f32.vlgmr.msra.gmra.mrb[16].mxu1 %vm570_vm4, %v3185_v11 }
 0x6f9   : > { %3271 = vmatprep.mubr.f32.mxu1 %v7565_v20 }
 0x6fc   : > { %4276 = vmatmul.mubr.msk.f32.gmra.mrb[18].mxu1 %vm570_vm4, %v3186_v10  ;;  %v4036_v10 = vld [vmem:[#allocation8 + $0x90] sm:$0xff] }
 0x6fd   : > { %3277 = vmatprep.mubr.f32.mxu1 %v7565_v20 }
 0x6fe   : > { %v3306_v8 = vpop.permute.xlu1 %3305 }
 0x6ff   : > { %v3311_v50 = vpop.permute.xlu0 %3310 }
 0x700   : > { %4277 = vmatmul.mubr.msk.f32.gmra.mrb[20].mxu1 %vm570_vm4, %v3187_v55 }
 0x701   : > { %3283 = vmatprep.mubr.f32.mxu1 %v7565_v20 }
 0x702   : > { %v3316_v46 = vpop.permute.xlu1 %3315 }
 0x703   : > { %v3321_v39 = vpop.permute.xlu0 %3320 }
 0x704   : > { %4278 = vmatmul.mubr.msk.f32.gmra.mrb[22].mxu1 %vm570_vm4, %v3188_v13  ;;  %v4037_v13 = vld [vmem:[#allocation8 + $0x98] sm:$0xff] }
 0x705   : > { %4012 = vmatprep.mubr.f32.mxu1 %v7565_v20 }
 0x7cb   : > { %v3267_v5 = vpop.f32.mrb[16].mxu1 }
 0x7cc   : > { %v3323_v26 = vadd.f32 %v3306_v8, %v3267_v5  ;;  %v3269_v17 = vpop.f32.mrb[17].mxu1 }
 0x7cd   : > { %v3324_v60 = vadd.f32 %v3306_v8, %v3269_v17 }
 0x7ce   : > { %v7036_v61 = vmax.f32 %v3323_v26, 0.0 }
 0x7cf   : > { %v7038_v7 = vmax.f32 %v3324_v60, 0.0  ;;  %v3273_v45 = vpop.f32.mrb[18].mxu1 }
 0x7d0   : > { %v3325_v9 = vadd.f32 %v3311_v50, %v3273_v45  ;;  %3496 = vrot.lane.b32.xlu1 %v7036_v61, %s5049_s10  ;;  %v3275_v12 = vpop.f32.mrb[19].mxu1 }
 0x7d1   : > { %3538 = vrot.lane.b32.xlu0 %v7038_v7, %s5053_s14  ;;  %v3326_v63 = vadd.f32 %v3311_v50, %v3275_v12 }
 0x7d2   : > { %v7044_v41 = vmax.f32 %v3325_v9, 0.0 }
 0x7d3   : > { %v3279_v22 = vpop.f32.mrb[20].mxu1  ;;  %v7062_v21 = vmax.f32 %v3326_v63, 0.0 }
 0x7d4   : > { %3536 = vrot.lane.b32.xlu1 %v7036_v61, %s5053_s14  ;;  %v3281_v36 = vpop.f32.mrb[21].mxu1  ;;  %v3327_v28 = vadd.f32 %v3316_v46, %v3279_v22 }
 0x7d5   : > { %3498 = vrot.lane.b32.xlu0 %v7044_v41, %s5049_s10  ;;  %v3328_v2 = vadd.f32 %v3316_v46, %v3281_v36  ;;  %v3531_v40 = vmul.f32 %v7062_v21, %v5558_v53 }
 0x7d6   : > { %v7084_v6 = vmax.f32 %v3327_v28, 0.0 }
 0x7d7   : > { %v3285_v1 = vpop.f32.mrb[22].mxu1  ;;  %v7086_v23 = vmax.f32 %v3328_v2, 0.0 }
 0x7d8   : > { %3359 = vrot.lane.b32.xlu1 %v7036_v61, %s5046_s23  ;;  %v3287_v56 = vpop.f32.mrb[23].mxu1  ;;  %v3329_v57 = vadd.f32 %v3321_v39, %v3285_v1 }
 0x7d9   : > { %3361 = vrot.lane.b32.xlu0 %v7044_v41, %s5046_s23  ;;  %v3330_v24 = vadd.f32 %v3321_v39, %v3287_v56 }
 0x7da   : > { %v7092_v58 = vmax.f32 %v3329_v57, 0.0 }
 0x7db   : > { %v7110_v42 = vmax.f32 %v3330_v24, 0.0 }
 0x7dc   : > { %3403 = vrot.lane.b32.xlu1 %v7036_v61, %s5047_s21 }
 0x7dd   : > { %3405 = vrot.lane.b32.xlu0 %v7044_v41, %s5047_s21 }
 0x7e0   : > { %3447 = vrot.lane.b32.xlu1 %v7036_v61, %s5048_s28 }
 0x7e1   : > { %3449 = vrot.lane.b32.xlu0 %v7044_v41, %s5048_s28 }
 0x7e4   : > { %3484 = vrot.lane.b32.xlu1 %v7038_v7, %s5049_s10 }
 0x7e5   : > { %3486 = vrot.lane.b32.xlu0 %v7062_v21, %s5049_s10 }
 0x7e8   : > { %3343 = vrot.lane.b32.xlu1 %v7038_v7, %s5046_s23 }
 0x7e9   : > { %3542 = vrot.lane.b32.xlu0 %v7062_v21, %s5053_s14 }
 0x7ec   : > { %3391 = vrot.lane.b32.xlu1 %v7038_v7, %s5047_s21 }
 0x7ed   : > { %3345 = vrot.lane.b32.xlu0 %v7062_v21, %s5046_s23 }
 0x7f0   : > { %3435 = vrot.lane.b32.xlu1 %v7038_v7, %s5048_s28 }
 0x7f1   : > { %3393 = vrot.lane.b32.xlu0 %v7062_v21, %s5047_s21 }
 0x7f4   : > { %3540 = vrot.lane.b32.xlu1 %v7044_v41, %s5053_s14 }
 0x7f5   : > { %3437 = vrot.lane.b32.xlu0 %v7062_v21, %s5048_s28 }
 0x7f8   : > { %3500 = vrot.lane.b32.xlu1 %v7084_v6, %s5049_s10 }
 0x7f9   : > { %3546 = vrot.lane.b32.xlu0 %v7086_v23, %s5053_s14 }
 0x7fc   : > { %3544 = vrot.lane.b32.xlu1 %v7084_v6, %s5053_s14 }
 0x7fd   : > { %3502 = vrot.lane.b32.xlu0 %v7092_v58, %s5049_s10 }
 0x800   : > { %3363 = vrot.lane.b32.xlu1 %v7084_v6, %s5046_s23 }
 0x801   : > { %3365 = vrot.lane.b32.xlu0 %v7092_v58, %s5046_s23 }
 0x804   : > { %3407 = vrot.lane.b32.xlu1 %v7084_v6, %s5047_s21 }
 0x805   : > { %3409 = vrot.lane.b32.xlu0 %v7092_v58, %s5047_s21 }
 0x808   : > { %3451 = vrot.lane.b32.xlu1 %v7084_v6, %s5048_s28 }
 0x809   : > { %3453 = vrot.lane.b32.xlu0 %v7092_v58, %s5048_s28 }
 0x80c   : > { %3488 = vrot.lane.b32.xlu1 %v7086_v23, %s5049_s10 }
 0x80d   : > { %3490 = vrot.lane.b32.xlu0 %v7110_v42, %s5049_s10 }
 0x810   : > { %3347 = vrot.lane.b32.xlu1 %v7086_v23, %s5046_s23 }
 0x811   : > { %3789 = vrot.lane.b32.xlu0 %v7038_v7, %s5051_s6 }
 0x814   : > { %3395 = vrot.lane.b32.xlu1 %v7086_v23, %s5047_s21 }
 0x815   : > { %3793 = vrot.lane.b32.xlu0 %v7062_v21, %s5051_s6 }
 0x818   : > { %3439 = vrot.lane.b32.xlu1 %v7086_v23, %s5048_s28 }
 0x819   : > { %3797 = vrot.lane.b32.xlu0 %v7086_v23, %s5051_s6 }
 0x81c   : > { %3548 = vrot.lane.b32.xlu1 %v7092_v58, %s5053_s14 }
 0x81d   : > { %3550 = vrot.lane.b32.xlu0 %v7110_v42, %s5053_s14 }
 0x820   : > { %3787 = vrot.lane.b32.xlu1 %v7036_v61, %s5051_s6 }
 0x821   : > { %3833 = vrot.lane.b32.xlu0 %v7038_v7, %s5052_s8 }
 0x824   : > { %3791 = vrot.lane.b32.xlu1 %v7044_v41, %s5051_s6 }
 0x825   : > { %3349 = vrot.lane.b32.xlu0 %v7110_v42, %s5046_s23  ;;  %s4966_s23 = sshll.u32 %s5056_s9, 4  ;;  %s4967_s23 = int_to_ptr.vmem [resolvable:$false] %s4966_s23 }
 0x826   : > { %p4969_p12 = scmp.lt.s32.totalorder %s7455_s24, %s4967_s23 }
 0x828   : > { %3795 = vrot.lane.b32.xlu1 %v7084_v6, %s5051_s6 }
 0x829   : > { %3837 = vrot.lane.b32.xlu0 %v7062_v21, %s5052_s8 }
 0x82c   : > { %3799 = vrot.lane.b32.xlu1 %v7092_v58, %s5051_s6 }
 0x82d   : > { %3397 = vrot.lane.b32.xlu0 %v7110_v42, %s5047_s21 }
 0x830   : > { %3831 = vrot.lane.b32.xlu1 %v7036_v61, %s5052_s8 }
 0x831   : > { %3841 = vrot.lane.b32.xlu0 %v7086_v23, %s5052_s8 }
 0x834   : > { %3835 = vrot.lane.b32.xlu1 %v7044_v41, %s5052_s8 }
 0x835   : > { %3441 = vrot.lane.b32.xlu0 %v7110_v42, %s5048_s28  ;;  %s4968_s28 = scalar_lea.vmem %s4967_s23, 2048 }
 0x836   : > { %p4970_p2 = scmp.lt.s32.totalorder %s4968_s28, %s4962_s27 }
 0x838   : > { %3839 = vrot.lane.b32.xlu1 %v7084_v6, %s5052_s8  ;;  %p4971_p1 = por %p4970_p2, %p4969_p12 }
 0x839   : > { %3877 = vrot.lane.b32.xlu0 %v7038_v7, %s5054_s30 }
 0x83a   : > { %p4972_p4 = pnand %p4971_p1, %p4965_p7 }
 0x83c   : > { %3843 = vrot.lane.b32.xlu1 %v7092_v58, %s5052_s8 }
 0x83d   : > { %3801 = vrot.lane.b32.xlu0 %v7110_v42, %s5051_s6 }
 0x840   : > { %3875 = vrot.lane.b32.xlu1 %v7036_v61, %s5054_s30 }
 0x841   : > { %3881 = vrot.lane.b32.xlu0 %v7062_v21, %s5054_s30 }
 0x842   : > { %v3497_v29 = vpop.permute.xlu1 %3496 }
 0x843   : > { %v3539_v43 = vpop.permute.xlu0 %3538 }
 0x844   : > { %3879 = vrot.lane.b32.xlu1 %v7044_v41, %s5054_s30 }
 0x845   : > { %3845 = vrot.lane.b32.xlu0 %v7110_v42, %s5052_s8 }
 0x846   : > { %v3537_v3 = vpop.permute.xlu1 %3536 }
 0x847   : > { %v7173_v4 = vsel %vm528_vm7, %v3537_v3, %v3539_v43  ;;  %v7176_v62 = vsel %vm528_vm7, %v3539_v43, %v3537_v3  ;;  %v3499_v27 = vpop.permute.xlu0 %3498 }
 0x848   : > { %3883 = vrot.lane.b32.xlu1 %v7084_v6, %s5054_s30 }
 0x849   : > { %3885 = vrot.lane.b32.xlu0 %v7086_v23, %s5054_s30 }
 0x84a   : > { %v3360_v49 = vpop.permute.xlu1 %3359 }
 0x84b   : > { %v3362_v30 = vpop.permute.xlu0 %3361 }
 0x84c   : > { %3887 = vrot.lane.b32.xlu1 %v7092_v58, %s5054_s30 }
 0x84d   : > { %3889 = vrot.lane.b32.xlu0 %v7110_v42, %s5054_s30 }
 0x84e   : > { %v3404_v25 = vpop.permute.xlu1 %3403 }
 0x84f   : > { %v3406_v11 = vpop.permute.xlu0 %3405 }
 0x850   : > { %4040 = vperm.xlu1 %4843, %v4034_v19  }
 0x851   : > { %4045 = vperm.xlu0 %4842, %v4035_v31  }
 0x852   : > { %v3448_v55 = vpop.permute.xlu1 %3447 }
 0x853   : > { %v3450_v8 = vpop.permute.xlu0 %3449 }
 0x854   : > { %4050 = vperm.xlu1 %4843, %v4036_v10  }
 0x855   : > { %4055 = vperm.xlu0 %4842, %v4037_v13  }
 0x856   : > { %v3485_v5 = vpop.permute.xlu1 %3484 }
 0x857   : > { %v3504_v26 = vsel %vm463_vm3, %v3497_v29, %v3485_v5  ;;  %v3516_v17 = vsel %vm463_vm3, %v3485_v5, %v3497_v29  ;;  %v3487_v60 = vpop.permute.xlu0 %3486 }
 0x858   : > { %v3520_v50 = vmul.f32 %v3516_v17, %v5526_v15  ;;  %v3521_v45 = vmul.f32 %v3504_v26, %v5523_v14  ;;  %v3505_v9 = vsel %vm463_vm3, %v3499_v27, %v3487_v60  ;;  %v3517_v12 = vsel %vm463_vm3, %v3487_v60, %v3499_v27 }
 0x859   : > { %v3522_v22 = vmul.f32 %v3517_v12, %v5526_v15  ;;  %v3523_v36 = vmul.f32 %v3505_v9, %v5523_v14 }
 0x85a   : > { %v3344_v1 = vpop.permute.xlu1 %3343 }
 0x85b   : > { %v4588_v56 = vpack.c.bf16 %v3522_v22, %v3520_v50  ;;  %v7194_v63 = vpop.permute.xlu0 %3542  ;;  %v4586_v46 = vpack.c.bf16 %v3523_v36, %v3521_v45  ;;  %v3367_v28 = vsel %vm300_vm0, %v3360_v49, %v3344_v1  ;;  %v3379_v2 = vsel %vm300_vm0, %v3344_v1, %v3360_v49 }
 0x85c   : > { %v7201_v43 = vmul.f32 %v3379_v2, %v5450_v18  ;;  %v7204_v3 = vmul.f32 %v3367_v28, %v5442_v16 }
 0x85d   : > { %4587 = vmatprep.subr.bf16.mxu0 %v4586_v46 }
 0x85e   : > { %v3392_v39 = vpop.permute.xlu1 %3391  ;;  %4589 = vmatpush1.bf16.msra.mxu0 %v4588_v56 }
 0x85f   : > { %v3346_v57 = vpop.permute.xlu0 %3345  ;;  %v3411_v49 = vsel %vm353_vm1, %v3404_v25, %v3392_v39  ;;  %v3423_v31 = vsel %vm353_vm1, %v3392_v39, %v3404_v25 }
 0x860   : > { %v3368_v24 = vsel %vm300_vm0, %v3362_v30, %v3346_v57  ;;  %v3380_v29 = vsel %vm300_vm0, %v3346_v57, %v3362_v30  ;;  %v7222_v50 = vmul.f32 %v3423_v31, %v5477_v47  ;;  %v7225_v45 = vmul.f32 %v3411_v49, %v5480_v48 }
 0x861   : > { %v7207_v27 = vmul.f32 %v3380_v29, %v5450_v18  ;;  %v7210_v19 = vmul.f32 %v3368_v24, %v5442_v16 }
 0x862   : > { %v3436_v10 = vpop.permute.xlu1 %3435 }
 0x863   : > { %v3467_v13 = vsel %vm406_vm2, %v3436_v10, %v3448_v55  ;;  %v3394_v5 = vpop.permute.xlu0 %3393  ;;  %v3455_v12 = vsel %vm406_vm2, %v3448_v55, %v3436_v10 }
 0x864   : > { %v3412_v17 = vsel %vm353_vm1, %v3406_v11, %v3394_v5  ;;  %v3424_v60 = vsel %vm353_vm1, %v3394_v5, %v3406_v11  ;;  %v7241_v28 = vmul.f32 %v3467_v13, %v5500_v33  ;;  %v7244_v2 = vmul.f32 %v3455_v12, %v5503_v34 }
 0x865   : > { %v7228_v25 = vmul.f32 %v3424_v60, %v5477_v47  ;;  %v7231_v9 = vmul.f32 %v3412_v17, %v5480_v48 }
 0x866   : > { %v3541_v22 = vpop.permute.xlu1 %3540 }
 0x867   : > { %v3438_v1 = vpop.permute.xlu0 %3437 }
 0x868   : > { %v3456_v56 = vsel %vm406_vm2, %v3450_v8, %v3438_v1  ;;  %v3468_v46 = vsel %vm406_vm2, %v3438_v1, %v3450_v8 }
 0x869   : > { %v7247_v55 = vmul.f32 %v3468_v46, %v5500_v33  ;;  %v7250_v39 = vmul.f32 %v3456_v56, %v5503_v34 }
 0x86a   : > { %v3501_v57 = vpop.permute.xlu1 %3500 }
 0x86b   : > { %v3547_v29 = vpop.permute.xlu0 %3546 }
 0x86e   : > { %v3545_v49 = vpop.permute.xlu1 %3544 }
 0x86f   : > { %v3503_v31 = vpop.permute.xlu0 %3502 }
 0x872   : > { %v7256_v10 = vpop.permute.xlu1 %3363 }
 0x873   : > { %v7258_v13 = vpop.permute.xlu0 %3365 }
 0x876   : > { %v7260_v5 = vpop.permute.xlu1 %3407 }
 0x877   : > { %v7262_v17 = vpop.permute.xlu0 %3409 }
 0x87a   : > { %v7264_v60 = vpop.permute.xlu1 %3451 }
 0x87b   : > { %v7266_v12 = vpop.permute.xlu0 %3453 }
 0x87e   : > { %v3489_v1 = vpop.permute.xlu1 %3488 }
 0x87f   : > { %v3506_v56 = vsel %vm463_vm3, %v3501_v57, %v3489_v1  ;;  %v3518_v46 = vsel %vm463_vm3, %v3489_v1, %v3501_v57  ;;  %v3491_v24 = vpop.permute.xlu0 %3490  ;;  %v3529_v1 = vmul.f32 %v7038_v7, %v5558_v53  ;;  %v3533_v7 = vmul.f32 %v7086_v23, %v5558_v53 }
 0x880   : > { %v3524_v8 = vmul.f32 %v3518_v46, %v5526_v15  ;;  %v3525_v36 = vmul.f32 %v3506_v56, %v5523_v14  ;;  %v3507_v11 = vsel %vm463_vm3, %v3503_v31, %v3491_v24  ;;  %v3519_v30 = vsel %vm463_vm3, %v3491_v24, %v3503_v31 }
 0x881   : > { %v3526_v26 = vmul.f32 %v3519_v30, %v5526_v15  ;;  %v3527_v0 = vmul.f32 %v3507_v11, %v5523_v14  ;;  %v3530_v56 = vmul.f32 %v7044_v41, %v5562_v59  ;;  %v4594_v46 = vpack.c.bf16 %v3531_v40, %v3529_v1 }
 0x882   : > { %v3348_v44 = vpop.permute.xlu1 %3347  ;;  %v3535_v15 = vmul.f32 %v7110_v42, %v5558_v53  ;;  %v3569_v14 = vsel %vm528_vm7, %v7194_v63, %v3541_v22  ;;  %v3534_v40 = vmul.f32 %v7092_v58, %v5562_v59  ;;  %v3553_v42 = vsel %vm528_vm7, %v3541_v22, %v7194_v63 }
 0x883   : > { %v4592_v54 = vpack.c.bf16 %v3526_v26, %v3524_v8  ;;  %v3790_v51 = vpop.permute.xlu0 %3789  ;;  %v4590_v57 = vpack.c.bf16 %v3527_v0, %v3525_v36  ;;  %v3528_v0 = vmul.f32 %v7036_v61, %v5562_v59  ;;  %v3575_v26 = vmul.f32 %v3569_v14, %v5626_v35 }
 0x884   : > { %v4598_v36 = vpack.c.bf16 %v3535_v15, %v3533_v7  ;;  %v3573_v61 = vmul.f32 %v7176_v62, %v5626_v35  ;;  %v3574_v23 = vmul.f32 %v3553_v42, %v5623_v32  ;;  %v3572_v63 = vmul.f32 %v7173_v4, %v5623_v32 }
 0x885   : > { %4591 = vmatprep.subr.bf16.mxu0 %v4590_v57  ;;  %v4596_v41 = vpack.c.bf16 %v3530_v56, %v3528_v0  ;;  %v3554_v22 = vsel %vm528_vm7, %v3545_v49, %v3547_v29  ;;  %v3570_v8 = vsel %vm528_vm7, %v3547_v29, %v3545_v49 }
 0x886   : > { %v7286_v30 = vpop.permute.xlu1 %3395  ;;  %4593 = vmatpush1.bf16.msra.mxu0 %v4592_v54  ;;  %v3532_v54 = vmul.f32 %v7084_v6, %v5562_v59  ;;  %v4602_v24 = vpack.c.bf16 %v3575_v26, %v3573_v61  ;;  %v4604_v6 = vpack.c.bf16 %v3574_v23, %v3572_v63  ;;  %v3576_v1 = vmul.f32 %v3554_v22, %v5623_v32 }
 0x887   : > { %4595 = vmatprep.subr.bf16.mxu0 %v4594_v46  ;;  %v3794_v21 = vpop.permute.xlu0 %3793  ;;  %v3577_v56 = vmul.f32 %v3570_v8, %v5626_v35  ;;  %v7588_v8 = vpack.c.bf16 %v7207_v27, %v7201_v43 }
 0x888   : > { %v4600_v58 = vpack.c.bf16 %v3534_v40, %v3532_v54  ;;  %v3381_v40 = vsel %vm300_vm0, %v3348_v44, %v7256_v10 }
 0x88a   : > { %v7297_v11 = vpop.permute.xlu1 %3439  ;;  %4597 = vmatpush1.bf16.msra.mxu0 %v4596_v41  ;;  %v3369_v41 = vsel %vm300_vm0, %v7256_v10, %v3348_v44 }
 0x88b   : > { %v7303_v53 = vpop.permute.xlu0 %3797  ;;  %4599 = vmatprep.subr.bf16.mxu0 %v4598_v36  ;;  %v3388_v63 = vmul.f32 %v3369_v41, %v5442_v16 }
 0x88e   : > { %v3549_v31 = vpop.permute.xlu1 %3548  ;;  %4601 = vmatpush1.bf16.msra.mxu0 %v4600_v58 }
 0x88f   : > { %v3551_v59 = vpop.permute.xlu0 %3550  ;;  %4603 = vmatprep.subr.bf16.mxu0 %v4602_v24  ;;  %v3387_v24 = vmul.f32 %v3381_v40, %v5450_v18 }
 0x890   : > { %v3555_v62 = vsel %vm528_vm7, %v3549_v31, %v3551_v59  ;;  %v3571_v57 = vsel %vm528_vm7, %v3551_v59, %v3549_v31 }
 0x891   : > { %v3578_v46 = vmul.f32 %v3555_v62, %v5623_v32  ;;  %v3579_v4 = vmul.f32 %v3571_v57, %v5626_v35  ;;  %v3581_v35 = vld [vmem:[#allocation6 + $0x1a0] sm:$0xff]  ;;  %v3582_v62 = vld [vmem:[#allocation6 + $0x1a8] sm:$0xff]  ;;  %v7589_v57 = vpack.c.bf16 %v7231_v9, %v7225_v45 }
 0x892   : > { %v3788_v15 = vpop.permute.xlu1 %3787  ;;  %4605 = vmatpush1.bf16.msra.mxu0 %v4604_v6 }
 0x893   : > { %v4608_v29 = vpack.c.bf16 %v3578_v46, %v3576_v1  ;;  %v7316_v49 = vpop.permute.xlu0 %3833  ;;  %v4606_v14 = vpack.c.bf16 %v3579_v4, %v3577_v56  ;;  %v3803_v0 = vsel %vm789_vm5, %v3788_v15, %v3790_v51  ;;  %v3819_v7 = vsel %vm789_vm5, %v3790_v51, %v3788_v15  ;;  %v3583_v46 = vld [vmem:[#allocation6 + $0x1b0] sm:$0xff] }
 0x894   : > { %v3823_v42 = vmul.f32 %v3803_v0, %v5540_v37  ;;  %v3824_v26 = vmul.f32 %v3819_v7, %v5543_v38  ;;  %v7587_v51 = vpack.c.bf16 %v7210_v19, %v7204_v3  ;;  %v7590_v15 = vpack.c.bf16 %v7228_v25, %v7222_v50 }
 0x895   : > { %4607 = vmatprep.subr.bf16.mxu0 %v4606_v14  ;;  %v7591_v25 = vpack.c.bf16 %v7250_v39, %v7244_v2  ;;  %v7592_v39 = vpack.c.bf16 %v7247_v55, %v7241_v28 }
 0x896   : > { %v3792_v32 = vpop.permute.xlu1 %3791  ;;  %4609 = vmatpush1.bf16.msra.mxu0 %v4608_v29 }
 0x897   : > { %v3804_v36 = vsel %vm789_vm5, %v3792_v32, %v3794_v21  ;;  %v3820_v54 = vsel %vm789_vm5, %v3794_v21, %v3792_v32  ;;  %v3350_v61 = vpop.permute.xlu0 %3349  ;;  %4611 = vmatprep.subr.bf16.mxu0 %v7587_v51 }
 0x898   : > { %v3825_v23 = vmul.f32 %v3804_v36, %v5540_v37  ;;  %v3826_v44 = vmul.f32 %v3820_v54, %v5543_v38  ;;  %v3370_v10 = vsel %vm300_vm0, %v7258_v13, %v3350_v61  ;;  %v3382_v58 = vsel %vm300_vm0, %v3350_v61, %v7258_v13 }
 0x899   : > { %v3389_v21 = vmul.f32 %v3382_v58, %v5450_v18  ;;  %v3390_v22 = vmul.f32 %v3370_v10, %v5442_v16  ;;  %4279 = vmatmul.mubr.msk.f32.vlgmr.msra.gmra.mrb[16].mxu0 %vm570_vm4, %v3581_v35  ;;  %v3413_v16 = vsel %vm353_vm1, %v7260_v5, %v7286_v30  ;;  %v3425_v18 = vsel %vm353_vm1, %v7286_v30, %v7260_v5 }
 0x89a   : > { %v7342_v3 = vpack.c.bf16 %v3825_v23, %v3823_v42  ;;  %v3796_v19 = vpop.permute.xlu1 %3795  ;;  %4613 = vmatpush1.bf16.msra.mxu0 %v7588_v8  ;;  %v4634_v31 = vpack.c.bf16 %v3826_v44, %v3824_v26  ;;  %3667 = vmatprep.mubr.f32.mxu0 %v7565_v20  ;;  %v3431_v5 = vmul.f32 %v3425_v18, %v5477_v47 }
 0x89b   : > { %v4616_v13 = vpack.c.bf16 %v3389_v21, %v3387_v24  ;;  %v3838_v59 = vpop.permute.xlu0 %3837  ;;  %v4614_v6 = vpack.c.bf16 %v3390_v22, %v3388_v63  ;;  %v3432_v30 = vmul.f32 %v3413_v16, %v5480_v48  ;;  %v3821_v54 = vsel %vm789_vm5, %v7303_v53, %v3796_v19 }
 0x89c   : > { %4658 = vmatprep.subr.bf16.mxu1 %v4634_v31  ;;  %v3828_v28 = vmul.f32 %v3821_v54, %v5543_v38 }
 0x89d   : > { %4615 = vmatprep.subr.bf16.mxu0 %v4614_v6  ;;  %4664 = vmatpush1.bf16.msra.mxu1 %v7342_v3 }
 0x89e   : > { %v3800_v43 = vpop.permute.xlu1 %3799  ;;  %4617 = vmatpush1.bf16.msra.mxu0 %v4616_v13 }
 0x89f   : > { %v3398_v27 = vpop.permute.xlu0 %3397  ;;  %4619 = vmatprep.subr.bf16.mxu0 %v7589_v57  ;;  %4280 = vmatmul.mubr.msk.f32.gmra.mrb[18].mxu0 %vm570_vm4, %v3582_v62  ;;  %v3482_v57 = vld [vmem:[#allocation6 + $0x190] sm:$0xff] }
 0x8a0   : > { %v3414_v1 = vsel %vm353_vm1, %v7262_v17, %v3398_v27  ;;  %v3426_v56 = vsel %vm353_vm1, %v3398_v27, %v7262_v17  ;;  %3673 = vmatprep.mubr.f32.mxu0 %v7565_v20  ;;  %v3584_v17 = vld [vmem:[#allocation6 + $0x1b8] sm:$0xff] }
 0x8a1   : > { %v3433_v4 = vmul.f32 %v3426_v56, %v5477_v47  ;;  %v3434_v45 = vmul.f32 %v3414_v1, %v5480_v48  ;;  %v3457_v47 = vsel %vm406_vm2, %v7264_v60, %v7297_v11  ;;  %v3469_v48 = vsel %vm406_vm2, %v7297_v11, %v7264_v60 }
 0x8a2   : > { %v3832_v9 = vpop.permute.xlu1 %3831  ;;  %4621 = vmatpush1.bf16.msra.mxu0 %v7590_v15  ;;  %v3475_v32 = vmul.f32 %v3469_v48, %v5500_v33  ;;  %v3476_v60 = vmul.f32 %v3457_v47, %v5503_v34  ;;  %v4846_v15 = vld [vmem:[#allocation9 + $0x18] ss:$0 sm:$0xff] }
 0x8a3   : > { %v4624_v29 = vpack.c.bf16 %v3433_v4, %v3431_v5  ;;  %v3842_v14 = vpop.permute.xlu0 %3841  ;;  %v4622_v0 = vpack.c.bf16 %v3434_v45, %v3432_v30  ;;  %4281 = vmatmul.mubr.msk.f32.gmra.mrb[20].mxu0 %vm570_vm4, %v3583_v46  ;;  %v3863_v23 = vsel %vm842_vm6, %v7316_v49, %v3832_v9  ;;  %v3847_v58 = vsel %vm842_vm6, %v3832_v9, %v7316_v49  ;;  %v3483_v48 = vld [vmem:[#allocation6 + $0x198] sm:$0xff] }
 0x8a4   : > { %3679 = vmatprep.mubr.f32.mxu0 %v7565_v20  ;;  %v3868_v8 = vmul.f32 %v3863_v23, %v5603_v52 }
 0x8a5   : > { %4623 = vmatprep.subr.bf16.mxu0 %v4622_v0 }
 0x8a6   : > { %v3836_v7 = vpop.permute.xlu1 %3835  ;;  %4625 = vmatpush1.bf16.msra.mxu0 %v4624_v29 }
 0x8a7   : > { %v3442_v50 = vpop.permute.xlu0 %3441  ;;  %4627 = vmatprep.subr.bf16.mxu0 %v7591_v25  ;;  %4282 = vmatmul.mubr.msk.f32.gmra.mrb[22].mxu0 %vm570_vm4, %v3584_v17  ;;  %v3864_v61 = vsel %vm842_vm6, %v3838_v59, %v3836_v7  ;;  %v3848_v44 = vsel %vm842_vm6, %v3836_v7, %v3838_v59  ;;  %v4847_v25 = vld [vmem:[#allocation9 + $0x10] ss:$0 sm:$0xff] }
 0x8a8   : > { %v3458_v41 = vsel %vm406_vm2, %v7266_v12, %v3442_v50  ;;  %v3470_v40 = vsel %vm406_vm2, %v3442_v50, %v7266_v12  ;;  %3762 = vmatprep.mubr.f32.mxu0 %v7565_v20  ;;  %v3805_v12 = vsel %vm789_vm5, %v3796_v19, %v7303_v53  ;;  %v3870_v24 = vmul.f32 %v3864_v61, %v5603_v52  ;;  %v3481_v19 = vld [vmem:[#allocation6 + $0x188] sm:$0xff] }
 0x8a9   : > { %v3477_v11 = vmul.f32 %v3470_v40, %v5500_v33  ;;  %v3478_v35 = vmul.f32 %v3458_v41, %v5503_v34  ;;  %v3480_v34 = vld [vmem:[#allocation6 + $0x180] sm:$0xff]  ;;  %v3827_v51 = vmul.f32 %v3805_v12, %v5540_v37 }
 0x8aa   : > { %v3840_v2 = vpop.permute.xlu1 %3839  ;;  %4629 = vmatpush1.bf16.msra.mxu0 %v7592_v39 }
 0x8ab   : > { %v4632_v42 = vpack.c.bf16 %v3477_v11, %v3475_v32  ;;  %v3878_v26 = vpop.permute.xlu0 %3877  ;;  %v4630_v36 = vpack.c.bf16 %v3478_v35, %v3476_v60 }
 0x8ad   : > { %4631 = vmatprep.subr.bf16.mxu0 %v4630_v36 }
 0x8ae   : > { %v3844_v33 = vpop.permute.xlu1 %3843  ;;  %4633 = vmatpush1.bf16.msra.mxu0 %v4632_v42 }
 0x8af   : > { %v3802_v55 = vpop.permute.xlu0 %3801  ;;  %4635 = vmatprep.subr.bf16.mxu0 %v4634_v31  ;;  %v7593_v31 = vld [vmem:[#allocation16_spill] sm:$0xff] }
 0x8b0   : > { %v3806_v10 = vsel %vm789_vm5, %v3800_v43, %v3802_v55  ;;  %v3822_v53 = vsel %vm789_vm5, %v3802_v55, %v3800_v43  ;;  %v3869_v13 = vmul.f32 %v3848_v44, %v7593_v31  ;;  %v3867_v62 = vmul.f32 %v3847_v58, %v7593_v31  ;;  %v3923_v55 = vld [vmem:[#allocation6 + $0x1d8] sm:$0xff] }
 0x8b1   : > { %v3829_v63 = vmul.f32 %v3806_v10, %v5540_v37  ;;  %v3830_v21 = vmul.f32 %v3822_v53, %v5543_v38  ;;  %4283 = vmatmul.mubr.msk.f32.vlgmr.msra.gmra.mrb[16].mxu0 %vm570_vm4, %v3480_v34  ;;  %v3849_v37 = vsel %vm842_vm6, %v3840_v2, %v3842_v14  ;;  %v3865_v38 = vsel %vm842_vm6, %v3842_v14, %v3840_v2  ;;  %v3920_v34 = vld [vmem:[#allocation6 + $0x1c0] sm:$0xff] }
 0x8b2   : > { %v3876_v22 = vpop.permute.xlu1 %3875  ;;  %4637 = vmatpush1.bf16.msra.mxu0 %v7342_v3  ;;  %3768 = vmatprep.mubr.f32.mxu0 %v7565_v20  ;;  %v4642_v3 = vpack.c.bf16 %v3870_v24, %v3868_v8  ;;  %v4644_v18 = vpack.c.bf16 %v3869_v13, %v3867_v62  ;;  %v3871_v1 = vmul.f32 %v3849_v37, %v7593_v31  ;;  %v7595_v37 = vld [vmem:[#allocation19_spill] sm:$0xff] }
 0x8b3   : > { %v4640_v59 = vpack.c.bf16 %v3829_v63, %v3827_v51  ;;  %v3882_v49 = vpop.permute.xlu0 %3881  ;;  %v4638_v6 = vpack.c.bf16 %v3830_v21, %v3828_v28  ;;  %v3872_v56 = vmul.f32 %v3865_v38, %v5603_v52  ;;  %v3907_v30 = vsel %vm895_vm8, %v3878_v26, %v3876_v22  ;;  %v3922_v51 = vld [vmem:[#allocation6 + $0x1d0] sm:$0xff]  ;;  %v3921_v28 = vld [vmem:[#allocation6 + $0x1c8] sm:$0xff] }
 0x8b4   : > { %v3891_v0 = vsel %vm895_vm8, %v3876_v22, %v3878_v26  ;;  %v3912_v50 = vmul.f32 %v4846_v15, %v3907_v30  ;;  %v7597_v30 = vld [vmem:[#allocation23_spill] sm:$0xff] }
 0x8b5   : > { %4284 = vmatmul.mubr.msk.f32.gmra.mrb[18].mxu0 %vm570_vm4, %v3481_v19  ;;  %4639 = vmatprep.subr.bf16.mxu0 %v4638_v6 }
 0x8b6   : > { %4659 = vmatprep.subr.bf16.mxu1 %v4638_v6  ;;  %v3880_v16 = vpop.permute.xlu1 %3879  ;;  %4641 = vmatpush1.bf16.msra.mxu0 %v4640_v59 }
 0x8b7   : > { %v3908_v43 = vsel %vm895_vm8, %v3882_v49, %v3880_v16  ;;  %4665 = vmatpush1.bf16.msra.mxu1 %v4640_v59  ;;  %v3846_v27 = vpop.permute.xlu0 %3845  ;;  %4643 = vmatprep.subr.bf16.mxu0 %v4642_v3  ;;  %v3892_v4 = vsel %vm895_vm8, %v3880_v16, %v3882_v49  ;;  %v7594_v49 = vld [vmem:[#allocation18_spill] sm:$0xff] }
 0x8b8   : > { %4660 = vmatprep.subr.bf16.mxu1 %v4642_v3  ;;  %v3850_v46 = vsel %vm842_vm6, %v3844_v33, %v3846_v27  ;;  %v3866_v5 = vsel %vm842_vm6, %v3846_v27, %v3844_v33  ;;  %3774 = vmatprep.mubr.f32.mxu0 %v7565_v20  ;;  %v3914_v29 = vmul.f32 %v4846_v15, %v3908_v43  ;;  %v7596_v43 = vld [vmem:[#allocation22_spill] sm:$0xff] }
 0x8b9   : > { %v3873_v45 = vmul.f32 %v3850_v46, %v7593_v31  ;;  %v3874_v9 = vmul.f32 %v3866_v5, %v5603_v52  ;;  %4285 = vmatmul.mubr.msk.f32.gmra.mrb[20].mxu0 %vm570_vm4, %v3482_v57  ;;  %v3913_v41 = vmul.f32 %v4847_v25, %v3892_v4  ;;  %v3911_v52 = vmul.f32 %v4847_v25, %v3891_v0  ;;  %v7599_v0 = vld [vmem:[#allocation21_spill] sm:$0xff] }
 0x8ba   : > { %v3884_v14 = vpop.permute.xlu1 %3883  ;;  %4645 = vmatpush1.bf16.msra.mxu0 %v4644_v18  ;;  %3780 = vmatprep.mubr.f32.mxu0 %v7565_v20  ;;  %v4650_v11 = vpack.c.bf16 %v3914_v29, %v3912_v50  ;;  %v7601_v50 = vld [vmem:[#allocation25_spill] sm:$0xff] }
 0x8bb   : > { %v4648_v17 = vpack.c.bf16 %v3873_v45, %v3871_v1  ;;  %4666 = vmatpush1.bf16.msra.mxu1 %v4644_v18  ;;  %v3886_v47 = vpop.permute.xlu0 %3885  ;;  %v4646_v7 = vpack.c.bf16 %v3874_v9, %v3872_v56  ;;  %v4652_v2 = vpack.c.bf16 %v3913_v41, %v3911_v52 }
 0x8bc   : > { %v3893_v40 = vsel %vm895_vm8, %v3884_v14, %v3886_v47  ;;  %v3909_v32 = vsel %vm895_vm8, %v3886_v47, %v3884_v14 }
 0x8bd   : > { %4647 = vmatprep.subr.bf16.mxu0 %v4646_v7  ;;  %4661 = vmatprep.subr.bf16.mxu1 %v4646_v7  ;;  %v3915_v26 = vmul.f32 %v4847_v25, %v3893_v40  ;;  %v3916_v36 = vmul.f32 %v4846_v15, %v3909_v32 }
 0x8be   : > { %4286 = vmatmul.mubr.msk.f32.gmra.mrb[22].mxu0 %vm570_vm4, %v3483_v48  ;;  %v3888_v60 = vpop.permute.xlu1 %3887  ;;  %v7600_v48 = vld [vmem:[#allocation24_spill] sm:$0xff] }
 0x8bf   : > { %4649 = vmatpush1.bf16.msra.mxu0 %v4648_v17  ;;  %4667 = vmatpush1.bf16.msra.mxu1 %v4648_v17  ;;  %v3890_v35 = vpop.permute.xlu0 %3889 }
 0x8c0   : > { %4662 = vmatprep.subr.bf16.mxu1 %v4650_v11  ;;  %v3894_v39 = vsel %vm895_vm8, %v3888_v60, %v3890_v35  ;;  %v3910_v42 = vsel %vm895_vm8, %v3890_v35, %v3888_v60  ;;  %4651 = vmatprep.subr.bf16.mxu0 %v4650_v11 }
 0x8c1   : > { %v3917_v12 = vmul.f32 %v4847_v25, %v3894_v39  ;;  %v3918_v54 = vmul.f32 %v4846_v15, %v3910_v42  ;;  %4000 = vmatprep.mubr.f32.mxu0 %v7565_v20  ;;  %v7598_v15 = vld [vmem:[#allocation20_spill] sm:$0xff] }
 0x8c3   : > { %v4656_v61 = vpack.c.bf16 %v3917_v12, %v3915_v26  ;;  %4653 = vmatpush1.bf16.msra.mxu0 %v4652_v2  ;;  %4668 = vmatpush1.bf16.msra.mxu1 %v4652_v2  ;;  %v4654_v33 = vpack.c.bf16 %v3918_v54, %v3916_v36 }
 0x8c5   : > { %4655 = vmatprep.subr.bf16.mxu0 %v4654_v33  ;;  %4663 = vmatprep.subr.bf16.mxu1 %v4654_v33 }
 0x8c7   : > { %4657 = vmatpush1.bf16.msra.mxu0 %v4656_v61  ;;  %4669 = vmatpush1.bf16.msra.mxu1 %v4656_v61 }
 0x8ca   : > { %4287 = vmatmul.mubr.msk.f32.vlgmr.msra.gmra.mrb[16].mxu0 %vm570_vm4, %v3920_v34  ;;  %4289 = vmatmul.mubr.msk.f32.vlgmr.msra.gmra.mrb[24].mxu1 %vm570_vm4, %v3922_v51 }
 0x8cb   : > { %4006 = vmatprep.mubr.f32.mxu0 %v7565_v20  ;;  %4018 = vmatprep.mubr.f32.mxu1 %v7565_v20 }
 0x8ce   : > { %4288 = vmatmul.mubr.msk.f32.gmra.mrb[18].mxu0 %vm570_vm4, %v3921_v28  ;;  %4290 = vmatmul.mubr.msk.f32.gmra.mrb[26].mxu1 %vm570_vm4, %v3923_v55 }
 0x8cf   : > { %v4041_v58 = vpop.permute.xlu1 %4040 }
 0x8d0   : > { %v4046_v24 = vpop.permute.xlu0 %4045 }
 0x8d3   : > { %v4051_v20 = vpop.permute.xlu1 %4050 }
 0x8d4   : > { %v4056_v5 = vpop.permute.xlu0 %4055 }
 0x98c   : > { %v3776_v23 = vpop.f32.mrb[20].mxu0 }
 0x98d   : > { %v3778_v44 = vpop.f32.mrb[21].mxu0 }
 0x991   : > { %v3782_v10 = vpop.f32.mrb[22].mxu0 }
 0x992   : > { %v3784_v53 = vpop.f32.mrb[23].mxu0 }
 0x99d   : > { %v4002_v63 = vpop.f32.mrb[16].mxu0  ;;  %v4014_v21 = vpop.f32.mrb[24].mxu1 }
 0x99e   : > { %v4058_v22 = vadd.f32 %v4041_v58, %v4002_v63  ;;  %v4678_v19 = vadd.f32 %v4014_v21, %v3776_v23  ;;  %v4004_v8 = vpop.f32.mrb[17].mxu0  ;;  %v4016_v31 = vpop.f32.mrb[25].mxu1 }
 0x99f   : > { %v4059_v13 = vadd.f32 %v4041_v58, %v4004_v8  ;;  %v4679_v59 = vadd.f32 %v4016_v31, %v3778_v44 }
 0x9a0   : > { %v4066_v6 = vadd.f32 %v4058_v22, %v7594_v49  ;;  %v4062_v62 = vadd.f32 %v4678_v19, %v4051_v20 }
 0x9a1   : > { %v4067_v38 = vadd.f32 %v4059_v13, %v7595_v37  ;;  %v4063_v3 = vadd.f32 %v4679_v59, %v4051_v20  ;;  %v4008_v16 = vpop.f32.mrb[18].mxu0  ;;  %v4020_v18 = vpop.f32.mrb[26].mxu1 }
 0x9a2   : > { %4090 = vst [vmem:[%s259_s29] sm:$0xff] %v4066_v6  ;;  %v4070_v27 = vadd.f32 %v4062_v62, %v7596_v43  ;;  %v4060_v57 = vadd.f32 %v4046_v24, %v4008_v16  ;;  %v4680_v1 = vadd.f32 %v4020_v18, %v3782_v10  ;;  %v4010_v56 = vpop.f32.mrb[19].mxu0  ;;  %v4022_v46 = vpop.f32.mrb[27].mxu1 }
 0x9a3   : > { %4091 = vst [vmem:[%s259_s29 + $0x8] sm:$0xff] %v4067_v38  ;;  %v4071_v4 = vadd.f32 %v4063_v3, %v7597_v30  ;;  %v4061_v45 = vadd.f32 %v4046_v24, %v4010_v56  ;;  %v4681_v9 = vadd.f32 %v4022_v46, %v3784_v53 }
 0x9a4   : > { %4094 = vst [vmem:[%s259_s29 + $0x20] sm:$0xff] %v4070_v27  ;;  %v4068_v29 = vadd.f32 %v4060_v57, %v7598_v15  ;;  %v4064_v14 = vadd.f32 %v4680_v1, %v4056_v5 }
 0x9a5   : > { %4095 = vst [vmem:[%s259_s29 + $0x28] sm:$0xff] %v4071_v4  ;;  %v4069_v17 = vadd.f32 %v4061_v45, %v7599_v0  ;;  %v4065_v47 = vadd.f32 %v4681_v9, %v4056_v5 }
 0x9a6   : > { %4092 = vst [vmem:[%s259_s29 + $0x10] sm:$0xff] %v4068_v29  ;;  %v4072_v7 = vadd.f32 %v4064_v14, %v7600_v48 }
 0x9a7   : > { %4093 = vst [vmem:[%s259_s29 + $0x18] sm:$0xff] %v4069_v17  ;;  %v4073_v25 = vadd.f32 %v4065_v47, %v7601_v50 }
 0x9a8   : > { %4096 = vst [vmem:[%s259_s29 + $0x30] sm:$0xff] %v4072_v7 }
 0x9a9   : > { %4097 = vst [vmem:[%s259_s29 + $0x38] sm:$0xff] %v4073_v25 }
 0x9aa   : > { %4975 = shalt.err (!%p4972_p4)
}
 0x9ab   : > { %s4976_s10 = scalar_lea.hbm %s7462_s12, 1024  ;;  %s4980_s14 = scalar_lea.hbm %s7511_s4, 2048 }
 0x9ac   : > { %p4977_p9 = scmp.ne.s32.totalorder %s7462_s12, %s4976_s10  ;;  %p4981_p8 = scmp.lt.u32.totalorder %s7462_s12, %s7511_s4 }
 0x9ad   : > { %p4982_p13 = scmp.lt.u32.totalorder %s4980_s14, %s4976_s10  ;;  %p4984_p10 = scmp.lt.u32.totalorder %s4976_s10, %s7462_s12 }
 0x9ae   : > { %p4978_p0 = pnand %p4977_p9, %p5231_p5 }
 0x9af   : > { %p4983_p6 = por %p4982_p13, %p4981_p8 }
 0x9b0   : > { %p4979_p11 = pneg %p4978_p0 }
 0x9b1   : > { %p4985_p3 = por %p4984_p10, %p4983_p6 }
 0x9b3   : > { %p4986_p7 = pnand %p4985_p3, %p4979_p11 }
 0x9b5   : > { %4989 = shalt.err (!%p4986_p7)
}
 0x9b6   : > { %s5057_s5 = smov 256  }
 0x9b7   : > { %4764 = dma.vmem_to_hbm [thread:$0]  (%p5231_p5), %s7455_s24, 1024, %s7462_s12, %s4099_s19, %s5057_s5, %s5057_s5, %s5047_s21  }
 0x9b8 PF: > { %s4127_s7 = sand.u32 1, %s5024_s15   ;;  %p7602_p12 = scmp.ne.s32.totalorder %s7542_s22, 0 }
 0x9b9   : > { %p7603_p2 = scmp.ge.s32.totalorder %s5036_s18, 2  ;;  %s4128_s25 = scalar_lea.sflag [#allocation5], %s4127_s7 }
 0x9bb   : > { %p4781_p1 = pnand %p7603_p2, %p7602_p12 }
 0x9bd   : > { %5019 = dma.done.wait (!%p4781_p1), %s4128_s25, 1024  }
 0x9be   : > { %5021 = vsyncadd (!%p4781_p1), %s4128_s25, 4294966272  ;;  %p19_p4 = scmp.ge.s32.totalorder %s5217_s11, 4   ;;  %s7604_s15 = smov %s5028_s16 }
 0x9bf   : > { %s7605_s16 = smov %s5032_s17  ;;  %s7606_s17 = smov %s5227_s13 }
 0x9c0   : > { %s7607_s18 = smov %s5217_s11  ;;  %21 = sbr.rel (!%p19_p4) target bundleno = 7 (0x7), region = 111 }
 0x9c7   :  { %4133 = vsyncpa [#allocation4], 1 }
 0x9c8   :  { %4135 = vsyncpa [#allocation4 + $0x1], 1 }
 0x9c9   :  { %4136 = vsyncpa [#allocation7], 1 }
 0x9ca   :  { %4137 = vsyncpa [#allocation10], 1 }
 0x9cb   :  { %4138 = vsyncpa [#allocation5], 1 }
 0x9cc   :  { %4140 = vsyncpa [#allocation5 + $0x1], 1 }

</bundles_post_ra>
